<compile_context>
chip_gen: v7x
topology: tpu7x:2x2x1
jax: 0.10.0
libtpu: 0.0.40
codegen_flags: <defaults>
</compile_context>

<pallas_src>
import functools
import math

import jax
import jax.numpy as jnp
from jax.experimental import pallas as pl
from jax.experimental.pallas import tpu as pltpu


def _gelu(v, approx):
    if approx:
        # tanh approximation -> EUP (own VLIW slot), cheap next to the VALU-bound taps.
        c = math.sqrt(2.0 / math.pi)
        return 0.5 * v * (1.0 + jnp.tanh(c * (v + 0.044715 * (v * v * v))))
    vf = v.astype(jnp.float32)
    out = 0.5 * vf * (1.0 + jax.lax.erf(vf * (1.0 / math.sqrt(2.0))))
    return out.astype(v.dtype)


def strip_block_kernel(
    x_top_ref,    # (1, 1, W, Cp)  halo row above the strip (clamped at image top)
    x_ref,        # (1, S, W, Cp)  main strip
    x_bot_ref,    # (1, 1, W, Cp)  halo row below the strip (clamped at image bottom)
    bn1_ref,      # (2, Cp)  row0 = scale, row1 = bias (folded eval-mode BN)
    bn2_ref,      # (2, Cp)
    ls_ref,       # (2, Cp)  row0 = layer_scale_1, row1 = layer_scale_2
    p1w_ref,      # (Cp, Cp)  bf16
    p1b_ref,      # (1, Cp)   f32
    p2w_ref,      # (Cp, Cp)  bf16
    p2b_ref,      # (1, Cp)
    fc1w_ref,     # (Cp, CHp) bf16
    fc1b_ref,     # (1, CHp)
    dww_ref,      # (9, CHp)  f32, 3x3 depthwise taps, row k = tap (k//3, k%3)
    dwb_ref,      # (1, CHp)
    fc2w_ref,     # (CHp, Cp) bf16
    fc2b_ref,     # (1, Cp)
    o_ref,        # (1, S, W, Cp)
    h_ref,        # scratch: (S+2, W, CHp) in mlp dtype (fc1 output, halo-extended)
    *,
    approx_gelu: bool,
):
    S, W, Cp = x_ref.shape[1], x_ref.shape[2], x_ref.shape[3]
    CHp = fc1w_ref.shape[1]
    SE = S + 2
    mdt = h_ref.dtype

    strip = pl.program_id(1)
    n_strips = pl.num_programs(1)

    # ---- hoisted parameter loads (no re-load / re-broadcast inside loops) ----
    bn1_s, bn1_b = bn1_ref[0, :], bn1_ref[1, :]
    bn2_s, bn2_b = bn2_ref[0, :], bn2_ref[1, :]
    ls1, ls2 = ls_ref[0, :], ls_ref[1, :]
    p1w, p2w = p1w_ref[...], p2w_ref[...]
    fc1w, fc2w = fc1w_ref[...], fc2w_ref[...]
    p1b, p2b = p1b_ref[0, :], p2b_ref[0, :]
    fc1b, fc2b = fc1b_ref[0, :], fc2b_ref[0, :]
    dww_m = dww_ref[...].astype(mdt)
    dwb_m = dwb_ref[0, :].astype(mdt)

    def pixel_chain(xc_raw):
        """attention branch: x -> x1 = x + ls1 * (proj2(gelu(proj1(bn1 x))) + bn1 x)."""
        xc = xc_raw.astype(jnp.float32)
        R = xc.shape[0]
        z = xc * bn1_s + bn1_b
        a = jnp.dot(z.reshape(R * W, Cp).astype(jnp.bfloat16), p1w,
                    preferred_element_type=jnp.float32) + p1b
        a = _gelu(a, approx_gelu)
        a = jnp.dot(a.astype(jnp.bfloat16), p2w,
                    preferred_element_type=jnp.float32) + p2b
        attn = a.reshape(R, W, Cp) + z          # residual inside Strip_Attention
        return xc + ls1 * attn                  # f32 residual

    def fc1_chain(x1c):
        """mlp head: x1 -> fc1(bn2 x1)."""
        R = x1c.shape[0]
        z2 = x1c * bn2_s + bn2_b
        hh = jnp.dot(z2.reshape(R * W, Cp).astype(jnp.bfloat16), fc1w,
                     preferred_element_type=jnp.float32) + fc1b
        return hh.reshape(R, W, CHp)

    # ---- main strip: attention branch, then fc1 staged straight into the scratch ----
    x1 = pixel_chain(x_ref[0])                                   # (S, W, Cp) f32, kept for residual
    h_ref[pl.ds(1, S)] = fc1_chain(x1).astype(mdt)

    # ---- halo rows: recomputed per strip (2 rows, negligible); zeroed at the image
    #      border so the 3x3 dwconv sees exact zero padding.  No full-strip concat. ----
    top_keep = (strip > 0).astype(jnp.float32)
    bot_keep = (strip + 1 < n_strips).astype(jnp.float32)
    halo = jnp.concatenate([x_top_ref[0], x_bot_ref[0]], axis=0)  # (2, W, Cp): tiny
    hh = fc1_chain(pixel_chain(halo))                             # (2, W, CHp)
    h_ref[0] = (hh[0] * top_keep).astype(mdt)
    h_ref[SE - 1] = (hh[1] * bot_keep).astype(mdt)

    # ---- 3x3 depthwise conv, padding=1: 9 fused FMAs straight off the scratch.
    #      Column neighbours via sublane roll (XLU) + edge masks; row neighbours via
    #      the halo rows.  Tap weights hoisted above. ----
    col = jax.lax.broadcasted_iota(jnp.int32, (1, W, 1), 1)
    not_first_col = col > 0
    not_last_col = col < W - 1
    acc = jnp.broadcast_to(dwb_m, (S, W, CHp))
    for di in range(3):
        rows = h_ref[pl.ds(di, S)]                                # (S, W, CHp), leading-axis slice
        left = jnp.where(not_first_col, pltpu.roll(rows, shift=1, axis=1), 0.0)
        right = jnp.where(not_last_col, pltpu.roll(rows, shift=W - 1, axis=1), 0.0)
        acc = acc + (left * dww_m[3 * di + 0]
                     + rows * dww_m[3 * di + 1]
                     + right * dww_m[3 * di + 2])

    g = _gelu(acc, approx_gelu)
    h2 = jnp.dot(g.reshape(S * W, CHp).astype(jnp.bfloat16), fc2w,
                 preferred_element_type=jnp.float32) + fc2b
    o_ref[0] = (x1 + ls2 * h2.reshape(S, W, Cp)).astype(o_ref.dtype)


def _round_up(n, m):
    return ((n + m - 1) // m) * m


def _vmem_capacity_bytes():
    """Per-core VMEM capacity (generation-aware), with conservative fallbacks."""
    try:
        cap = int(pltpu.get_tpu_info().vmem_capacity_bytes)
        if cap > 0:
            return cap
    except Exception:
        pass
    try:
        kind = jax.devices()[0].device_kind.lower()
        if "v7" in kind:
            return 64 * 1024 * 1024
    except Exception:
        pass
    return 128 * 1024 * 1024


def _footprint_bytes(S, W, Cp, CHp, io_bytes, mlp_bytes):
    """Analytic per-grid-step VMEM estimate (double-buffered I/O blocks,
    single-buffered weights, h scratch, live elementwise/matmul intermediates)."""
    weights = 2 * (2 * Cp * Cp + 2 * Cp * CHp)          # bf16 matmul weights, 1-buffered
    weights += 4 * (8 * Cp + 12 * CHp)                   # f32 BN / ls / biases / taps
    io = 2 * 2 * S * W * Cp * io_bytes                   # main in + out blocks, 2-buffered
    io += 2 * 2 * W * Cp * io_bytes                      # halo row blocks
    h_scr = (S + 2) * W * CHp * mlp_bytes                # fc1 scratch
    live = S * W * (3 * Cp * 4 + CHp * 4 + 3 * CHp * mlp_bytes)
    return weights + io + h_scr + live + (2 << 20)       # ~2 MiB slack


def _pick_strip_rows(N, H, W, Cp, CHp, io_bytes, mlp_bytes, budget):
    """Largest divisor of H whose per-step footprint fits the VMEM budget.
    When N >= 2 the batch axis alone feeds both v7x cores, so S may reach H;
    when N == 1 keep >= 2 strips (if H >= 2) so the strip axis can be sharded."""
    max_rows = H if N >= 2 else max(1, H // 2)
    best = 1
    for S in range(1, max_rows + 1):
        if H % S == 0 and _footprint_bytes(S, W, Cp, CHp, io_bytes, mlp_bytes) <= budget:
            best = S
    return best


def strip_block_pallas(x_nhwc, params, *, strip_rows=None, approx_gelu=False,
                       mlp_dtype=jnp.float32, vmem_budget_bytes=None):
    """Fused StripBlock forward.

    approx_gelu=True : tanh GELU (EUP) instead of exact erf (small numeric deviation).
    mlp_dtype=bf16   : run the dwconv/GELU chain + its scratch in bf16 (v6e/v7x only;
                       keep f32 on v5e, which has no bf16 VPU/EUP).
    """
    N, H, W, C = x_nhwc.shape
    CH = params["fc1w"].shape[1]

    LANE = 128  # v5e MXU-native; on v6e/v7x (256-wide MXU) real dims >=256 stay aligned.
    Cp = _round_up(C, LANE)
    CHp = _round_up(CH, LANE)

    io_bytes = jnp.dtype(x_nhwc.dtype).itemsize
    mlp_bytes = jnp.dtype(mlp_dtype).itemsize
    budget = int(vmem_budget_bytes or max(32 * 1024 * 1024,
                                          (_vmem_capacity_bytes() * 3) // 4))

    S = strip_rows or _pick_strip_rows(N, H, W, Cp, CHp, io_bytes, mlp_bytes, budget)
    assert H % S == 0, "strip_rows must divide H"
    n_strips = H // S

    f32, bf16 = jnp.float32, jnp.bfloat16

    def pad_to(a, shape):
        # Skip the pad entirely when already the right shape (no extra HBM pass).
        if tuple(a.shape) == tuple(shape):
            return a
        return jnp.pad(a, [(0, t - s) for s, t in zip(a.shape, shape)])

    # Lane-dense channel padding.  Zero-padded channels stay exactly zero through the
    # whole block.  When chaining StripBlocks, keep the padded NHWC layout across
    # blocks so this pad / the final slice happen once per network, not per block.
    x_p = pad_to(x_nhwc, (N, H, W, Cp))            # keep caller dtype (bf16 I/O halves HBM traffic)
    bn1 = pad_to(params["bn1"], (2, Cp)).astype(f32)
    bn2 = pad_to(params["bn2"], (2, Cp)).astype(f32)
    ls = pad_to(params["ls"], (2, Cp)).astype(f32)
    p1w = pad_to(params["p1w"], (Cp, Cp)).astype(bf16)
    p1b = pad_to(params["p1b"], (1, Cp)).astype(f32)
    p2w = pad_to(params["p2w"], (Cp, Cp)).astype(bf16)
    p2b = pad_to(params["p2b"], (1, Cp)).astype(f32)
    fc1w = pad_to(params["fc1w"], (Cp, CHp)).astype(bf16)
    fc1b = pad_to(params["fc1b"], (1, CHp)).astype(f32)
    dww = pad_to(params["dww"], (9, CHp)).astype(f32)
    dwb = pad_to(params["dwb"], (1, CHp)).astype(f32)
    fc2w = pad_to(params["fc2w"], (CHp, Cp)).astype(bf16)
    fc2b = pad_to(params["fc2b"], (1, Cp)).astype(f32)

    def const_spec(shape):
        # Constant index map -> single buffer (double-buffering would only waste VMEM).
        rank = len(shape)
        return pl.BlockSpec(shape, lambda n, i, _r=rank: (0,) * _r,
                            pipeline_mode=pl.Buffered(1))

    # x is passed three times: main strip + two 1-row halo blocks whose row index is
    # clamped at the image edges (the kernel zeroes them there).
    in_specs = [
        pl.BlockSpec((1, 1, W, Cp),
                     lambda n, i: (n, jnp.maximum(i * S - 1, 0), 0, 0)),
        pl.BlockSpec((1, S, W, Cp), lambda n, i: (n, i, 0, 0)),
        pl.BlockSpec((1, 1, W, Cp),
                     lambda n, i: (n, jnp.minimum((i + 1) * S, H - 1), 0, 0)),
        const_spec((2, Cp)),    # bn1
        const_spec((2, Cp)),    # bn2
        const_spec((2, Cp)),    # layer scales
        const_spec((Cp, Cp)),   # p1w (bf16)
        const_spec((1, Cp)),    # p1b
        const_spec((Cp, Cp)),   # p2w (bf16)
        const_spec((1, Cp)),    # p2b
        const_spec((Cp, CHp)),  # fc1w (bf16)
        const_spec((1, CHp)),   # fc1b
        const_spec((9, CHp)),   # dww
        const_spec((1, CHp)),   # dwb
        const_spec((CHp, Cp)),  # fc2w (bf16)
        const_spec((1, Cp)),    # fc2b
    ]

    kernel = functools.partial(strip_block_kernel, approx_gelu=bool(approx_gelu))

    out_p = pl.pallas_call(
        kernel,
        out_shape=jax.ShapeDtypeStruct((N, H, W, Cp), x_nhwc.dtype),
        grid=(N, n_strips),
        in_specs=in_specs,
        out_specs=pl.BlockSpec((1, S, W, Cp), lambda n, i: (n, i, 0, 0)),
        scratch_shapes=[pltpu.VMEM((S + 2, W, CHp), mlp_dtype)],
        compiler_params=pltpu.CompilerParams(
            dimension_semantics=("parallel", "parallel"),
            vmem_limit_bytes=budget,          # generation-aware (~48 MiB v7x, ~96 MiB v5e/v6e)
        ),
    )(
        x_p, x_p, x_p,
        bn1, bn2, ls,
        p1w, p1b, p2w, p2b,
        fc1w, fc1b, dww, dwb, fc2w, fc2b,
    )
    return out_p if Cp == C else out_p[..., :C]


def strip_block_reference(x_nhwc, params, *, approx_gelu=False):
    """Pure-JAX f32 reference (same math, no Pallas) for validation."""
    N, H, W, C = x_nhwc.shape
    CH = params["fc1w"].shape[1]
    x = x_nhwc.astype(jnp.float32)

    z = x * params["bn1"][0] + params["bn1"][1]
    a = jnp.einsum("nhwc,cd->nhwd", z, params["p1w"]) + params["p1b"][0]
    a = _gelu(a, approx_gelu)
    a = jnp.einsum("nhwc,cd->nhwd", a, params["p2w"]) + params["p2b"][0]
    attn = a + z
    x1 = x + params["ls"][0] * attn

    z2 = x1 * params["bn2"][0] + params["bn2"][1]
    h = jnp.einsum("nhwc,cd->nhwd", z2, params["fc1w"]) + params["fc1b"][0]
    hp = jnp.pad(h, ((0, 0), (1, 1), (1, 1), (0, 0)))
    acc = jnp.broadcast_to(params["dwb"][0], (N, H, W, CH))
    for k in range(9):
        di, dj = k // 3, k % 3
        acc = acc + hp[:, di:di + H, dj:dj + W, :] * params["dww"][k]
    h = _gelu(acc, approx_gelu)
    h2 = jnp.einsum("nhwc,cd->nhwd", h, params["fc2w"]) + params["fc2b"][0]
    return x1 + params["ls"][1] * h2


def make_params(key, dim, mlp_ratio=4.0):
    hidden = int(dim * mlp_ratio)
    ks = jax.random.split(key, 16)

    def nrm(k, shape, s=0.1):
        return (s * jax.random.normal(k, shape)).astype(jnp.float32)

    # folded eval-mode BatchNorm: scale = gamma/sqrt(var+eps), bias = beta - mean*scale
    def bn(k):
        k1, k2, k3, k4 = jax.random.split(k, 4)
        gamma = 1.0 + nrm(k1, (dim,))
        beta = nrm(k2, (dim,))
        mean = nrm(k3, (dim,))
        var = 1.0 + jnp.abs(nrm(k4, (dim,)))
        scale = gamma / jnp.sqrt(var + 1e-5)
        bias = beta - mean * scale
        return jnp.stack([scale, bias], axis=0)

    return {
        "bn1": bn(ks[0]),
        "bn2": bn(ks[1]),
        "p1w": nrm(ks[2], (dim, dim)),
        "p1b": nrm(ks[3], (1, dim)),
        "p2w": nrm(ks[4], (dim, dim)),
        "p2b": nrm(ks[5], (1, dim)),
        "fc1w": nrm(ks[6], (dim, hidden)),
        "fc1b": nrm(ks[7], (1, hidden)),
        "dww": nrm(ks[8], (9, hidden)),
        "dwb": nrm(ks[9], (1, hidden)),
        "fc2w": nrm(ks[10], (hidden, dim)),
        "fc2b": nrm(ks[11], (1, dim)),
        # layer_scale is a trained parameter (module init is 0.01); O(0.1) values make
        # the numerical check against the f32 reference meaningful.
        "ls": jnp.stack([0.10 * jnp.ones((dim,), jnp.float32),
                         0.15 * jnp.ones((dim,), jnp.float32)], axis=0),
    }


if __name__ == "__main__":
    N, C, H, W = 2, 8, 16, 16  # module takes NCHW input
    key = jax.random.PRNGKey(0)
    kx, kp = jax.random.split(key)

    x_nchw = jax.random.normal(kx, (N, C, H, W), dtype=jnp.float32)
    params = make_params(kp, dim=C, mlp_ratio=4.0)

    # layout conversion: NCHW (PyTorch) -> NHWC (kernel layout)
    x_nhwc = jnp.transpose(x_nchw, (0, 2, 3, 1))

    # Defaults: exact erf GELU, f32 elementwise chain -> matches PyTorch semantics.
    out_nhwc = jax.block_until_ready(strip_block_pallas(x_nhwc, params))
    out_nchw = jnp.transpose(out_nhwc, (0, 3, 1, 2))

    ref = jax.block_until_ready(strip_block_reference(x_nhwc, params))

    assert out_nhwc.shape == (N, H, W, C)
    assert out_nchw.shape == (N, C, H, W)
    # bf16 MXU operands vs f32 reference -> slightly looser tolerance than pure f32.
    assert jnp.allclose(out_nhwc, ref, rtol=5e-3, atol=5e-3), "mismatch vs reference"

    print("KERNEL_OK")
</pallas_src>

<mosaic_0001>
module attributes {stable_mosaic.version = 11 : i64} {
  func.func @strip_block_kernel(%arg0: i32, %arg1: i32, %arg2: memref<1x1x16x128xf32, #tpu.memory_space<vmem>>, %arg3: memref<1x16x16x128xf32, #tpu.memory_space<vmem>>, %arg4: memref<1x1x16x128xf32, #tpu.memory_space<vmem>>, %arg5: memref<2x128xf32, #tpu.memory_space<vmem>>, %arg6: memref<2x128xf32, #tpu.memory_space<vmem>>, %arg7: memref<2x128xf32, #tpu.memory_space<vmem>>, %arg8: memref<128x128xbf16, #tpu.memory_space<vmem>>, %arg9: memref<1x128xf32, #tpu.memory_space<vmem>>, %arg10: memref<128x128xbf16, #tpu.memory_space<vmem>>, %arg11: memref<1x128xf32, #tpu.memory_space<vmem>>, %arg12: memref<128x128xbf16, #tpu.memory_space<vmem>>, %arg13: memref<1x128xf32, #tpu.memory_space<vmem>>, %arg14: memref<9x128xf32, #tpu.memory_space<vmem>>, %arg15: memref<1x128xf32, #tpu.memory_space<vmem>>, %arg16: memref<128x128xbf16, #tpu.memory_space<vmem>>, %arg17: memref<1x128xf32, #tpu.memory_space<vmem>>, %arg18: memref<1x16x16x128xf32, #tpu.memory_space<vmem>>, %arg19: memref<18x16x128xf32, #tpu.memory_space<vmem>>) attributes {dimension_semantics = [#tpu.dimension_semantics<parallel>, #tpu.dimension_semantics<parallel>], iteration_bounds = array<i64: 2, 1>, scalar_prefetch = 0 : i64, scratch_operands = 1 : i64, tpu.core_type = #tpu.core_type<tc>, window_params = [{transform_indices = @transform_0, window_bounds = array<i64: 1, 1, 16, 128>}, {transform_indices = @transform_1, window_bounds = array<i64: 1, 16, 16, 128>}, {transform_indices = @transform_2, window_bounds = array<i64: 1, 1, 16, 128>}, {pipeline_mode = #tpu.pipeline_mode<synchronous>, transform_indices = @transform_3, window_bounds = array<i64: 2, 128>}, {pipeline_mode = #tpu.pipeline_mode<synchronous>, transform_indices = @transform_4, window_bounds = array<i64: 2, 128>}, {pipeline_mode = #tpu.pipeline_mode<synchronous>, transform_indices = @transform_5, window_bounds = array<i64: 2, 128>}, {pipeline_mode = #tpu.pipeline_mode<synchronous>, transform_indices = @transform_6, window_bounds = array<i64: 128, 128>}, {pipeline_mode = #tpu.pipeline_mode<synchronous>, transform_indices = @transform_7, window_bounds = array<i64: 1, 128>}, {pipeline_mode = #tpu.pipeline_mode<synchronous>, transform_indices = @transform_8, window_bounds = array<i64: 128, 128>}, {pipeline_mode = #tpu.pipeline_mode<synchronous>, transform_indices = @transform_9, window_bounds = array<i64: 1, 128>}, {pipeline_mode = #tpu.pipeline_mode<synchronous>, transform_indices = @transform_10, window_bounds = array<i64: 128, 128>}, {pipeline_mode = #tpu.pipeline_mode<synchronous>, transform_indices = @transform_11, window_bounds = array<i64: 1, 128>}, {pipeline_mode = #tpu.pipeline_mode<synchronous>, transform_indices = @transform_12, window_bounds = array<i64: 9, 128>}, {pipeline_mode = #tpu.pipeline_mode<synchronous>, transform_indices = @transform_13, window_bounds = array<i64: 1, 128>}, {pipeline_mode = #tpu.pipeline_mode<synchronous>, transform_indices = @transform_14, window_bounds = array<i64: 128, 128>}, {pipeline_mode = #tpu.pipeline_mode<synchronous>, transform_indices = @transform_15, window_bounds = array<i64: 1, 128>}, {transform_indices = @transform_16, window_bounds = array<i64: 1, 16, 16, 128>}]} {
    %c0 = arith.constant 0 : index
    %c0_0 = arith.constant 0 : index
    %0 = vector.load %arg5[%c0, %c0_0] : memref<2x128xf32, #tpu.memory_space<vmem>>, vector<1x128xf32>
    %1 = vector.shape_cast %0 : vector<1x128xf32> to vector<128xf32>
    %c1 = arith.constant 1 : index
    %c0_1 = arith.constant 0 : index
    %2 = vector.load %arg5[%c1, %c0_1] : memref<2x128xf32, #tpu.memory_space<vmem>>, vector<1x128xf32>
    %3 = vector.shape_cast %2 : vector<1x128xf32> to vector<128xf32>
    %c0_2 = arith.constant 0 : index
    %c0_3 = arith.constant 0 : index
    %4 = vector.load %arg6[%c0_2, %c0_3] : memref<2x128xf32, #tpu.memory_space<vmem>>, vector<1x128xf32>
    %5 = vector.shape_cast %4 : vector<1x128xf32> to vector<128xf32>
    %c1_4 = arith.constant 1 : index
    %c0_5 = arith.constant 0 : index
    %6 = vector.load %arg6[%c1_4, %c0_5] : memref<2x128xf32, #tpu.memory_space<vmem>>, vector<1x128xf32>
    %7 = vector.shape_cast %6 : vector<1x128xf32> to vector<128xf32>
    %c0_6 = arith.constant 0 : index
    %c0_7 = arith.constant 0 : index
    %8 = vector.load %arg7[%c0_6, %c0_7] : memref<2x128xf32, #tpu.memory_space<vmem>>, vector<1x128xf32>
    %9 = vector.shape_cast %8 : vector<1x128xf32> to vector<128xf32>
    %c1_8 = arith.constant 1 : index
    %c0_9 = arith.constant 0 : index
    %10 = vector.load %arg7[%c1_8, %c0_9] : memref<2x128xf32, #tpu.memory_space<vmem>>, vector<1x128xf32>
    %11 = vector.shape_cast %10 : vector<1x128xf32> to vector<128xf32>
    %c0_10 = arith.constant 0 : index
    %c0_11 = arith.constant 0 : index
    %12 = vector.load %arg8[%c0_10, %c0_11] : memref<128x128xbf16, #tpu.memory_space<vmem>>, vector<128x128xbf16>
    %c0_12 = arith.constant 0 : index
    %c0_13 = arith.constant 0 : index
    %13 = vector.load %arg10[%c0_12, %c0_13] : memref<128x128xbf16, #tpu.memory_space<vmem>>, vector<128x128xbf16>
    %c0_14 = arith.constant 0 : index
    %c0_15 = arith.constant 0 : index
    %14 = vector.load %arg12[%c0_14, %c0_15] : memref<128x128xbf16, #tpu.memory_space<vmem>>, vector<128x128xbf16>
    %c0_16 = arith.constant 0 : index
    %c0_17 = arith.constant 0 : index
    %15 = vector.load %arg16[%c0_16, %c0_17] : memref<128x128xbf16, #tpu.memory_space<vmem>>, vector<128x128xbf16>
    %c0_18 = arith.constant 0 : index
    %c0_19 = arith.constant 0 : index
    %16 = vector.load %arg9[%c0_18, %c0_19] : memref<1x128xf32, #tpu.memory_space<vmem>>, vector<1x128xf32>
    %17 = vector.shape_cast %16 : vector<1x128xf32> to vector<128xf32>
    %c0_20 = arith.constant 0 : index
    %c0_21 = arith.constant 0 : index
    %18 = vector.load %arg11[%c0_20, %c0_21] : memref<1x128xf32, #tpu.memory_space<vmem>>, vector<1x128xf32>
    %19 = vector.shape_cast %18 : vector<1x128xf32> to vector<128xf32>
    %c0_22 = arith.constant 0 : index
    %c0_23 = arith.constant 0 : index
    %20 = vector.load %arg13[%c0_22, %c0_23] : memref<1x128xf32, #tpu.memory_space<vmem>>, vector<1x128xf32>
    %21 = vector.shape_cast %20 : vector<1x128xf32> to vector<128xf32>
    %c0_24 = arith.constant 0 : index
    %c0_25 = arith.constant 0 : index
    %22 = vector.load %arg17[%c0_24, %c0_25] : memref<1x128xf32, #tpu.memory_space<vmem>>, vector<1x128xf32>
    %23 = vector.shape_cast %22 : vector<1x128xf32> to vector<128xf32>
    %c0_26 = arith.constant 0 : index
    %c0_27 = arith.constant 0 : index
    %24 = vector.load %arg14[%c0_26, %c0_27] : memref<9x128xf32, #tpu.memory_space<vmem>>, vector<9x128xf32>
    %c0_28 = arith.constant 0 : index
    %c0_29 = arith.constant 0 : index
    %25 = vector.load %arg15[%c0_28, %c0_29] : memref<1x128xf32, #tpu.memory_space<vmem>>, vector<1x128xf32>
    %26 = vector.shape_cast %25 : vector<1x128xf32> to vector<128xf32>
    %c0_30 = arith.constant 0 : index
    %c0_31 = arith.constant 0 : index
    %c0_32 = arith.constant 0 : index
    %c0_33 = arith.constant 0 : index
    %27 = vector.load %arg3[%c0_30, %c0_31, %c0_32, %c0_33] : memref<1x16x16x128xf32, #tpu.memory_space<vmem>>, vector<1x16x16x128xf32>
    %28 = vector.shape_cast %27 : vector<1x16x16x128xf32> to vector<16x16x128xf32>
    %29 = vector.shape_cast %1 : vector<128xf32> to vector<1x1x128xf32>
    %30 = vector.broadcast %29 : vector<1x1x128xf32> to vector<16x16x128xf32>
    %31 = arith.mulf %28, %30 : vector<16x16x128xf32>
    %32 = vector.shape_cast %3 : vector<128xf32> to vector<1x1x128xf32>
    %33 = vector.broadcast %32 : vector<1x1x128xf32> to vector<16x16x128xf32>
    %34 = arith.addf %31, %33 : vector<16x16x128xf32>
    %35 = vector.shape_cast %34 : vector<16x16x128xf32> to vector<256x128xf32>
    %36 = arith.truncf %35 : vector<256x128xf32> to vector<256x128xbf16>
    %cst = arith.constant dense<0.000000e+00> : vector<256x128xf32>
    %37 = tpu.matmul %36, %12, %cst {dimension_numbers = #tpu.dot_dimension_numbers<[1], [0], [0], [1], [0, 0, 1, 1], [], []>} : vector<256x128xbf16>, vector<128x128xbf16>, vector<256x128xf32> -> vector<256x128xf32>
    %38 = vector.shape_cast %17 : vector<128xf32> to vector<1x128xf32>
    %39 = vector.broadcast %38 : vector<1x128xf32> to vector<256x128xf32>
    %40 = arith.addf %37, %39 : vector<256x128xf32>
    %cst_34 = arith.constant 5.000000e-01 : f32
    %41 = vector.broadcast %cst_34 : f32 to vector<256x128xf32>
    %42 = arith.mulf %41, %40 : vector<256x128xf32>
    %cst_35 = arith.constant 0.707106769 : f32
    %43 = vector.broadcast %cst_35 : f32 to vector<256x128xf32>
    %44 = arith.mulf %40, %43 : vector<256x128xf32>
    %45 = math.erf %44 : vector<256x128xf32>
    %cst_36 = arith.constant 1.000000e+00 : f32
    %46 = vector.broadcast %cst_36 : f32 to vector<256x128xf32>
    %47 = arith.addf %46, %45 : vector<256x128xf32>
    %48 = arith.mulf %42, %47 : vector<256x128xf32>
    %49 = arith.truncf %48 : vector<256x128xf32> to vector<256x128xbf16>
    %cst_37 = arith.constant dense<0.000000e+00> : vector<256x128xf32>
    %50 = tpu.matmul %49, %13, %cst_37 {dimension_numbers = #tpu.dot_dimension_numbers<[1], [0], [0], [1], [0, 0, 1, 1], [], []>} : vector<256x128xbf16>, vector<128x128xbf16>, vector<256x128xf32> -> vector<256x128xf32>
    %51 = vector.shape_cast %19 : vector<128xf32> to vector<1x128xf32>
    %52 = vector.broadcast %51 : vector<1x128xf32> to vector<256x128xf32>
    %53 = arith.addf %50, %52 : vector<256x128xf32>
    %54 = vector.shape_cast %53 : vector<256x128xf32> to vector<16x16x128xf32>
    %55 = arith.addf %54, %34 : vector<16x16x128xf32>
    %56 = vector.shape_cast %9 : vector<128xf32> to vector<1x1x128xf32>
    %57 = vector.broadcast %56 : vector<1x1x128xf32> to vector<16x16x128xf32>
    %58 = arith.mulf %57, %55 : vector<16x16x128xf32>
    %59 = arith.addf %28, %58 : vector<16x16x128xf32>
    %60 = vector.shape_cast %5 : vector<128xf32> to vector<1x1x128xf32>
    %61 = vector.broadcast %60 : vector<1x1x128xf32> to vector<16x16x128xf32>
    %62 = arith.mulf %59, %61 : vector<16x16x128xf32>
    %63 = vector.shape_cast %7 : vector<128xf32> to vector<1x1x128xf32>
    %64 = vector.broadcast %63 : vector<1x1x128xf32> to vector<16x16x128xf32>
    %65 = arith.addf %62, %64 : vector<16x16x128xf32>
    %66 = vector.shape_cast %65 : vector<16x16x128xf32> to vector<256x128xf32>
    %67 = arith.truncf %66 : vector<256x128xf32> to vector<256x128xbf16>
    %cst_38 = arith.constant dense<0.000000e+00> : vector<256x128xf32>
    %68 = tpu.matmul %67, %14, %cst_38 {dimension_numbers = #tpu.dot_dimension_numbers<[1], [0], [0], [1], [0, 0, 1, 1], [], []>} : vector<256x128xbf16>, vector<128x128xbf16>, vector<256x128xf32> -> vector<256x128xf32>
    %69 = vector.shape_cast %21 : vector<128xf32> to vector<1x128xf32>
    %70 = vector.broadcast %69 : vector<1x128xf32> to vector<256x128xf32>
    %71 = arith.addf %68, %70 : vector<256x128xf32>
    %72 = vector.shape_cast %71 : vector<256x128xf32> to vector<16x16x128xf32>
    %c1_39 = arith.constant 1 : index
    %c0_40 = arith.constant 0 : index
    %c0_41 = arith.constant 0 : index
    %73 = vector.load %arg19[%c1_39, %c0_40, %c0_41] : memref<18x16x128xf32, #tpu.memory_space<vmem>>, vector<16x16x128xf32>
    tpu.vector_store %arg19[%c1_39, %c0_40, %c0_41], %72 {strides = array<i32>} : memref<18x16x128xf32, #tpu.memory_space<vmem>>, vector<16x16x128xf32>,
    %c0_i32 = arith.constant 0 : i32
    %74 = arith.cmpi sgt, %arg1, %c0_i32 : i32
    %75 = arith.extui %74 : i1 to i32
    %76 = arith.sitofp %75 : i32 to f32
    %c1_i32 = arith.constant 1 : i32
    %77 = arith.addi %arg1, %c1_i32 : i32
    %c1_i32_42 = arith.constant 1 : i32
    %78 = arith.cmpi slt, %77, %c1_i32_42 : i32
    %79 = arith.extui %78 : i1 to i32
    %80 = arith.sitofp %79 : i32 to f32
    %c0_43 = arith.constant 0 : index
    %c0_44 = arith.constant 0 : index
    %c0_45 = arith.constant 0 : index
    %c0_46 = arith.constant 0 : index
    %81 = vector.load %arg2[%c0_43, %c0_44, %c0_45, %c0_46] : memref<1x1x16x128xf32, #tpu.memory_space<vmem>>, vector<1x1x16x128xf32>
    %82 = vector.shape_cast %81 : vector<1x1x16x128xf32> to vector<1x16x128xf32>
    %c0_47 = arith.constant 0 : index
    %c0_48 = arith.constant 0 : index
    %c0_49 = arith.constant 0 : index
    %c0_50 = arith.constant 0 : index
    %83 = vector.load %arg4[%c0_47, %c0_48, %c0_49, %c0_50] : memref<1x1x16x128xf32, #tpu.memory_space<vmem>>, vector<1x1x16x128xf32>
    %84 = vector.shape_cast %83 : vector<1x1x16x128xf32> to vector<1x16x128xf32>
    %85 = tpu.concatenate %82, %84 in 0 : vector<1x16x128xf32>, vector<1x16x128xf32> -> vector<2x16x128xf32>
    %86 = vector.shape_cast %1 : vector<128xf32> to vector<1x1x128xf32>
    %87 = vector.broadcast %86 : vector<1x1x128xf32> to vector<2x16x128xf32>
    %88 = arith.mulf %85, %87 : vector<2x16x128xf32>
    %89 = vector.shape_cast %3 : vector<128xf32> to vector<1x1x128xf32>
    %90 = vector.broadcast %89 : vector<1x1x128xf32> to vector<2x16x128xf32>
    %91 = arith.addf %88, %90 : vector<2x16x128xf32>
    %92 = vector.shape_cast %91 : vector<2x16x128xf32> to vector<32x128xf32>
    %93 = arith.truncf %92 : vector<32x128xf32> to vector<32x128xbf16>
    %cst_51 = arith.constant dense<0.000000e+00> : vector<32x128xf32>
    %94 = tpu.matmul %93, %12, %cst_51 {dimension_numbers = #tpu.dot_dimension_numbers<[1], [0], [0], [1], [0, 0, 1, 1], [], []>} : vector<32x128xbf16>, vector<128x128xbf16>, vector<32x128xf32> -> vector<32x128xf32>
    %95 = vector.shape_cast %17 : vector<128xf32> to vector<1x128xf32>
    %96 = vector.broadcast %95 : vector<1x128xf32> to vector<32x128xf32>
    %97 = arith.addf %94, %96 : vector<32x128xf32>
    %cst_52 = arith.constant 5.000000e-01 : f32
    %98 = vector.broadcast %cst_52 : f32 to vector<32x128xf32>
    %99 = arith.mulf %98, %97 : vector<32x128xf32>
    %cst_53 = arith.constant 0.707106769 : f32
    %100 = vector.broadcast %cst_53 : f32 to vector<32x128xf32>
    %101 = arith.mulf %97, %100 : vector<32x128xf32>
    %102 = math.erf %101 : vector<32x128xf32>
    %cst_54 = arith.constant 1.000000e+00 : f32
    %103 = vector.broadcast %cst_54 : f32 to vector<32x128xf32>
    %104 = arith.addf %103, %102 : vector<32x128xf32>
    %105 = arith.mulf %99, %104 : vector<32x128xf32>
    %106 = arith.truncf %105 : vector<32x128xf32> to vector<32x128xbf16>
    %cst_55 = arith.constant dense<0.000000e+00> : vector<32x128xf32>
    %107 = tpu.matmul %106, %13, %cst_55 {dimension_numbers = #tpu.dot_dimension_numbers<[1], [0], [0], [1], [0, 0, 1, 1], [], []>} : vector<32x128xbf16>, vector<128x128xbf16>, vector<32x128xf32> -> vector<32x128xf32>
    %108 = vector.shape_cast %19 : vector<128xf32> to vector<1x128xf32>
    %109 = vector.broadcast %108 : vector<1x128xf32> to vector<32x128xf32>
    %110 = arith.addf %107, %109 : vector<32x128xf32>
    %111 = vector.shape_cast %110 : vector<32x128xf32> to vector<2x16x128xf32>
    %112 = arith.addf %111, %91 : vector<2x16x128xf32>
    %113 = vector.shape_cast %9 : vector<128xf32> to vector<1x1x128xf32>
    %114 = vector.broadcast %113 : vector<1x1x128xf32> to vector<2x16x128xf32>
    %115 = arith.mulf %114, %112 : vector<2x16x128xf32>
    %116 = arith.addf %85, %115 : vector<2x16x128xf32>
    %117 = vector.shape_cast %5 : vector<128xf32> to vector<1x1x128xf32>
    %118 = vector.broadcast %117 : vector<1x1x128xf32> to vector<2x16x128xf32>
    %119 = arith.mulf %116, %118 : vector<2x16x128xf32>
    %120 = vector.shape_cast %7 : vector<128xf32> to vector<1x1x128xf32>
    %121 = vector.broadcast %120 : vector<1x1x128xf32> to vector<2x16x128xf32>
    %122 = arith.addf %119, %121 : vector<2x16x128xf32>
    %123 = vector.shape_cast %122 : vector<2x16x128xf32> to vector<32x128xf32>
    %124 = arith.truncf %123 : vector<32x128xf32> to vector<32x128xbf16>
    %cst_56 = arith.constant dense<0.000000e+00> : vector<32x128xf32>
    %125 = tpu.matmul %124, %14, %cst_56 {dimension_numbers = #tpu.dot_dimension_numbers<[1], [0], [0], [1], [0, 0, 1, 1], [], []>} : vector<32x128xbf16>, vector<128x128xbf16>, vector<32x128xf32> -> vector<32x128xf32>
    %126 = vector.shape_cast %21 : vector<128xf32> to vector<1x128xf32>
    %127 = vector.broadcast %126 : vector<1x128xf32> to vector<32x128xf32>
    %128 = arith.addf %125, %127 : vector<32x128xf32>
    %129 = vector.shape_cast %128 : vector<32x128xf32> to vector<2x16x128xf32>
    %130 = vector.extract_strided_slice %129 {offsets = [0, 0, 0], sizes = [1, 16, 128], strides = [1, 1, 1]} : vector<2x16x128xf32> to vector<1x16x128xf32>
    %131 = vector.shape_cast %130 : vector<1x16x128xf32> to vector<16x128xf32>
    %132 = vector.broadcast %76 : f32 to vector<16x128xf32>
    %133 = arith.mulf %131, %132 : vector<16x128xf32>
    %c0_57 = arith.constant 0 : index
    %c0_58 = arith.constant 0 : index
    %c0_59 = arith.constant 0 : index
    %134 = vector.load %arg19[%c0_57, %c0_58, %c0_59] : memref<18x16x128xf32, #tpu.memory_space<vmem>>, vector<1x16x128xf32>
    %135 = vector.shape_cast %134 : vector<1x16x128xf32> to vector<16x128xf32>
    %136 = vector.shape_cast %133 : vector<16x128xf32> to vector<1x16x128xf32>
    tpu.vector_store %arg19[%c0_57, %c0_58, %c0_59], %136 {strides = array<i32>} : memref<18x16x128xf32, #tpu.memory_space<vmem>>, vector<1x16x128xf32>,
    %137 = vector.extract_strided_slice %129 {offsets = [1, 0, 0], sizes = [1, 16, 128], strides = [1, 1, 1]} : vector<2x16x128xf32> to vector<1x16x128xf32>
    %138 = vector.shape_cast %137 : vector<1x16x128xf32> to vector<16x128xf32>
    %139 = vector.broadcast %80 : f32 to vector<16x128xf32>
    %140 = arith.mulf %138, %139 : vector<16x128xf32>
    %c17 = arith.constant 17 : index
    %c0_60 = arith.constant 0 : index
    %c0_61 = arith.constant 0 : index
    %141 = vector.load %arg19[%c17, %c0_60, %c0_61] : memref<18x16x128xf32, #tpu.memory_space<vmem>>, vector<1x16x128xf32>
    %142 = vector.shape_cast %141 : vector<1x16x128xf32> to vector<16x128xf32>
    %143 = vector.shape_cast %140 : vector<16x128xf32> to vector<1x16x128xf32>
    tpu.vector_store %arg19[%c17, %c0_60, %c0_61], %143 {strides = array<i32>} : memref<18x16x128xf32, #tpu.memory_space<vmem>>, vector<1x16x128xf32>,
    %144 = tpu.iota {dimensions = array<i32: 1>} : vector<1x16x1xi32>
    %c0_i32_62 = arith.constant 0 : i32
    %145 = vector.broadcast %c0_i32_62 : i32 to vector<1x16x1xi32>
    %146 = arith.cmpi sgt, %144, %145 : vector<1x16x1xi32>
    %c15_i32 = arith.constant 15 : i32
    %147 = vector.broadcast %c15_i32 : i32 to vector<1x16x1xi32>
    %148 = arith.cmpi slt, %144, %147 : vector<1x16x1xi32>
    %149 = vector.shape_cast %26 : vector<128xf32> to vector<1x1x128xf32>
    %150 = vector.broadcast %149 : vector<1x1x128xf32> to vector<16x16x128xf32>
    %c0_63 = arith.constant 0 : index
    %c0_64 = arith.constant 0 : index
    %c0_65 = arith.constant 0 : index
    %151 = vector.load %arg19[%c0_63, %c0_64, %c0_65] : memref<18x16x128xf32, #tpu.memory_space<vmem>>, vector<16x16x128xf32>
    %c1_i32_66 = arith.constant 1 : i32
    %152 = tpu.dynamic_rotate %151 by %c1_i32_66 dim 1 : vector<16x16x128xf32>, i32 -> vector<16x16x128xf32>
    %cst_67 = arith.constant 0.000000e+00 : f32
    %153 = vector.shape_cast %146 : vector<1x16x1xi1> to vector<1x16x1xi1>
    %154 = vector.broadcast %153 : vector<1x16x1xi1> to vector<16x16x128xi1>
    %155 = vector.broadcast %cst_67 : f32 to vector<16x16x128xf32>
    %156 = arith.select %154, %152, %155 : vector<16x16x128xi1>, vector<16x16x128xf32>
    %c15_i32_68 = arith.constant 15 : i32
    %157 = tpu.dynamic_rotate %151 by %c15_i32_68 dim 1 : vector<16x16x128xf32>, i32 -> vector<16x16x128xf32>
    %cst_69 = arith.constant 0.000000e+00 : f32
    %158 = vector.shape_cast %148 : vector<1x16x1xi1> to vector<1x16x1xi1>
    %159 = vector.broadcast %158 : vector<1x16x1xi1> to vector<16x16x128xi1>
    %160 = vector.broadcast %cst_69 : f32 to vector<16x16x128xf32>
    %161 = arith.select %159, %157, %160 : vector<16x16x128xi1>, vector<16x16x128xf32>
    %162 = vector.extract_strided_slice %24 {offsets = [0, 0], sizes = [1, 128], strides = [1, 1]} : vector<9x128xf32> to vector<1x128xf32>
    %163 = vector.shape_cast %162 : vector<1x128xf32> to vector<128xf32>
    %164 = vector.shape_cast %163 : vector<128xf32> to vector<1x1x128xf32>
    %165 = vector.broadcast %164 : vector<1x1x128xf32> to vector<16x16x128xf32>
    %166 = arith.mulf %156, %165 : vector<16x16x128xf32>
    %167 = vector.extract_strided_slice %24 {offsets = [1, 0], sizes = [1, 128], strides = [1, 1]} : vector<9x128xf32> to vector<1x128xf32>
    %168 = vector.shape_cast %167 : vector<1x128xf32> to vector<128xf32>
    %169 = vector.shape_cast %168 : vector<128xf32> to vector<1x1x128xf32>
    %170 = vector.broadcast %169 : vector<1x1x128xf32> to vector<16x16x128xf32>
    %171 = arith.mulf %151, %170 : vector<16x16x128xf32>
    %172 = arith.addf %166, %171 : vector<16x16x128xf32>
    %173 = vector.extract_strided_slice %24 {offsets = [2, 0], sizes = [1, 128], strides = [1, 1]} : vector<9x128xf32> to vector<1x128xf32>
    %174 = vector.shape_cast %173 : vector<1x128xf32> to vector<128xf32>
    %175 = vector.shape_cast %174 : vector<128xf32> to vector<1x1x128xf32>
    %176 = vector.broadcast %175 : vector<1x1x128xf32> to vector<16x16x128xf32>
    %177 = arith.mulf %161, %176 : vector<16x16x128xf32>
    %178 = arith.addf %172, %177 : vector<16x16x128xf32>
    %179 = arith.addf %150, %178 : vector<16x16x128xf32>
    %c1_70 = arith.constant 1 : index
    %c0_71 = arith.constant 0 : index
    %c0_72 = arith.constant 0 : index
    %180 = vector.load %arg19[%c1_70, %c0_71, %c0_72] : memref<18x16x128xf32, #tpu.memory_space<vmem>>, vector<16x16x128xf32>
    %c1_i32_73 = arith.constant 1 : i32
    %181 = tpu.dynamic_rotate %180 by %c1_i32_73 dim 1 : vector<16x16x128xf32>, i32 -> vector<16x16x128xf32>
    %cst_74 = arith.constant 0.000000e+00 : f32
    %182 = vector.shape_cast %146 : vector<1x16x1xi1> to vector<1x16x1xi1>
    %183 = vector.broadcast %182 : vector<1x16x1xi1> to vector<16x16x128xi1>
    %184 = vector.broadcast %cst_74 : f32 to vector<16x16x128xf32>
    %185 = arith.select %183, %181, %184 : vector<16x16x128xi1>, vector<16x16x128xf32>
    %c15_i32_75 = arith.constant 15 : i32
    %186 = tpu.dynamic_rotate %180 by %c15_i32_75 dim 1 : vector<16x16x128xf32>, i32 -> vector<16x16x128xf32>
    %cst_76 = arith.constant 0.000000e+00 : f32
    %187 = vector.shape_cast %148 : vector<1x16x1xi1> to vector<1x16x1xi1>
    %188 = vector.broadcast %187 : vector<1x16x1xi1> to vector<16x16x128xi1>
    %189 = vector.broadcast %cst_76 : f32 to vector<16x16x128xf32>
    %190 = arith.select %188, %186, %189 : vector<16x16x128xi1>, vector<16x16x128xf32>
    %191 = vector.extract_strided_slice %24 {offsets = [3, 0], sizes = [1, 128], strides = [1, 1]} : vector<9x128xf32> to vector<1x128xf32>
    %192 = vector.shape_cast %191 : vector<1x128xf32> to vector<128xf32>
    %193 = vector.shape_cast %192 : vector<128xf32> to vector<1x1x128xf32>
    %194 = vector.broadcast %193 : vector<1x1x128xf32> to vector<16x16x128xf32>
    %195 = arith.mulf %185, %194 : vector<16x16x128xf32>
    %196 = vector.extract_strided_slice %24 {offsets = [4, 0], sizes = [1, 128], strides = [1, 1]} : vector<9x128xf32> to vector<1x128xf32>
    %197 = vector.shape_cast %196 : vector<1x128xf32> to vector<128xf32>
    %198 = vector.shape_cast %197 : vector<128xf32> to vector<1x1x128xf32>
    %199 = vector.broadcast %198 : vector<1x1x128xf32> to vector<16x16x128xf32>
    %200 = arith.mulf %180, %199 : vector<16x16x128xf32>
    %201 = arith.addf %195, %200 : vector<16x16x128xf32>
    %202 = vector.extract_strided_slice %24 {offsets = [5, 0], sizes = [1, 128], strides = [1, 1]} : vector<9x128xf32> to vector<1x128xf32>
    %203 = vector.shape_cast %202 : vector<1x128xf32> to vector<128xf32>
    %204 = vector.shape_cast %203 : vector<128xf32> to vector<1x1x128xf32>
    %205 = vector.broadcast %204 : vector<1x1x128xf32> to vector<16x16x128xf32>
    %206 = arith.mulf %190, %205 : vector<16x16x128xf32>
    %207 = arith.addf %201, %206 : vector<16x16x128xf32>
    %208 = arith.addf %179, %207 : vector<16x16x128xf32>
    %c2 = arith.constant 2 : index
    %c0_77 = arith.constant 0 : index
    %c0_78 = arith.constant 0 : index
    %209 = vector.load %arg19[%c2, %c0_77, %c0_78] : memref<18x16x128xf32, #tpu.memory_space<vmem>>, vector<16x16x128xf32>
    %c1_i32_79 = arith.constant 1 : i32
    %210 = tpu.dynamic_rotate %209 by %c1_i32_79 dim 1 : vector<16x16x128xf32>, i32 -> vector<16x16x128xf32>
    %cst_80 = arith.constant 0.000000e+00 : f32
    %211 = vector.shape_cast %146 : vector<1x16x1xi1> to vector<1x16x1xi1>
    %212 = vector.broadcast %211 : vector<1x16x1xi1> to vector<16x16x128xi1>
    %213 = vector.broadcast %cst_80 : f32 to vector<16x16x128xf32>
    %214 = arith.select %212, %210, %213 : vector<16x16x128xi1>, vector<16x16x128xf32>
    %c15_i32_81 = arith.constant 15 : i32
    %215 = tpu.dynamic_rotate %209 by %c15_i32_81 dim 1 : vector<16x16x128xf32>, i32 -> vector<16x16x128xf32>
    %cst_82 = arith.constant 0.000000e+00 : f32
    %216 = vector.shape_cast %148 : vector<1x16x1xi1> to vector<1x16x1xi1>
    %217 = vector.broadcast %216 : vector<1x16x1xi1> to vector<16x16x128xi1>
    %218 = vector.broadcast %cst_82 : f32 to vector<16x16x128xf32>
    %219 = arith.select %217, %215, %218 : vector<16x16x128xi1>, vector<16x16x128xf32>
    %220 = vector.extract_strided_slice %24 {offsets = [6, 0], sizes = [1, 128], strides = [1, 1]} : vector<9x128xf32> to vector<1x128xf32>
    %221 = vector.shape_cast %220 : vector<1x128xf32> to vector<128xf32>
    %222 = vector.shape_cast %221 : vector<128xf32> to vector<1x1x128xf32>
    %223 = vector.broadcast %222 : vector<1x1x128xf32> to vector<16x16x128xf32>
    %224 = arith.mulf %214, %223 : vector<16x16x128xf32>
    %225 = vector.extract_strided_slice %24 {offsets = [7, 0], sizes = [1, 128], strides = [1, 1]} : vector<9x128xf32> to vector<1x128xf32>
    %226 = vector.shape_cast %225 : vector<1x128xf32> to vector<128xf32>
    %227 = vector.shape_cast %226 : vector<128xf32> to vector<1x1x128xf32>
    %228 = vector.broadcast %227 : vector<1x1x128xf32> to vector<16x16x128xf32>
    %229 = arith.mulf %209, %228 : vector<16x16x128xf32>
    %230 = arith.addf %224, %229 : vector<16x16x128xf32>
    %231 = vector.extract_strided_slice %24 {offsets = [8, 0], sizes = [1, 128], strides = [1, 1]} : vector<9x128xf32> to vector<1x128xf32>
    %232 = vector.shape_cast %231 : vector<1x128xf32> to vector<128xf32>
    %233 = vector.shape_cast %232 : vector<128xf32> to vector<1x1x128xf32>
    %234 = vector.broadcast %233 : vector<1x1x128xf32> to vector<16x16x128xf32>
    %235 = arith.mulf %219, %234 : vector<16x16x128xf32>
    %236 = arith.addf %230, %235 : vector<16x16x128xf32>
    %237 = arith.addf %208, %236 : vector<16x16x128xf32>
    %cst_83 = arith.constant 5.000000e-01 : f32
    %238 = vector.broadcast %cst_83 : f32 to vector<16x16x128xf32>
    %239 = arith.mulf %238, %237 : vector<16x16x128xf32>
    %cst_84 = arith.constant 0.707106769 : f32
    %240 = vector.broadcast %cst_84 : f32 to vector<16x16x128xf32>
    %241 = arith.mulf %237, %240 : vector<16x16x128xf32>
    %242 = math.erf %241 : vector<16x16x128xf32>
    %cst_85 = arith.constant 1.000000e+00 : f32
    %243 = vector.broadcast %cst_85 : f32 to vector<16x16x128xf32>
    %244 = arith.addf %243, %242 : vector<16x16x128xf32>
    %245 = arith.mulf %239, %244 : vector<16x16x128xf32>
    %246 = vector.shape_cast %245 : vector<16x16x128xf32> to vector<256x128xf32>
    %247 = arith.truncf %246 : vector<256x128xf32> to vector<256x128xbf16>
    %cst_86 = arith.constant dense<0.000000e+00> : vector<256x128xf32>
    %248 = tpu.matmul %247, %15, %cst_86 {dimension_numbers = #tpu.dot_dimension_numbers<[1], [0], [0], [1], [0, 0, 1, 1], [], []>} : vector<256x128xbf16>, vector<128x128xbf16>, vector<256x128xf32> -> vector<256x128xf32>
    %249 = vector.shape_cast %23 : vector<128xf32> to vector<1x128xf32>
    %250 = vector.broadcast %249 : vector<1x128xf32> to vector<256x128xf32>
    %251 = arith.addf %248, %250 : vector<256x128xf32>
    %252 = vector.shape_cast %251 : vector<256x128xf32> to vector<16x16x128xf32>
    %253 = vector.shape_cast %11 : vector<128xf32> to vector<1x1x128xf32>
    %254 = vector.broadcast %253 : vector<1x1x128xf32> to vector<16x16x128xf32>
    %255 = arith.mulf %254, %252 : vector<16x16x128xf32>
    %256 = arith.addf %59, %255 : vector<16x16x128xf32>
    %c0_87 = arith.constant 0 : index
    %c0_88 = arith.constant 0 : index
    %c0_89 = arith.constant 0 : index
    %c0_90 = arith.constant 0 : index
    %257 = vector.load %arg18[%c0_87, %c0_88, %c0_89, %c0_90] : memref<1x16x16x128xf32, #tpu.memory_space<vmem>>, vector<1x16x16x128xf32>
    %258 = vector.shape_cast %257 : vector<1x16x16x128xf32> to vector<16x16x128xf32>
    %259 = vector.shape_cast %256 : vector<16x16x128xf32> to vector<1x16x16x128xf32>
    tpu.vector_store %arg18[%c0_87, %c0_88, %c0_89, %c0_90], %259 {strides = array<i32>} : memref<1x16x16x128xf32, #tpu.memory_space<vmem>>, vector<1x16x16x128xf32>,
    return
  }
  func.func @transform_0(%arg0: i32, %arg1: i32) -> (i32, i32, i32, i32) {
    %c16_i32 = arith.constant 16 : i32
    %0 = arith.muli %arg1, %c16_i32 : i32
    %c1_i32 = arith.constant 1 : i32
    %1 = arith.subi %0, %c1_i32 : i32
    %c0_i32 = arith.constant 0 : i32
    %2 = arith.maxsi %1, %c0_i32 : i32
    %c0_i32_0 = arith.constant 0 : i32
    %c0_i32_1 = arith.constant 0 : i32
    %c0_i32_2 = arith.constant 0 : i32
    return %arg0, %2, %c0_i32_0, %c0_i32_1 : i32, i32, i32, i32
  }
  func.func @transform_1(%arg0: i32, %arg1: i32) -> (i32, i32, i32, i32) {
    %c0_i32 = arith.constant 0 : i32
    %c0_i32_0 = arith.constant 0 : i32
    %c0_i32_1 = arith.constant 0 : i32
    return %arg0, %arg1, %c0_i32, %c0_i32_0 : i32, i32, i32, i32
  }
  func.func @transform_2(%arg0: i32, %arg1: i32) -> (i32, i32, i32, i32) {
    %c1_i32 = arith.constant 1 : i32
    %0 = arith.addi %arg1, %c1_i32 : i32
    %c16_i32 = arith.constant 16 : i32
    %1 = arith.muli %0, %c16_i32 : i32
    %c15_i32 = arith.constant 15 : i32
    %2 = arith.minsi %1, %c15_i32 : i32
    %c0_i32 = arith.constant 0 : i32
    %c0_i32_0 = arith.constant 0 : i32
    %c0_i32_1 = arith.constant 0 : i32
    return %arg0, %2, %c0_i32, %c0_i32_0 : i32, i32, i32, i32
  }
  func.func @transform_3(%arg0: i32, %arg1: i32) -> (i32, i32) {
    %c0_i32 = arith.constant 0 : i32
    %c0_i32_0 = arith.constant 0 : i32
    %c0_i32_1 = arith.constant 0 : i32
    return %c0_i32, %c0_i32_0 : i32, i32
  }
  func.func @transform_4(%arg0: i32, %arg1: i32) -> (i32, i32) {
    %c0_i32 = arith.constant 0 : i32
    %c0_i32_0 = arith.constant 0 : i32
    %c0_i32_1 = arith.constant 0 : i32
    return %c0_i32, %c0_i32_0 : i32, i32
  }
  func.func @transform_5(%arg0: i32, %arg1: i32) -> (i32, i32) {
    %c0_i32 = arith.constant 0 : i32
    %c0_i32_0 = arith.constant 0 : i32
    %c0_i32_1 = arith.constant 0 : i32
    return %c0_i32, %c0_i32_0 : i32, i32
  }
  func.func @transform_6(%arg0: i32, %arg1: i32) -> (i32, i32) {
    %c0_i32 = arith.constant 0 : i32
    %c0_i32_0 = arith.constant 0 : i32
    %c0_i32_1 = arith.constant 0 : i32
    return %c0_i32, %c0_i32_0 : i32, i32
  }
  func.func @transform_7(%arg0: i32, %arg1: i32) -> (i32, i32) {
    %c0_i32 = arith.constant 0 : i32
    %c0_i32_0 = arith.constant 0 : i32
    %c0_i32_1 = arith.constant 0 : i32
    return %c0_i32, %c0_i32_0 : i32, i32
  }
  func.func @transform_8(%arg0: i32, %arg1: i32) -> (i32, i32) {
    %c0_i32 = arith.constant 0 : i32
    %c0_i32_0 = arith.constant 0 : i32
    %c0_i32_1 = arith.constant 0 : i32
    return %c0_i32, %c0_i32_0 : i32, i32
  }
  func.func @transform_9(%arg0: i32, %arg1: i32) -> (i32, i32) {
    %c0_i32 = arith.constant 0 : i32
    %c0_i32_0 = arith.constant 0 : i32
    %c0_i32_1 = arith.constant 0 : i32
    return %c0_i32, %c0_i32_0 : i32, i32
  }
  func.func @transform_10(%arg0: i32, %arg1: i32) -> (i32, i32) {
    %c0_i32 = arith.constant 0 : i32
    %c0_i32_0 = arith.constant 0 : i32
    %c0_i32_1 = arith.constant 0 : i32
    return %c0_i32, %c0_i32_0 : i32, i32
  }
  func.func @transform_11(%arg0: i32, %arg1: i32) -> (i32, i32) {
    %c0_i32 = arith.constant 0 : i32
    %c0_i32_0 = arith.constant 0 : i32
    %c0_i32_1 = arith.constant 0 : i32
    return %c0_i32, %c0_i32_0 : i32, i32
  }
  func.func @transform_12(%arg0: i32, %arg1: i32) -> (i32, i32) {
    %c0_i32 = arith.constant 0 : i32
    %c0_i32_0 = arith.constant 0 : i32
    %c0_i32_1 = arith.constant 0 : i32
    return %c0_i32, %c0_i32_0 : i32, i32
  }
  func.func @transform_13(%arg0: i32, %arg1: i32) -> (i32, i32) {
    %c0_i32 = arith.constant 0 : i32
    %c0_i32_0 = arith.constant 0 : i32
    %c0_i32_1 = arith.constant 0 : i32
    return %c0_i32, %c0_i32_0 : i32, i32
  }
  func.func @transform_14(%arg0: i32, %arg1: i32) -> (i32, i32) {
    %c0_i32 = arith.constant 0 : i32
    %c0_i32_0 = arith.constant 0 : i32
    %c0_i32_1 = arith.constant 0 : i32
    return %c0_i32, %c0_i32_0 : i32, i32
  }
  func.func @transform_15(%arg0: i32, %arg1: i32) -> (i32, i32) {
    %c0_i32 = arith.constant 0 : i32
    %c0_i32_0 = arith.constant 0 : i32
    %c0_i32_1 = arith.constant 0 : i32
    return %c0_i32, %c0_i32_0 : i32, i32
  }
  func.func @transform_16(%arg0: i32, %arg1: i32) -> (i32, i32, i32, i32) {
    %c0_i32 = arith.constant 0 : i32
    %c0_i32_0 = arith.constant 0 : i32
    %c0_i32_1 = arith.constant 0 : i32
    return %arg0, %arg1, %c0_i32, %c0_i32_0 : i32, i32, i32, i32
  }
}

</mosaic_0001>

<bundles_post_ra>
// kernel: tpu_custom_call.1
= control target key start
LH: loop header
LB: loop body
LE: loop exit
PB: predicated region body
PF: predicated region fallthrough
CT: control target
= control target key end

     0   :  { %s9105_s0 = inlined_call_operand.hbm [shape: f32[2,16,16,128], index: 0, kind: input, shape index: {}]   ;;  %s9106_s1 = inlined_call_operand.hbm [shape: f32[2,16,16,128], index: 1, kind: input, shape index: {}]   ;;  %s9107_s2 = inlined_call_operand.hbm [shape: f32[2,16,16,128], index: 2, kind: input, shape index: {}]   ;;  %s9108_s3 = inlined_call_operand.hbm [shape: f32[2,128], index: 3, kind: input, shape index: {}]   ;;  %s9109_s4 = inlined_call_operand.hbm [shape: f32[2,128], index: 4, kind: input, shape index: {}]   ;;  %s9110_s5 = inlined_call_operand.hbm [shape: f32[2,128], index: 5, kind: input, shape index: {}]   ;;  %s9111_s6 = inlined_call_operand.hbm [shape: bf16[128,128], index: 6, kind: input, shape index: {}]   ;;  %s9112_s7 = inlined_call_operand.hbm [shape: f32[1,128], index: 7, kind: input, shape index: {}]   ;;  %s9113_s8 = inlined_call_operand.hbm [shape: bf16[128,128], index: 8, kind: input, shape index: {}]   ;;  %s9114_s9 = inlined_call_operand.hbm [shape: f32[1,128], index: 9, kind: input, shape index: {}]   ;;  %s9115_s10 = inlined_call_operand.hbm [shape: bf16[128,128], index: 10, kind: input, shape index: {}]   ;;  %s9116_s11 = inlined_call_operand.hbm [shape: f32[1,128], index: 11, kind: input, shape index: {}]   ;;  %s9117_s12 = inlined_call_operand.hbm [shape: f32[9,128], index: 12, kind: input, shape index: {}]   ;;  %s9118_s13 = inlined_call_operand.hbm [shape: f32[1,128], index: 13, kind: input, shape index: {}]   ;;  %s9119_s14 = inlined_call_operand.hbm [shape: bf16[128,128], index: 14, kind: input, shape index: {}]   ;;  %s9120_s15 = inlined_call_operand.hbm [shape: f32[1,128], index: 15, kind: input, shape index: {}]   ;;  %s9121_s16 = inlined_call_operand.hbm [shape: f32[2,16,16,128], index: 16, kind: output, shape index: {}]  }
   0x1   :  { %9260 = sst [smem:[#allocation201_spill]] %s9105_s0 }
   0x2   :  { %9261 = sst [smem:[#allocation202_spill]] %s9106_s1 }
   0x3   :  { %9262 = sst [smem:[#allocation203_spill]] %s9107_s2 }
   0x4   :  { %9263 = sst [smem:[#allocation204_spill]] %s9108_s3 }
   0x5   :  { %9264 = sst [smem:[#allocation205_spill]] %s9109_s4 }
   0x6   :  { %9265 = sst [smem:[#allocation206_spill]] %s9110_s5 }
   0x7   :  { %9266 = sst [smem:[#allocation207_spill]] %s9111_s6 }
   0x8   :  { %9267 = sst [smem:[#allocation208_spill]] %s9112_s7 }
   0x9   :  { %9268 = sst [smem:[#allocation209_spill]] %s9113_s8 }
   0xa   :  { %9269 = sst [smem:[#allocation210_spill]] %s9114_s9 }
   0xb   :  { %9270 = sst [smem:[#allocation211_spill]] %s9115_s10 }
   0xc   :  { %9271 = sst [smem:[#allocation212_spill]] %s9116_s11 }
   0xd   :  { %9272 = sst [smem:[#allocation213_spill]] %s9117_s12 }
   0xe   :  { %9273 = sst [smem:[#allocation214_spill]] %s9118_s13 }
   0xf   :  { %9274 = sst [smem:[#allocation215_spill]] %s9119_s14 }
  0x10   :  { %9275 = sst [smem:[#allocation216_spill]] %s9120_s15 }
  0x11   :  { %9276 = sst [smem:[#allocation217_spill]] %s9121_s16 }
  0x12   :  { %21 = vsyncpa [#allocation4], 0 }
  0x13   :  { %23 = vsyncpa [#allocation4 + $0x1], 0 }
  0x14   :  { %24 = vsyncpa [#allocation7], 0 }
  0x15   :  { %26 = vsyncpa [#allocation7 + $0x1], 0 }
  0x16   :  { %27 = vsyncpa [#allocation10], 0 }
  0x17   :  { %28 = vsyncpa [#allocation13], 0 }
  0x18   :  { %29 = vsyncpa [#allocation16], 0 }
  0x19   :  { %30 = vsyncpa [#allocation19], 0 }
  0x1a   :  { %31 = vsyncpa [#allocation22], 0 }
  0x1b   :  { %32 = vsyncpa [#allocation25], 0 }
  0x1c   :  { %33 = vsyncpa [#allocation28], 0 }
  0x1d   :  { %34 = vsyncpa [#allocation5], 0 }
  0x1e   :  { %36 = vsyncpa [#allocation5 + $0x1], 0  ;;  %s5993_s21 = smov 0   ;;  %s5995_s22 = smov 0  }
  0x1f   :  { %s5997_s23 = smov 0   ;;  %s5999_s24 = smov 0  }
  0x20   :  { %s6001_s25 = smov 0   ;;  %s6003_s26 = smov 0  }
  0x21 LB: > { %9277 = sst [smem:[#allocation40_spill]] %s5871_s23  ;;  %s6024_s27 = sadd.s32 4294967295, %s5883_s26   ;;  %s5883_s26 = sphi %s6003_s26, %s42_s26   ;;  %s5879_s25 = sphi %s6001_s25, %s9761_s25   ;;  %s5875_s24 = sphi %s5999_s24, %s9760_s24   ;;  %s5871_s23 = sphi %s5997_s23, %s9759_s23   ;;  %s5867_s22 = sphi %s5995_s22, %s9763_s22   ;;  %s5863_s21 = sphi %s5993_s21, %s9762_s21  }
  0x22   : > { %9278 = sst [smem:[#allocation41_spill]] %s5875_s24  ;;  %p4392_p0 = scmp.ge.s32.totalorder %s5883_s26, 1 }
  0x23   : > { %9279 = sst [smem:[#allocation42_spill]] %s5879_s25  ;;  %p9127_p1 = scmp.eq.s32.totalorder %s6024_s27, 0 }
  0x24   : > { %9280 = sst [smem:[#allocation43_spill]] %s5883_s26  ;;  %p460_p2 = scmp.lt.s32.totalorder %s5883_s26, 3 }
  0x25   : > { %s5885_s29 = smov [#allocation9]   ;;  %s5886_s0 = smov [#allocation12]  }
  0x26   : > { %p6029_p3 = pnand %p4392_p0, %p460_p2  ;;  %s473_s30 = sshll.u32 %s5885_s29, 4  ;;  %s474_s30 = int_to_ptr.vmem [resolvable:$true] %s473_s30 }
  0x27   : > { %s495_s17 = sshll.u32 %s5886_s0, 4  ;;  %s5887_s19 = smov [#allocation15]   ;;  %s6042_s17 = int_to_ptr.vmem [resolvable:$true] %s495_s17 }
  0x28   : > { %s9281_s28 = scalar_select %p6029_p3, 1, 0 }
  0x29   : > { %p4943_p5 = pneg %p6029_p3  ;;  %s519_s20 = sshll.u32 %s5887_s19, 4  ;;  %s6044_s20 = int_to_ptr.vmem [resolvable:$true] %s519_s20 }
  0x2a   : > { %9282 = sst [smem:[#allocation44_spill]] %s9281_s28  ;;  %s9284_s3 = sld [smem:[#allocation204_spill]] }
  0x2b   : > { %p6038_p6 = pnand %p4943_p5, %p9127_p1 }
  0x2d   : > { %s9283_s18 = scalar_select %p6038_p6, 1, 0 }
  0x2e   : > { %p6054_p8 = pneg %p6038_p6 }
  0x30   : > { %s5315_s24 = scalar_lea.hbm %s9284_s3, 32 }
  0x31   : > { %p5316_p7 = scmp.ne.s32.totalorder %s9284_s3, %s5315_s24  ;;  %p5322_p11 = scmp.lt.u32.totalorder %s5315_s24, %s9284_s3 }
  0x32   : > { %s9285_s0 = scalar_select %p6054_p8, 1, 0 }
  0x33   : > { %p5318_p9 = pnand %p6054_p8, %p5316_p7 }
  0x35   : > { %p5319_p10 = pneg %p5318_p9 }
  0x37   : > { %p5324_p12 = pnand %p5322_p11, %p5319_p10 }
  0x39   : > { %5327 = shalt.err (!%p5324_p12)
}
  0x3a   : > { %s5328_s16 = scalar_lea.vmem %s474_s30, 32  ;;  %p5336_p5 = scmp.lt.s32.totalorder %s474_s30, %s474_s30 }
  0x3b   : > { %p5329_p13 = scmp.ne.s32.totalorder %s474_s30, %s5328_s16  ;;  %p5337_p4 = scmp.lt.s32.totalorder %s5328_s16, %s5328_s16 }
  0x3d   : > { %p5331_p0 = pnand %p5329_p13, %p6054_p8  ;;  %p5338_p1 = por %p5337_p4, %p5336_p5 }
  0x3f   : > { %p5332_p2 = pneg %p5331_p0 }
  0x41   : > { %p5339_p3 = pnand %p5338_p1, %p5332_p2 }
  0x43   : > { %5342 = shalt.err (!%p5339_p3)
}
  0x44   : > { %4946 = dma.hbm_to_vmem [thread:$0]  (!%p6038_p6), %s9284_s3, 32, %s474_s30, [#allocation10]  }
  0x45   : > { %s9286_s5 = sld [smem:[#allocation206_spill]] }
  0x4b   : > { %s5343_s29 = scalar_lea.hbm %s9286_s5, 32 }
  0x4c   : > { %p5344_p7 = scmp.ne.s32.totalorder %s9286_s5, %s5343_s29  ;;  %p5350_p1 = scmp.lt.u32.totalorder %s5343_s29, %s9286_s5 }
  0x4e   : > { %p5346_p9 = pnand %p5344_p7, %p6054_p8 }
  0x50   : > { %p5347_p4 = pneg %p5346_p9 }
  0x52   : > { %p5352_p3 = pnand %p5350_p1, %p5347_p4 }
  0x54   : > { %5355 = shalt.err (!%p5352_p3)
}
  0x55   : > { %s5356_s30 = scalar_lea.vmem %s6042_s17, 32  ;;  %p5364_p13 = scmp.lt.s32.totalorder %s6042_s17, %s6042_s17 }
  0x56   : > { %p5357_p10 = scmp.ne.s32.totalorder %s6042_s17, %s5356_s30  ;;  %p5365_p0 = scmp.lt.s32.totalorder %s5356_s30, %s5356_s30 }
  0x58   : > { %p5359_p11 = pnand %p5357_p10, %p6054_p8  ;;  %p5366_p2 = por %p5365_p0, %p5364_p13 }
  0x5a   : > { %p5360_p12 = pneg %p5359_p11 }
  0x5c   : > { %p5367_p5 = pnand %p5366_p2, %p5360_p12 }
  0x5e   : > { %5370 = shalt.err (!%p5367_p5)
}
  0x5f   : > { %4952 = dma.hbm_to_vmem [thread:$0]  (!%p6038_p6), %s9286_s5, 32, %s6042_s17, [#allocation13]  }
  0x60   : > { %s9287_s7 = sld [smem:[#allocation208_spill]] }
  0x66   : > { %s5371_s15 = scalar_lea.hbm %s9287_s7, 16 }
  0x67   : > { %p5372_p7 = scmp.ne.s32.totalorder %s9287_s7, %s5371_s15  ;;  %p5378_p1 = scmp.lt.u32.totalorder %s5371_s15, %s9287_s7 }
  0x69   : > { %p5374_p9 = pnand %p5372_p7, %p6054_p8 }
  0x6b   : > { %p5375_p4 = pneg %p5374_p9 }
  0x6d   : > { %p5380_p3 = pnand %p5378_p1, %p5375_p4 }
  0x6f   : > { %5383 = shalt.err (!%p5380_p3)
}
  0x70   : > { %s5384_s17 = scalar_lea.vmem %s6044_s20, 16  ;;  %s5391_s30 = scalar_lea.vmem %s6044_s20, 32 }
  0x71   : > { %p5385_p10 = scmp.ne.s32.totalorder %s6044_s20, %s5384_s17  ;;  %p5392_p13 = scmp.lt.s32.totalorder %s6044_s20, %s6044_s20 }
  0x72   : > { %p5393_p0 = scmp.lt.s32.totalorder %s5391_s30, %s5384_s17 }
  0x73   : > { %p5387_p11 = pnand %p5385_p10, %p6054_p8 }
  0x74   : > { %p5394_p2 = por %p5393_p0, %p5392_p13 }
  0x75   : > { %p5388_p12 = pneg %p5387_p11 }
  0x77   : > { %p5395_p5 = pnand %p5394_p2, %p5388_p12 }
  0x79   : > { %5398 = shalt.err (!%p5395_p5)
}
  0x7a   : > { %4958 = dma.hbm_to_vmem [thread:$0]  (!%p6038_p6), %s9287_s7, 16, %s6044_s20, [#allocation16]  }
  0x7b   : > { %s5888_s2 = smov [#allocation18]   ;;  %s5889_s15 = smov [#allocation21]  }
  0x7c   : > { %s543_s28 = sshll.u32 %s5888_s2, 4  ;;  %s567_s24 = sshll.u32 %s5889_s15, 4  ;;  %s544_s28 = int_to_ptr.vmem [resolvable:$true] %s543_s28  ;;  %s568_s24 = int_to_ptr.vmem [resolvable:$true] %s567_s24 }
  0x7d   : > { %s9288_s9 = sld [smem:[#allocation210_spill]] }
  0x83   : > { %s5399_s16 = scalar_lea.hbm %s9288_s9, 16 }
  0x84   : > { %p5400_p7 = scmp.ne.s32.totalorder %s9288_s9, %s5399_s16  ;;  %p5406_p1 = scmp.lt.u32.totalorder %s5399_s16, %s9288_s9 }
  0x86   : > { %p5402_p9 = pnand %p5400_p7, %p6054_p8 }
  0x88   : > { %p5403_p4 = pneg %p5402_p9 }
  0x8a   : > { %p5408_p3 = pnand %p5406_p1, %p5403_p4 }
  0x8c   : > { %5411 = shalt.err (!%p5408_p3)
}
  0x8d   : > { %s5412_s20 = scalar_lea.vmem %s544_s28, 16  ;;  %s5419_s14 = scalar_lea.vmem %s544_s28, 32 }
  0x8e   : > { %p5413_p10 = scmp.ne.s32.totalorder %s544_s28, %s5412_s20  ;;  %p5420_p13 = scmp.lt.s32.totalorder %s544_s28, %s544_s28 }
  0x8f   : > { %p5421_p0 = scmp.lt.s32.totalorder %s5419_s14, %s5412_s20 }
  0x90   : > { %p5415_p11 = pnand %p5413_p10, %p6054_p8 }
  0x91   : > { %p5422_p2 = por %p5421_p0, %p5420_p13 }
  0x92   : > { %p5416_p12 = pneg %p5415_p11 }
  0x94   : > { %p5423_p5 = pnand %p5422_p2, %p5416_p12 }
  0x96   : > { %5426 = shalt.err (!%p5423_p5)
}
  0x97   : > { %4964 = dma.hbm_to_vmem [thread:$0]  (!%p6038_p6), %s9288_s9, 16, %s544_s28, [#allocation19]  }
  0x98   : > { %s9289_s11 = sld [smem:[#allocation212_spill]] }
  0x9e   : > { %s5427_s19 = scalar_lea.hbm %s9289_s11, 16 }
  0x9f   : > { %p5428_p7 = scmp.ne.s32.totalorder %s9289_s11, %s5427_s19  ;;  %p5434_p1 = scmp.lt.u32.totalorder %s5427_s19, %s9289_s11 }
  0xa1   : > { %p5430_p9 = pnand %p5428_p7, %p6054_p8 }
  0xa3   : > { %p5431_p4 = pneg %p5430_p9 }
  0xa5   : > { %p5436_p3 = pnand %p5434_p1, %p5431_p4 }
  0xa7   : > { %5439 = shalt.err (!%p5436_p3)
}
  0xa8   : > { %s5440_s20 = scalar_lea.vmem %s568_s24, 16  ;;  %s5447_s28 = scalar_lea.vmem %s568_s24, 32 }
  0xa9   : > { %p5441_p10 = scmp.ne.s32.totalorder %s568_s24, %s5440_s20  ;;  %p5448_p13 = scmp.lt.s32.totalorder %s568_s24, %s568_s24 }
  0xaa   : > { %p5449_p0 = scmp.lt.s32.totalorder %s5447_s28, %s5440_s20 }
  0xab   : > { %p5443_p11 = pnand %p5441_p10, %p6054_p8 }
  0xac   : > { %p5450_p2 = por %p5449_p0, %p5448_p13 }
  0xad   : > { %p5444_p12 = pneg %p5443_p11 }
  0xaf   : > { %p5451_p5 = pnand %p5450_p2, %p5444_p12 }
  0xb1   : > { %5454 = shalt.err (!%p5451_p5)
}
  0xb2   : > { %4970 = dma.hbm_to_vmem [thread:$0]  (!%p6038_p6), %s9289_s11, 16, %s568_s24, [#allocation22]  }
  0xb3   : > { %s5890_s15 = smov [#allocation24]   ;;  %s9290_s13 = sld [smem:[#allocation214_spill]] }
  0xb4   : > { %s591_s3 = sshll.u32 %s5890_s15, 4  ;;  %s592_s3 = int_to_ptr.vmem [resolvable:$true] %s591_s3 }
  0xb9   : > { %s5455_s16 = scalar_lea.hbm %s9290_s13, 16 }
  0xba   : > { %p5456_p7 = scmp.ne.s32.totalorder %s9290_s13, %s5455_s16  ;;  %p5462_p1 = scmp.lt.u32.totalorder %s5455_s16, %s9290_s13 }
  0xbc   : > { %p5458_p9 = pnand %p5456_p7, %p6054_p8 }
  0xbe   : > { %p5459_p4 = pneg %p5458_p9 }
  0xc0   : > { %p5464_p3 = pnand %p5462_p1, %p5459_p4 }
  0xc2   : > { %5467 = shalt.err (!%p5464_p3)
}
  0xc3   : > { %s5468_s24 = scalar_lea.vmem %s592_s3, 16  ;;  %s5475_s28 = scalar_lea.vmem %s592_s3, 32 }
  0xc4   : > { %p5469_p10 = scmp.ne.s32.totalorder %s592_s3, %s5468_s24  ;;  %p5476_p13 = scmp.lt.s32.totalorder %s592_s3, %s592_s3 }
  0xc5   : > { %p5477_p0 = scmp.lt.s32.totalorder %s5475_s28, %s5468_s24 }
  0xc6   : > { %p5471_p11 = pnand %p5469_p10, %p6054_p8 }
  0xc7   : > { %p5478_p2 = por %p5477_p0, %p5476_p13 }
  0xc8   : > { %p5472_p12 = pneg %p5471_p11 }
  0xca   : > { %p5479_p5 = pnand %p5478_p2, %p5472_p12 }
  0xcc   : > { %5482 = shalt.err (!%p5479_p5)
}
  0xcd   : > { %4976 = dma.hbm_to_vmem [thread:$0]  (!%p6038_p6), %s9290_s13, 16, %s592_s3, [#allocation25]  }
  0xce   : > { %s4391_s15 = sadd.s32 4294967294, %s5883_s26   ;;  %s54_s29 = sadd.s32 1, %s5879_s25 }
  0xcf   : > { %p56_p7 = scmp.ge.s32.totalorder %s54_s29, 2  ;;  %s71_s19 = sadd.s32 1, %s5871_s23 }
  0xd0   : > { %p78_p9 = scmp.ne.s32.totalorder %s5871_s23, %s5867_s22  ;;  %p79_p4 = scmp.eq.s32.totalorder %s5883_s26, 0 }
  0xd1   : > { %s9765_s29 = smov (%p56_p7, %s54_s29), 0  ;;  %p84_p3 = scmp.ne.s32.totalorder %s5867_s22, %s5863_s21 }
  0xd2   : > { %9291 = sst [smem:[#allocation45_spill]] %s9765_s29  ;;  %p6179_p1 = por %p79_p4, %p78_p9 }
  0xd3   : > { %s66_s3 = ssub.s32 %s5879_s25, %s9765_s29  ;;  %p447_p10 = scmp.eq.s32.totalorder %s6024_s27, 1 }
  0xd4   : > { %p69_p11 = scmp.eq.s32.totalorder %s66_s3, 0  ;;  %p9293_p12 = scmp.eq.s32.totalorder %s6024_s27, 0 }
  0xd5   : > { %p6194_p0 = por %p447_p10, %p78_p9  ;;  %p453_p2 = scmp.eq.s32.totalorder %s4391_s15, 1 }
  0xd6   : > { %p6190_p13 = por %p9293_p12, %p84_p3  ;;  %p5010_p7 = scmp.lt.s32.totalorder %s5883_s26, 2 }
  0xd7   : > { %s9295_s30 = scalar_select %p6194_p0, 1, 0 }
  0xd8   : > { %s9294_s17 = scalar_select %p6190_p13, 1, 0 }
  0xd9   : > { %s6199_s12 = scalar_select %p69_p11, %s5871_s23, %s71_s19  }
  0xda   : > { %p6201_p5 = por %p453_p2, %p84_p3  ;;  %s6207_s24 = sand.u32 1, %s5871_s23  }
  0xdb   : > { %9296 = sst [smem:[#allocation46_spill]] %s6199_s12  ;;  %s6210_s28 = sshll.u32 %s5879_s25, 12 }
  0xdc   : > { %s9297_s20 = scalar_select %p6201_p5, 1, 0 }
  0xdd   : > { %p6214_p4 = pnand %p5010_p7, %p6179_p1  ;;  %s653_s2 = sand.u32 1, %s5883_s26  }
  0xde   : > { %9298 = sst [smem:[#allocation47_spill]] %s9297_s20  ;;  %s4410_s15 = sshll.u32 %s6207_s24, 8 }
  0xdf   : > { %s9299_s14 = scalar_select %p6214_p4, 1, 0 }
  0xe0   : > { %s9300_s1 = sld [smem:[#allocation202_spill]]  ;;  %s657_s7 = scalar_lea.vmem [#allocation6], %s4410_s15 }
  0xe1   : > { %s667_s9 = sshll.u32 %s657_s7, 4  ;;  %s6228_s16 = scalar_lea.sflag [#allocation7], %s653_s2  ;;  %s6226_s9 = int_to_ptr.vmem [resolvable:$true] %s667_s9 }
  0xe2   : > { %p6234_p1 = pneg %p6214_p4 }
  0xe4   : > { %s9301_s13 = scalar_select %p6234_p1, 1, 0 }
  0xe6   : > { %s6224_s5 = scalar_lea.hbm %s9300_s1, %s6210_s28  ;;  %s5488_s15 = scalar_lea.hbm %s9300_s1, 8192 }
  0xe7   : > { %s5483_s11 = scalar_lea.hbm %s6224_s5, 4096  ;;  %p5489_p11 = scmp.lt.u32.totalorder %s6224_s5, %s9300_s1 }
  0xe8   : > { %p5484_p9 = scmp.ne.s32.totalorder %s6224_s5, %s5483_s11  ;;  %p5490_p12 = scmp.lt.u32.totalorder %s5488_s15, %s5483_s11 }
  0xe9   : > { %p5492_p7 = scmp.lt.u32.totalorder %s5483_s11, %s6224_s5 }
  0xea   : > { %p5486_p3 = pnand %p6234_p1, %p5484_p9  ;;  %p5491_p2 = por %p5490_p12, %p5489_p11 }
  0xec   : > { %p5487_p10 = pneg %p5486_p3  ;;  %p5493_p5 = por %p5492_p7, %p5491_p2 }
  0xee   : > { %p5494_p0 = pnand %p5493_p5, %p5487_p10 }
  0xf0   : > { %5497 = shalt.err (!%p5494_p0)
}
  0xf1   : > { %s5498_s2 = scalar_lea.vmem %s6226_s9, 4096  ;;  %s5891_s19 = smov [#allocation6]  }
  0xf2   : > { %p5499_p9 = scmp.ne.s32.totalorder %s6226_s9, %s5498_s2  ;;  %s5503_s3 = sshll.u32 %s5891_s19, 4  ;;  %s5504_s3 = int_to_ptr.vmem [resolvable:$false] %s5503_s3 }
  0xf3   : > { %s5505_s29 = scalar_lea.vmem %s5504_s3, 8192  ;;  %p5506_p6 = scmp.lt.s32.totalorder %s6226_s9, %s5504_s3 }
  0xf4   : > { %p5501_p3 = pnand %p5499_p9, %p6234_p1  ;;  %p5507_p8 = scmp.lt.s32.totalorder %s5505_s29, %s5498_s2 }
  0xf6   : > { %p5502_p13 = pneg %p5501_p3  ;;  %p5508_p11 = por %p5507_p8, %p5506_p6 }
  0xf8   : > { %p5509_p12 = pnand %p5508_p11, %p5502_p13 }
  0xfa   : > { %5512 = shalt.err (!%p5509_p12)
}
  0xfb   : > { %s9147_s11 = smov 128   ;;  %s9149_s15 = smov 8  }
  0xfc   : > { %4989 = dma.hbm_to_vmem [thread:$0]  (!%p6214_p4), %s6224_s5, 4096, %s6226_s9, %s6228_s16, %s9147_s11, %s9147_s11, %s9149_s15  }
  0xfd   : > { %s5894_s7 = smov [#allocation11]   ;;  %s5895_s3 = smov [#allocation14]  }
  0xfe   : > { %s484_s19 = sshll.u32 %s5894_s7, 4  ;;  %s505_s2 = sshll.u32 %s5895_s3, 4  ;;  %s485_s19 = int_to_ptr.vmem [resolvable:$true] %s484_s19  ;;  %s506_s2 = int_to_ptr.vmem [resolvable:$true] %s505_s2 }
  0xff   : > { %s9302_s4 = sld [smem:[#allocation205_spill]]  ;;  %p9303_p8 = scmp.ne.s32.totalorder %s9285_s0, 0 }
 0x105   : > { %s5513_s25 = scalar_lea.hbm %s9302_s4, 32 }
 0x106   : > { %p5514_p6 = scmp.ne.s32.totalorder %s9302_s4, %s5513_s25  ;;  %p5520_p5 = scmp.lt.u32.totalorder %s5513_s25, %s9302_s4 }
 0x108   : > { %p5516_p13 = pnand %p5514_p6, %p9303_p8 }
 0x10a   : > { %p5517_p0 = pneg %p5516_p13 }
 0x10c   : > { %p5522_p10 = pnand %p5520_p5, %p5517_p0 }
 0x10e   : > { %5525 = shalt.err (!%p5522_p10)
}
 0x10f   : > { %s5526_s5 = scalar_lea.vmem %s485_s19, 32  ;;  %p5534_p3 = scmp.lt.s32.totalorder %s485_s19, %s485_s19 }
 0x110   : > { %p5527_p2 = scmp.ne.s32.totalorder %s485_s19, %s5526_s5  ;;  %p5535_p11 = scmp.lt.s32.totalorder %s5526_s5, %s5526_s5 }
 0x112   : > { %p5529_p7 = pnand %p5527_p2, %p9303_p8  ;;  %p5536_p12 = por %p5535_p11, %p5534_p3 }
 0x114   : > { %p5530_p9 = pneg %p5529_p7 }
 0x116   : > { %p5537_p4 = pnand %p5536_p12, %p5530_p9 }
 0x118   : > { %5540 = shalt.err (!%p5537_p4)
}
 0x119   : > { %p9304_p6 = scmp.ne.s32.totalorder %s9283_s18, 0  ;;  %s9305_s6 = sld [smem:[#allocation207_spill]] }
 0x11b   : > { %4949 = dma.hbm_to_vmem [thread:$0]  (!%p9304_p6), %s9302_s4, 32, %s485_s19, [#allocation10]  }
 0x11f   : > { %s5541_s26 = scalar_lea.hbm %s9305_s6, 1024 }
 0x120   : > { %p5542_p13 = scmp.ne.s32.totalorder %s9305_s6, %s5541_s26  ;;  %p5548_p4 = scmp.lt.u32.totalorder %s5541_s26, %s9305_s6 }
 0x122   : > { %p5544_p0 = pnand %p5542_p13, %p9303_p8 }
 0x124   : > { %p5545_p5 = pneg %p5544_p0 }
 0x126   : > { %p5550_p10 = pnand %p5548_p4, %p5545_p5 }
 0x128   : > { %5553 = shalt.err (!%p5550_p10)
}
 0x129   : > { %s5554_s29 = scalar_lea.vmem %s506_s2, 1024  ;;  %p5562_p3 = scmp.lt.s32.totalorder %s506_s2, %s506_s2 }
 0x12a   : > { %p5555_p2 = scmp.ne.s32.totalorder %s506_s2, %s5554_s29  ;;  %p5563_p11 = scmp.lt.s32.totalorder %s5554_s29, %s5554_s29 }
 0x12c   : > { %p5557_p7 = pnand %p5555_p2, %p9303_p8  ;;  %p5564_p12 = por %p5563_p11, %p5562_p3 }
 0x12e   : > { %p5558_p9 = pneg %p5557_p7 }
 0x130   : > { %p5565_p1 = pnand %p5564_p12, %p5558_p9 }
 0x132   : > { %5568 = shalt.err (!%p5565_p1)
}
 0x133   : > { %s9151_s19 = smov 64   ;;  %s5897_s5 = smov 4  }
 0x134   : > { %4955 = dma.hbm_to_vmem [thread:$0]  (!%p9304_p6), %s9305_s6, 1024, %s506_s2, [#allocation13], %s9151_s19, %s9151_s19, %s5897_s5  }
 0x135   : > { %s5898_s23 = smov [#allocation17]   ;;  %s5899_s26 = smov [#allocation20]  }
 0x136   : > { %s529_s25 = sshll.u32 %s5898_s23, 4  ;;  %s553_s12 = sshll.u32 %s5899_s26, 4  ;;  %s530_s25 = int_to_ptr.vmem [resolvable:$true] %s529_s25  ;;  %s554_s12 = int_to_ptr.vmem [resolvable:$true] %s553_s12 }
 0x137   : > { %s9306_s8 = sld [smem:[#allocation209_spill]] }
 0x13d   : > { %s5569_s3 = scalar_lea.hbm %s9306_s8, 1024 }
 0x13e   : > { %p5570_p1 = scmp.ne.s32.totalorder %s9306_s8, %s5569_s3  ;;  %p5576_p5 = scmp.lt.u32.totalorder %s5569_s3, %s9306_s8 }
 0x140   : > { %p5572_p13 = pnand %p5570_p1, %p9303_p8 }
 0x142   : > { %p5573_p0 = pneg %p5572_p13 }
 0x144   : > { %p5578_p4 = pnand %p5576_p5, %p5573_p0 }
 0x146   : > { %5581 = shalt.err (!%p5578_p4)
}
 0x147   : > { %s5582_s2 = scalar_lea.vmem %s530_s25, 1024  ;;  %p5590_p9 = scmp.lt.s32.totalorder %s530_s25, %s530_s25 }
 0x148   : > { %p5583_p10 = scmp.ne.s32.totalorder %s530_s25, %s5582_s2  ;;  %p5591_p3 = scmp.lt.s32.totalorder %s5582_s2, %s5582_s2 }
 0x14a   : > { %p5585_p2 = pnand %p5583_p10, %p9303_p8  ;;  %p5592_p11 = por %p5591_p3, %p5590_p9 }
 0x14c   : > { %p5586_p7 = pneg %p5585_p2 }
 0x14e   : > { %p5593_p12 = pnand %p5592_p11, %p5586_p7 }
 0x150   : > { %5596 = shalt.err (!%p5593_p12)
}
 0x151   : > { %4961 = dma.hbm_to_vmem [thread:$0]  (!%p9304_p6), %s9306_s8, 1024, %s530_s25, [#allocation16], %s9151_s19, %s9151_s19, %s5897_s5  }
 0x152   : > { %s9307_s10 = sld [smem:[#allocation211_spill]] }
 0x158   : > { %s5597_s9 = scalar_lea.hbm %s9307_s10, 1024 }
 0x159   : > { %p5598_p1 = scmp.ne.s32.totalorder %s9307_s10, %s5597_s9  ;;  %p5604_p5 = scmp.lt.u32.totalorder %s5597_s9, %s9307_s10 }
 0x15b   : > { %p5600_p13 = pnand %p5598_p1, %p9303_p8 }
 0x15d   : > { %p5601_p0 = pneg %p5600_p13 }
 0x15f   : > { %p5606_p4 = pnand %p5604_p5, %p5601_p0 }
 0x161   : > { %5609 = shalt.err (!%p5606_p4)
}
 0x162   : > { %s5610_s3 = scalar_lea.vmem %s554_s12, 1024  ;;  %p5618_p9 = scmp.lt.s32.totalorder %s554_s12, %s554_s12 }
 0x163   : > { %p5611_p10 = scmp.ne.s32.totalorder %s554_s12, %s5610_s3  ;;  %p5619_p3 = scmp.lt.s32.totalorder %s5610_s3, %s5610_s3 }
 0x165   : > { %p5613_p2 = pnand %p5611_p10, %p9303_p8  ;;  %p5620_p11 = por %p5619_p3, %p5618_p9 }
 0x167   : > { %p5614_p7 = pneg %p5613_p2 }
 0x169   : > { %p5621_p12 = pnand %p5620_p11, %p5614_p7 }
 0x16b   : > { %5624 = shalt.err (!%p5621_p12)
}
 0x16c   : > { %4967 = dma.hbm_to_vmem [thread:$0]  (!%p9304_p6), %s9307_s10, 1024, %s554_s12, [#allocation19], %s9151_s19, %s9151_s19, %s5897_s5  }
 0x16d   : > { %s5900_s2 = smov [#allocation23]   ;;  %s5901_s11 = smov [#allocation26]  }
 0x16e   : > { %s577_s4 = sshll.u32 %s5900_s2, 4  ;;  %s601_s15 = sshll.u32 %s5901_s11, 4  ;;  %s578_s4 = int_to_ptr.vmem [resolvable:$true] %s577_s4  ;;  %s602_s15 = int_to_ptr.vmem [resolvable:$true] %s601_s15 }
 0x16f   : > { %s9308_s23 = sld [smem:[#allocation213_spill]] }
 0x175   : > { %s9309_s20 = smov %s9308_s23  ;;  %s5625_s26 = scalar_lea.hbm %s9308_s23, 256 }
 0x176   : > { %p5626_p1 = scmp.ne.s32.totalorder %s9309_s20, %s5625_s26  ;;  %p5632_p5 = scmp.lt.u32.totalorder %s5625_s26, %s9309_s20 }
 0x178   : > { %p5628_p13 = pnand %p5626_p1, %p9303_p8 }
 0x17a   : > { %p5629_p0 = pneg %p5628_p13 }
 0x17c   : > { %p5634_p4 = pnand %p5632_p5, %p5629_p0 }
 0x17e   : > { %5637 = shalt.err (!%p5634_p4)
}
 0x17f   : > { %s5638_s12 = scalar_lea.vmem %s578_s4, 256  ;;  %p5646_p9 = scmp.lt.s32.totalorder %s578_s4, %s578_s4 }
 0x180   : > { %p5639_p10 = scmp.ne.s32.totalorder %s578_s4, %s5638_s12  ;;  %p5647_p3 = scmp.lt.s32.totalorder %s5638_s12, %s5638_s12 }
 0x182   : > { %p5641_p2 = pnand %p5639_p10, %p9303_p8  ;;  %p5648_p11 = por %p5647_p3, %p5646_p9 }
 0x184   : > { %p5642_p7 = pneg %p5641_p2 }
 0x186   : > { %p5649_p12 = pnand %p5648_p11, %p5642_p7 }
 0x188   : > { %5652 = shalt.err (!%p5649_p12)
}
 0x189   : > { %s9310_s29 = smov 8   ;;  %s9311_s2 = smov 128  }
 0x18a   : > { %4973 = dma.hbm_to_vmem [thread:$0]  (!%p9304_p6), %s9309_s20, 256, %s578_s4, [#allocation22], %s9311_s2, %s9311_s2, %s9310_s29  }
 0x18b   : > { %s9312_s23 = sld [smem:[#allocation215_spill]] }
 0x191   : > { %s9313_s7 = smov %s9312_s23  ;;  %s5653_s26 = scalar_lea.hbm %s9312_s23, 1024 }
 0x192   : > { %p5654_p1 = scmp.ne.s32.totalorder %s9313_s7, %s5653_s26  ;;  %p5660_p5 = scmp.lt.u32.totalorder %s5653_s26, %s9313_s7 }
 0x194   : > { %p5656_p13 = pnand %p5654_p1, %p9303_p8 }
 0x196   : > { %p5657_p0 = pneg %p5656_p13 }
 0x198   : > { %p5662_p4 = pnand %p5660_p5, %p5657_p0 }
 0x19a   : > { %5665 = shalt.err (!%p5662_p4)
}
 0x19b   : > { %s5666_s6 = scalar_lea.vmem %s602_s15, 1024  ;;  %p5674_p9 = scmp.lt.s32.totalorder %s602_s15, %s602_s15 }
 0x19c   : > { %p5667_p10 = scmp.ne.s32.totalorder %s602_s15, %s5666_s6  ;;  %p5675_p3 = scmp.lt.s32.totalorder %s5666_s6, %s5666_s6 }
 0x19e   : > { %p5669_p2 = pnand %p5667_p10, %p9303_p8  ;;  %p5676_p11 = por %p5675_p3, %p5674_p9 }
 0x1a0   : > { %p5670_p7 = pneg %p5669_p2 }
 0x1a2   : > { %p5677_p12 = pnand %p5676_p11, %p5670_p7 }
 0x1a4   : > { %5680 = shalt.err (!%p5677_p12)
}
 0x1a5   : > { %s9314_s4 = smov 64   ;;  %s5902_s1 = smov [#allocation27]  }
 0x1a6   : > { %4979 = dma.hbm_to_vmem [thread:$0]  (!%p9304_p6), %s9313_s7, 1024, %s602_s15, [#allocation25], %s9314_s4, %s9314_s4, %s5897_s5  }
 0x1a7   : > { %s615_s9 = sshll.u32 %s5902_s1, 4  ;;  %s4407_s23 = sshll.u32 %s6207_s24, 4  ;;  %s616_s9 = int_to_ptr.vmem [resolvable:$true] %s615_s9 }
 0x1a8   : > { %s9315_s25 = sld [smem:[#allocation216_spill]] }
 0x1ae   : > { %s9316_s12 = smov %s9315_s25  ;;  %s5681_s6 = scalar_lea.hbm %s9315_s25, 16 }
 0x1af   : > { %p5682_p1 = scmp.ne.s32.totalorder %s9316_s12, %s5681_s6  ;;  %p5688_p5 = scmp.lt.u32.totalorder %s5681_s6, %s9316_s12 }
 0x1b1   : > { %p5684_p13 = pnand %p5682_p1, %p9303_p8 }
 0x1b3   : > { %p5685_p0 = pneg %p5684_p13 }
 0x1b5   : > { %p5690_p4 = pnand %p5688_p5, %p5685_p0 }
 0x1b7   : > { %5693 = shalt.err (!%p5690_p4)
}
 0x1b8   : > { %s5694_s5 = scalar_lea.vmem %s616_s9, 16  ;;  %s5701_s15 = scalar_lea.vmem %s616_s9, 32 }
 0x1b9   : > { %p5695_p10 = scmp.ne.s32.totalorder %s616_s9, %s5694_s5  ;;  %p5702_p9 = scmp.lt.s32.totalorder %s616_s9, %s616_s9 }
 0x1ba   : > { %p5703_p3 = scmp.lt.s32.totalorder %s5701_s15, %s5694_s5 }
 0x1bb   : > { %p5697_p2 = pnand %p5695_p10, %p9303_p8 }
 0x1bc   : > { %p5704_p11 = por %p5703_p3, %p5702_p9 }
 0x1bd   : > { %p5698_p7 = pneg %p5697_p2 }
 0x1bf   : > { %p5705_p12 = pnand %p5704_p11, %p5698_p7 }
 0x1c1   : > { %5708 = shalt.err (!%p5705_p12)
}
 0x1c2   : > { %4982 = dma.hbm_to_vmem [thread:$0]  (!%p9304_p6), %s9316_s12, 16, %s616_s9, [#allocation28]  }
 0x1c3   : > { %s9317_s0 = sld [smem:[#allocation201_spill]]  ;;  %s630_s1 = scalar_lea.vmem [#allocation3], %s4407_s23 }
 0x1c4   : > { %s643_s26 = sshll.u32 %s630_s1, 4  ;;  %s6411_s18 = scalar_lea.vmem [#allocation8], %s4407_s23  ;;  %s6409_s26 = int_to_ptr.vmem [resolvable:$true] %s643_s26 }
 0x1c5   : > { %s694_s3 = sshll.u32 %s6411_s18, 4  ;;  %s627_s25 = scalar_lea.sflag [#allocation4], %s6207_s24  ;;  %s6443_s3 = int_to_ptr.vmem [resolvable:$true] %s694_s3 }
 0x1c6   : > { %p9318_p6 = scmp.ne.s32.totalorder %s9301_s13, 0 }
 0x1c9   : > { %s6407_s11 = scalar_lea.hbm %s9317_s0, %s6210_s28  ;;  %s5714_s5 = scalar_lea.hbm %s9317_s0, 8192 }
 0x1ca   : > { %s5709_s6 = scalar_lea.hbm %s6407_s11, 256  ;;  %p5715_p0 = scmp.lt.u32.totalorder %s6407_s11, %s9317_s0 }
 0x1cb   : > { %p5710_p8 = scmp.ne.s32.totalorder %s6407_s11, %s5709_s6  ;;  %p5716_p5 = scmp.lt.u32.totalorder %s5714_s5, %s5709_s6 }
 0x1cc   : > { %p5718_p10 = scmp.lt.u32.totalorder %s5709_s6, %s6407_s11 }
 0x1cd   : > { %p5712_p1 = pnand %p5710_p8, %p9318_p6  ;;  %p5717_p4 = por %p5716_p5, %p5715_p0 }
 0x1cf   : > { %p5713_p13 = pneg %p5712_p1  ;;  %p5719_p2 = por %p5718_p10, %p5717_p4 }
 0x1d1   : > { %p5720_p7 = pnand %p5719_p2, %p5713_p13 }
 0x1d3   : > { %5723 = shalt.err (!%p5720_p7)
}
 0x1d4   : > { %s5724_s23 = scalar_lea.vmem %s6409_s26, 256  ;;  %s5903_s10 = smov [#allocation3]  }
 0x1d5   : > { %p5725_p9 = scmp.ne.s32.totalorder %s6409_s26, %s5724_s23  ;;  %s5729_s20 = sshll.u32 %s5903_s10, 4  ;;  %s5730_s20 = int_to_ptr.vmem [resolvable:$false] %s5729_s20 }
 0x1d6   : > { %s5731_s4 = scalar_lea.vmem %s5730_s20, 512  ;;  %p5732_p12 = scmp.lt.s32.totalorder %s6409_s26, %s5730_s20 }
 0x1d7   : > { %p5727_p3 = pnand %p5725_p9, %p9318_p6  ;;  %p5733_p8 = scmp.lt.s32.totalorder %s5731_s4, %s5724_s23 }
 0x1d9   : > { %p5728_p11 = pneg %p5727_p3  ;;  %p5734_p1 = por %p5733_p8, %p5732_p12 }
 0x1db   : > { %p5735_p0 = pnand %p5734_p1, %p5728_p11 }
 0x1dd   : > { %5738 = shalt.err (!%p5735_p0)
}
 0x1de   : > { %p9319_p13 = scmp.ne.s32.totalorder %s9299_s14, 0  ;;  %s4486_s1 = sadd.s32 3840, %s6210_s28 }
 0x1df   : > { %s9320_s19 = sld [smem:[#allocation203_spill]] }
 0x1e0   : > { %4986 = dma.hbm_to_vmem [thread:$0]  (!%p9319_p13), %s6407_s11, 256, %s6409_s26, %s627_s25, %s9311_s2, %s9311_s2, %s9310_s29  }
 0x1e5   : > { %s6449_s5 = scalar_lea.hbm %s9320_s19, %s4486_s1  ;;  %s5744_s26 = scalar_lea.hbm %s9320_s19, 8192 }
 0x1e6   : > { %s5739_s24 = scalar_lea.hbm %s6449_s5, 256  ;;  %p5745_p2 = scmp.lt.u32.totalorder %s6449_s5, %s9320_s19 }
 0x1e7   : > { %p5740_p5 = scmp.ne.s32.totalorder %s6449_s5, %s5739_s24  ;;  %p5746_p7 = scmp.lt.u32.totalorder %s5744_s26, %s5739_s24 }
 0x1e8   : > { %p5748_p3 = scmp.lt.u32.totalorder %s5739_s24, %s6449_s5 }
 0x1e9   : > { %p5742_p4 = pnand %p5740_p5, %p9318_p6  ;;  %p5747_p9 = por %p5746_p7, %p5745_p2 }
 0x1eb   : > { %p5743_p10 = pneg %p5742_p4  ;;  %p5749_p11 = por %p5748_p3, %p5747_p9 }
 0x1ed   : > { %p5750_p12 = pnand %p5749_p11, %p5743_p10 }
 0x1ef   : > { %5753 = shalt.err (!%p5750_p12)
}
 0x1f0   : > { %s5754_s25 = scalar_lea.vmem %s6443_s3, 256  ;;  %s5904_s8 = smov [#allocation8]  }
 0x1f1   : > { %p5755_p8 = scmp.ne.s32.totalorder %s6443_s3, %s5754_s25  ;;  %s5759_s23 = sshll.u32 %s5904_s8, 4  ;;  %s5760_s23 = int_to_ptr.vmem [resolvable:$false] %s5759_s23 }
 0x1f2   : > { %s5761_s10 = scalar_lea.vmem %s5760_s23, 512  ;;  %p5762_p5 = scmp.lt.s32.totalorder %s6443_s3, %s5760_s23 }
 0x1f3   : > { %p5757_p1 = pnand %p5755_p8, %p9318_p6  ;;  %p5763_p4 = scmp.lt.s32.totalorder %s5761_s10, %s5754_s25 }
 0x1f5   : > { %p5758_p0 = pneg %p5757_p1  ;;  %p5764_p2 = por %p5763_p4, %p5762_p5 }
 0x1f7   : > { %p5765_p7 = pnand %p5764_p2, %p5758_p0 }
 0x1f9   : > { %5768 = shalt.err (!%p5765_p7)
}
 0x1fa   : > { %4992 = dma.hbm_to_vmem [thread:$0]  (!%p9319_p13), %s6449_s5, 256, %s6443_s3, %s6228_s16, %s9311_s2, %s9311_s2, %s9310_s29  }
 0x1fb   : > { %s9321_s13 = sld [smem:[#allocation44_spill]] }
 0x201   : > { %p9322_p6 = scmp.ne.s32.totalorder %s9321_s13, 0 }
 0x203   : > { %706 = sbr.rel (%p9322_p6) target bundleno = 1914 (0x77a), region = 84 }
 0x20a   : > { %s6479_s20 = sand.u32 1, %s5867_s22   ;;  %p9323_p10 = scmp.ne.s32.totalorder %s9294_s17, 0 }
 0x20b   : > { %s4417_s4 = sshll.u32 %s6479_s20, 4  ;;  %s709_s1 = scalar_lea.sflag [#allocation4], %s6479_s20 }
 0x20c   : > { %s6483_s6 = scalar_lea.vmem [#allocation3], %s4417_s4 }
 0x20d   : > { %5822 = dma.done.wait (%p9323_p10), %s709_s1, 256  }
 0x20e   : > { %5824 = vsyncadd (%p9323_p10), %s709_s1, 4294967040  ;;  %s717_s14 = sand.u32 1, %s6024_s27   ;;  %s4418_s16 = sshll.u32 %s6479_s20, 8 }
 0x20f   : > { %s718_s29 = scalar_lea.sflag [#allocation7], %s717_s14  ;;  %s6493_s2 = scalar_lea.vmem [#allocation6], %s4418_s16 }
 0x210   : > { %5826 = dma.done.wait (%p9323_p10), %s718_s29, 4352  }
 0x211   : > { %5828 = vsyncadd (%p9323_p10), %s718_s29, 4294962944  ;;  %s6499_s3 = scalar_lea.vmem [#allocation8], %s4417_s4  ;;  %p9324_p13 = scmp.eq.s32.totalorder %s6024_s27, 0 }
 0x213   : > { %5830 = dma.done.wait (%p9324_p13), [#allocation10], 64   ;;  %p9325_p9 = pmov %p9324_p13 }
 0x215   : > { %5832 = vsyncadd (%p9325_p9), [#allocation10], 4294967232  ;;  %p9326_p3 = pmov %p9325_p9 }
 0x217   : > { %5834 = dma.done.wait (%p9326_p3), [#allocation13], 1056   ;;  %p9327_p11 = pmov %p9326_p3 }
 0x218   : > { %p9328_p12 = pmov %p9326_p3 }
 0x219   : > { %5836 = vsyncadd (%p9327_p11), [#allocation13], 4294966240 }
 0x21a   : > { %5838 = dma.done.wait (%p9328_p12), [#allocation16], 1040   ;;  %p9329_p8 = pmov %p9326_p3 }
 0x21b   : > { %p9330_p1 = pmov %p9326_p3 }
 0x21c   : > { %5840 = vsyncadd (%p9329_p8), [#allocation16], 4294966256 }
 0x21d   : > { %5842 = dma.done.wait (%p9330_p1), [#allocation19], 1040   ;;  %p9331_p0 = pmov %p9330_p1 }
 0x21f   : > { %5844 = vsyncadd (%p9331_p0), [#allocation19], 4294966256  ;;  %p9332_p5 = pmov %p9331_p0 }
 0x220   : > { %p9333_p4 = pmov %p9331_p0 }
 0x221   : > { %5846 = dma.done.wait (%p9332_p5), [#allocation22], 272  }
 0x222   : > { %5848 = vsyncadd (%p9333_p4), [#allocation22], 4294967024  ;;  %p9334_p2 = pmov %p9331_p0 }
 0x223   : > { %p9335_p7 = pmov %p9331_p0 }
 0x224   : > { %5850 = dma.done.wait (%p9334_p2), [#allocation25], 1040  }
 0x225   : > { %5852 = vsyncadd (%p9335_p7), [#allocation25], 4294966256  ;;  %p9336_p6 = pmov %p9331_p0 }
 0x226   : > { %p9337_p10 = pmov %p9331_p0 }
 0x227   : > { %5854 = dma.done.wait (%p9336_p6), [#allocation28], 16  }
 0x228   : > { %5856 = vsyncadd (%p9337_p10), [#allocation28], 4294967280  ;;  %v6529_v0 = vld [vmem:[#allocation14] sm:$0xff]   ;;  %v6531_v1 = vld [vmem:[#allocation14 + $0x8] sm:$0xff]   ;;  %s8929_s27 = scalar_lea.vmem [#allocation29], %s4418_s16  ;;  %s9746_s17 = sld [smem:[#allocation41_spill]] }
 0x229   : > { %4615 = vmatprep.subr.bf16.mxu0 %v6529_v0  ;;  %v5094_v2 = vld [vmem:[#allocation14 + $0x10] sm:$0xff]   ;;  %v5095_v3 = vld [vmem:[#allocation14 + $0x18] sm:$0xff]   ;;  %v930_v7 = vld [vmem:[%s6493_s2 + $0x8] sm:$0xff]  ;;  %s4130_s5 = sshll.u32 %s8929_s27, 4  ;;  %s9751_s11 = sld [smem:[#allocation217_spill]]  ;;  %s9052_s5 = int_to_ptr.vmem [resolvable:$true] %s4130_s5 }
 0x22a   : > { %4616 = vmatpush3.bf16.msra.mxu0 %v6529_v0  ;;  %v6537_v4 = vld [vmem:[#allocation9] ss:$0 sm:$0xff]  ;;  %v6539_v5 = vld [vmem:[#allocation9 + $0x1] ss:$0 sm:$0xff]  ;;  %v5096_v11 = vld [vmem:[#allocation14 + $0x20] sm:$0xff]   ;;  %s4114_s18 = scalar_lea.sflag [#allocation5], %s6479_s20 }
 0x22b   : > { %4617 = vmatprep.subr.bf16.mxu0 %v6531_v1  ;;  %v929_v6 = vld [vmem:[%s6493_s2] sm:$0xff]  ;;  %v966_v9 = vmul.f32 %v6537_v4, %v930_v7  ;;  %v5097_v14 = vld [vmem:[#allocation14 + $0x28] sm:$0xff]   ;;  %v5098_v15 = vld [vmem:[#allocation14 + $0x30] sm:$0xff]   ;;  %s5769_s28 = scalar_lea.vmem %s9052_s5, 4096  ;;  %p9753_p9 = scmp.ne.s32.totalorder %s9295_s30, 0 }
 0x22c   : > { %v965_v8 = vmul.f32 %v6537_v4, %v929_v6  ;;  %v931_v16 = vld [vmem:[%s6493_s2 + $0x10] sm:$0xff]  ;;  %v932_v17 = vld [vmem:[%s6493_s2 + $0x18] sm:$0xff]  ;;  %v933_v18 = vld [vmem:[%s6493_s2 + $0x20] sm:$0xff]  ;;  %p5770_p13 = scmp.ne.s32.totalorder %s9052_s5, %s5769_s28  ;;  %s5905_s25 = smov [#allocation29]  }
 0x22d   : > { %v6549_v12 = vadd.f32 %v6539_v5, %v966_v9  ;;  %v934_v19 = vld [vmem:[%s6493_s2 + $0x28] sm:$0xff]  ;;  %v5099_v21 = vld [vmem:[#allocation14 + $0x38] sm:$0xff]   ;;  %v967_v22 = vmul.f32 %v6537_v4, %v931_v16  ;;  %v968_v23 = vmul.f32 %v6537_v4, %v932_v17  ;;  %v5101_v24 = vld [vmem:[#allocation17 + $0x8] sm:$0xff]   ;;  %v969_v25 = vmul.f32 %v6537_v4, %v933_v18  ;;  %s5773_s8 = sshll.u32 %s5905_s25, 4  ;;  %s5774_s8 = int_to_ptr.vmem [resolvable:$false] %s5773_s8 }
 0x22e   : > { %4618 = vmatpush3.bf16.msra.mxu0 %v6531_v1  ;;  %v6546_v10 = vadd.f32 %v6539_v5, %v965_v8  ;;  %v5100_v20 = vld [vmem:[#allocation17] sm:$0xff]   ;;  %v970_v26 = vmul.f32 %v6537_v4, %v934_v19  ;;  %v935_v27 = vld [vmem:[%s6493_s2 + $0x30] sm:$0xff]  ;;  %v936_v28 = vld [vmem:[%s6493_s2 + $0x38] sm:$0xff]  ;;  %s4487_s9 = sshll.u32 %s9746_s17, 12  ;;  %p5771_p3 = pnand %p5770_p13, %p9753_p9 }
 0x22f   : > { %4619 = vmatprep.subr.bf16.mxu0 %v5094_v2  ;;  %4867 = vmatprep.subr.bf16.mxu1 %v5100_v20  ;;  %v6564_v29 = vadd.f32 %v6539_v5, %v967_v22  ;;  %v6567_v30 = vadd.f32 %v6539_v5, %v968_v23  ;;  %v937_v31 = vld [vmem:[%s6493_s2 + $0x40] sm:$0xff]  ;;  %v938_v32 = vld [vmem:[%s6493_s2 + $0x48] sm:$0xff]  ;;  %v6572_v33 = vadd.f32 %v6539_v5, %v969_v25  ;;  %v939_v41 = vld [vmem:[%s6493_s2 + $0x50] sm:$0xff]  ;;  %s9050_s26 = scalar_lea.hbm %s9751_s11, %s4487_s9  ;;  %s5775_s23 = scalar_lea.vmem %s5774_s8, 8192 }
 0x230   : > { %v1033_v13 = vpack.c.bf16 %v6549_v12, %v6546_v10  ;;  %4875 = vmatpush3.bf16.msra.mxu1 %v5100_v20  ;;  %v6575_v34 = vadd.f32 %v6539_v5, %v970_v26  ;;  %v971_v36 = vmul.f32 %v6537_v4, %v935_v27  ;;  %v972_v37 = vmul.f32 %v6537_v4, %v936_v28  ;;  %v940_v42 = vld [vmem:[%s6493_s2 + $0x58] sm:$0xff]  ;;  %v941_v47 = vld [vmem:[%s6493_s2 + $0x60] sm:$0xff]  ;;  %v942_v48 = vld [vmem:[%s6493_s2 + $0x68] sm:$0xff]  ;;  %p5772_p11 = pneg %p5771_p3  ;;  %p5776_p12 = scmp.lt.s32.totalorder %s9052_s5, %s5774_s8 }
 0x231   : > { %4868 = vmatprep.subr.bf16.mxu1 %v5101_v24  ;;  %v1034_v35 = vpack.c.bf16 %v6567_v30, %v6564_v29  ;;  %v973_v39 = vmul.f32 %v6537_v4, %v937_v31  ;;  %v974_v40 = vmul.f32 %v6537_v4, %v938_v32  ;;  %v975_v50 = vmul.f32 %v6537_v4, %v939_v41  ;;  %v943_v59 = vld [vmem:[%s6493_s2 + $0x70] sm:$0xff]  ;;  %v944_v60 = vld [vmem:[%s6493_s2 + $0x78] sm:$0xff]  ;;  %v945_v61 = vld [vmem:[%s6493_s2 + $0x80] sm:$0xff]  ;;  %p5777_p8 = scmp.lt.s32.totalorder %s5775_s23, %s5769_s28 }
 0x232   : > { %4620 = vmatpush3.bf16.msra.mxu0 %v5094_v2  ;;  %4631 = vmatprep.mubr.bf16.mxu0 %v1033_v13  ;;  %v1035_v38 = vpack.c.bf16 %v6575_v34, %v6572_v33  ;;  %v6588_v43 = vadd.f32 %v6539_v5, %v971_v36  ;;  %v6591_v44 = vadd.f32 %v6539_v5, %v972_v37  ;;  %v946_v62 = vld [vmem:[%s6493_s2 + $0x88] sm:$0xff]  ;;  %v948_v16 = vld [vmem:[%s6493_s2 + $0x98] sm:$0xff]  ;;  %v949_v17 = vld [vmem:[%s6493_s2 + $0xa0] sm:$0xff] }
 0x233   : > { %4621 = vmatprep.subr.bf16.mxu0 %v5095_v3  ;;  %v6594_v45 = vadd.f32 %v6539_v5, %v973_v39  ;;  %v6597_v46 = vadd.f32 %v6539_v5, %v974_v40  ;;  %v976_v51 = vmul.f32 %v6537_v4, %v940_v42  ;;  %v977_v53 = vmul.f32 %v6537_v4, %v941_v47  ;;  %v950_v18 = vld [vmem:[%s6493_s2 + $0xa8] sm:$0xff]  ;;  %v951_v31 = vld [vmem:[%s6493_s2 + $0xb0] sm:$0xff]  ;;  %v952_v32 = vld [vmem:[%s6493_s2 + $0xb8] sm:$0xff]  ;;  %p5778_p1 = por %p5777_p8, %p5776_p12 }
 0x234   : > { %4876 = vmatpush3.bf16.msra.mxu1 %v5101_v24  ;;  %v1036_v49 = vpack.c.bf16 %v6591_v44, %v6588_v43  ;;  %v978_v54 = vmul.f32 %v6537_v4, %v942_v48  ;;  %v6610_v55 = vadd.f32 %v6539_v5, %v975_v50  ;;  %v979_v2 = vmul.f32 %v6537_v4, %v943_v59  ;;  %v954_v36 = vld [vmem:[%s6493_s2 + $0xc8] sm:$0xff] }
 0x235   : > { %v1037_v52 = vpack.c.bf16 %v6597_v46, %v6594_v45  ;;  %v6613_v56 = vadd.f32 %v6539_v5, %v976_v51  ;;  %v6616_v57 = vadd.f32 %v6539_v5, %v977_v53  ;;  %v981_v7 = vmul.f32 %v6537_v4, %v945_v61  ;;  %v955_v51 = vld [vmem:[%s6493_s2 + $0xd0] sm:$0xff]  ;;  %v957_v53 = vld [vmem:[%s6493_s2 + $0xe0] sm:$0xff]  ;;  %p5779_p0 = pnand %p5778_p1, %p5772_p11 }
 0x236   : > { %4622 = vmatpush3.bf16.msra.mxu0 %v5095_v3  ;;  %v6619_v58 = vadd.f32 %v6539_v5, %v978_v54  ;;  %v980_v3 = vmul.f32 %v6537_v4, %v944_v60  ;;  %v982_v8 = vmul.f32 %v6537_v4, %v946_v62  ;;  %v6634_v9 = vadd.f32 %v6539_v5, %v979_v2  ;;  %v958_v54 = vld [vmem:[%s6493_s2 + $0xe8] sm:$0xff] }
 0x237   : > { %4623 = vmatprep.subr.bf16.mxu0 %v5096_v11  ;;  %v1038_v63 = vpack.c.bf16 %v6613_v56, %v6610_v55  ;;  %v6640_v13 = vadd.f32 %v6539_v5, %v981_v7  ;;  %v985_v23 = vmul.f32 %v6537_v4, %v949_v17  ;;  %v988_v39 = vmul.f32 %v6537_v4, %v952_v32  ;;  %v6757_v32 = vld [vmem:[#allocation17 + $0x30] sm:$0xff]  }
 0x238   : > { %v1039_v6 = vpack.c.bf16 %v6619_v58, %v6616_v57  ;;  %v990_v42 = vmul.f32 %v6537_v4, %v954_v36  ;;  %v991_v60 = vmul.f32 %v6537_v4, %v955_v51  ;;  %v994_v2 = vmul.f32 %v6537_v4, %v958_v54  ;;  %v6770_v36 = vld [vmem:[#allocation20] sm:$0xff]  }
 0x239   : > { %v6664_v27 = vadd.f32 %v6539_v5, %v985_v23  ;;  %v6685_v48 = vadd.f32 %v6539_v5, %v988_v39 }
 0x23a   : > { %4624 = vmatpush3.bf16.msra.mxu0 %v5096_v11  ;;  %v6637_v11 = vadd.f32 %v6539_v5, %v980_v3  ;;  %v6691_v50 = vadd.f32 %v6539_v5, %v990_v42  ;;  %v6706_v3 = vadd.f32 %v6539_v5, %v991_v60 }
 0x23b   : > { %4625 = vmatprep.subr.bf16.mxu0 %v5097_v14  ;;  %9339 = vst [vmem:[#allocation49_spill] sm:$0xff] %v6664_v27  ;;  %9342 = vst [vmem:[#allocation52_spill] sm:$0xff] %v6685_v48 }
 0x23c   : > { %v1040_v19 = vpack.c.bf16 %v6637_v11, %v6634_v9  ;;  %9344 = vst [vmem:[#allocation54_spill] sm:$0xff] %v6691_v50  ;;  %9345 = vst [vmem:[#allocation55_spill] sm:$0xff] %v6706_v3 }
 0x23e   : > { %4626 = vmatpush3.bf16.msra.mxu0 %v5097_v14  ;;  %v6643_v14 = vadd.f32 %v6539_v5, %v982_v8  ;;  %v6715_v8 = vadd.f32 %v6539_v5, %v994_v2 }
 0x23f   : > { %4627 = vmatprep.subr.bf16.mxu0 %v5098_v15 }
 0x240   : > { %9338 = vst [vmem:[#allocation48_spill] sm:$0xff] %v6643_v14  ;;  %v1041_v22 = vpack.c.bf16 %v6643_v14, %v6640_v13  ;;  %9348 = vst [vmem:[#allocation58_spill] sm:$0xff] %v6715_v8 }
 0x242   : > { %4628 = vmatpush3.bf16.msra.mxu0 %v5098_v15  ;;  %v947_v15 = vld [vmem:[%s6493_s2 + $0x90] sm:$0xff] }
 0x243   : > { %4629 = vmatprep.subr.bf16.mxu0 %v5099_v21 }
 0x246   : > { %4630 = vmatpush3.bf16.msra.mxu0 %v5099_v21  ;;  %v984_v21 = vmul.f32 %v6537_v4, %v948_v16  ;;  %v960_v16 = vld [vmem:[%s6493_s2 + $0xf8] sm:$0xff] }
 0x247   : > { %4663 = vmatprep.subr.bf16.mxu0 %v5100_v20 }
 0x248   : > { %v6661_v26 = vadd.f32 %v6539_v5, %v984_v21 }
 0x249   : > { %4632 = vmatmul.mubr.bf16.vlgmr.msra.gmra.mrb[0].mxu0 %v1034_v35  ;;  %v953_v35 = vld [vmem:[%s6493_s2 + $0xc0] sm:$0xff] }
 0x24a   : > { %4635 = vmatprep.mubr.bf16.mxu0 %v1035_v38  ;;  %4664 = vmatpush3.bf16.msra.mxu0 %v5100_v20  ;;  %v983_v20 = vmul.f32 %v6537_v4, %v947_v15  ;;  %v987_v38 = vmul.f32 %v6537_v4, %v951_v31  ;;  %v989_v41 = vmul.f32 %v6537_v4, %v953_v35  ;;  %v959_v15 = vld [vmem:[%s6493_s2 + $0xf0] sm:$0xff]  ;;  %v6763_v35 = vld [vmem:[#allocation17 + $0x38] sm:$0xff]  }
 0x24b   : > { %4665 = vmatprep.subr.bf16.mxu0 %v5101_v24  ;;  %v6751_v31 = vld [vmem:[#allocation17 + $0x28] sm:$0xff]  }
 0x24c   : > { %v6658_v25 = vadd.f32 %v6539_v5, %v983_v20  ;;  %v6682_v47 = vadd.f32 %v6539_v5, %v987_v38 }
 0x24e   : > { %4666 = vmatpush3.bf16.msra.mxu0 %v5101_v24  ;;  %v986_v24 = vmul.f32 %v6537_v4, %v950_v18  ;;  %v1042_v37 = vpack.c.bf16 %v6661_v26, %v6658_v25  ;;  %9341 = vst [vmem:[#allocation51_spill] sm:$0xff] %v6682_v47  ;;  %v1044_v59 = vpack.c.bf16 %v6685_v48, %v6682_v47 }
 0x24f   : > { %v995_v18 = vmul.f32 %v6537_v4, %v959_v15 }
 0x250   : > { %v6667_v28 = vadd.f32 %v6539_v5, %v986_v24  ;;  %v6733_v24 = vld [vmem:[#allocation17 + $0x10] sm:$0xff]  }
 0x251   : > { %4636 = vmatmul.mubr.bf16.gmra.mrb[4].mxu0 %v1036_v49  ;;  %v6688_v49 = vadd.f32 %v6539_v5, %v989_v41  ;;  %v6726_v21 = vadd.f32 %v6539_v5, %v995_v18  ;;  %4667 = vmatprep.subr.bf16.mxu0 %v6733_v24 }
 0x252   : > { %4639 = vmatprep.mubr.bf16.mxu0 %v1037_v52  ;;  %9340 = vst [vmem:[#allocation50_spill] sm:$0xff] %v6667_v28  ;;  %v1043_v40 = vpack.c.bf16 %v6667_v28, %v6664_v27  ;;  %v956_v52 = vld [vmem:[%s6493_s2 + $0xd8] sm:$0xff]  ;;  %4869 = vmatprep.subr.bf16.mxu1 %v6733_v24 }
 0x253   : > { %9343 = vst [vmem:[#allocation53_spill] sm:$0xff] %v6688_v49  ;;  %v992_v61 = vmul.f32 %v6537_v4, %v956_v52  ;;  %v1045_v62 = vpack.c.bf16 %v6691_v50, %v6688_v49  ;;  %9349 = vst [vmem:[#allocation59_spill] sm:$0xff] %v6726_v21  ;;  %4668 = vmatpush3.bf16.msra.mxu0 %v6733_v24  ;;  %4877 = vmatpush3.bf16.msra.mxu1 %v6733_v24 }
 0x259   : > { %4640 = vmatmul.mubr.bf16.gmra.mrb[8].mxu0 %v1038_v63  ;;  %v993_v63 = vmul.f32 %v6537_v4, %v957_v53 }
 0x25a   : > { %4643 = vmatprep.mubr.bf16.mxu0 %v1039_v6  ;;  %v6709_v6 = vadd.f32 %v6539_v5, %v992_v61 }
 0x25b   : > { %v6712_v7 = vadd.f32 %v6539_v5, %v993_v63 }
 0x25c   : > { %9346 = vst [vmem:[#allocation56_spill] sm:$0xff] %v6709_v6  ;;  %v1046_v17 = vpack.c.bf16 %v6709_v6, %v6706_v3 }
 0x25d   : > { %9347 = vst [vmem:[#allocation57_spill] sm:$0xff] %v6712_v7  ;;  %v1047_v20 = vpack.c.bf16 %v6715_v8, %v6712_v7 }
 0x261   : > { %4644 = vmatmul.mubr.bf16.gmra.mrb[12].mxu0 %v1040_v19  ;;  %v996_v19 = vmul.f32 %v6537_v4, %v960_v16  ;;  %v6739_v4 = vld [vmem:[#allocation17 + $0x18] sm:$0xff]  }
 0x262   : > { %4647 = vmatprep.mubr.bf16.mxu0 %v1041_v22  ;;  %4669 = vmatprep.subr.bf16.mxu0 %v6739_v4 }
 0x263   : > { %v6729_v22 = vadd.f32 %v6539_v5, %v996_v19  ;;  %4870 = vmatprep.subr.bf16.mxu1 %v6739_v4  ;;  %4670 = vmatpush3.bf16.msra.mxu0 %v6739_v4  ;;  %v6745_v5 = vld [vmem:[#allocation17 + $0x20] sm:$0xff]  }
 0x264   : > { %4878 = vmatpush3.bf16.msra.mxu1 %v6739_v4  ;;  %4671 = vmatprep.subr.bf16.mxu0 %v6745_v5 }
 0x265   : > { %9350 = vst [vmem:[#allocation60_spill] sm:$0xff] %v6729_v22  ;;  %v1048_v23 = vpack.c.bf16 %v6729_v22, %v6726_v21  ;;  %4871 = vmatprep.subr.bf16.mxu1 %v6745_v5 }
 0x267   : > { %4672 = vmatpush3.bf16.msra.mxu0 %v6745_v5 }
 0x268   : > { %4879 = vmatpush3.bf16.msra.mxu1 %v6745_v5  ;;  %4673 = vmatprep.subr.bf16.mxu0 %v6751_v31 }
 0x269   : > { %4648 = vmatmul.mubr.bf16.gmra.mrb[16].mxu0 %v1042_v37  ;;  %4872 = vmatprep.subr.bf16.mxu1 %v6751_v31  ;;  %v6773_v37 = vld [vmem:[#allocation15] ss:$0 sm:$0xff] }
 0x26a   : > { %4651 = vmatprep.mubr.bf16.mxu0 %v1043_v40 }
 0x26b   : > { %4674 = vmatpush3.bf16.msra.mxu0 %v6751_v31 }
 0x26c   : > { %4880 = vmatpush3.bf16.msra.mxu1 %v6751_v31  ;;  %4675 = vmatprep.subr.bf16.mxu0 %v6757_v32 }
 0x26d   : > { %4873 = vmatprep.subr.bf16.mxu1 %v6757_v32 }
 0x26f   : > { %4676 = vmatpush3.bf16.msra.mxu0 %v6757_v32 }
 0x270   : > { %4881 = vmatpush3.bf16.msra.mxu1 %v6757_v32  ;;  %4677 = vmatprep.subr.bf16.mxu0 %v6763_v35 }
 0x271   : > { %4652 = vmatmul.mubr.bf16.gmra.mrb[20].mxu0 %v1044_v59  ;;  %4874 = vmatprep.subr.bf16.mxu1 %v6763_v35 }
 0x272   : > { %4655 = vmatprep.mubr.bf16.mxu0 %v1045_v62 }
 0x273   : > { %4678 = vmatpush3.bf16.msra.mxu0 %v6763_v35 }
 0x274   : > { %4882 = vmatpush3.bf16.msra.mxu1 %v6763_v35  ;;  %4711 = vmatprep.subr.bf16.mxu0 %v6770_v36 }
 0x275   : > { %4759 = vmatprep.subr.bf16.mxu1 %v6529_v0 }
 0x279   : > { %4656 = vmatmul.mubr.bf16.gmra.mrb[24].mxu0 %v1046_v17 }
 0x27a   : > { %4659 = vmatprep.mubr.bf16.mxu0 %v1047_v20 }
 0x281   : > { %4660 = vmatmul.mubr.bf16.gmra.mrb[28].mxu0 %v1048_v23 }
 0x31c   : > { %v4633_v38 = vpop.f32.mrb[0].mxu0 }
 0x31d   : > { %v1146_v39 = vadd.f32 %v4633_v38, %v6773_v37  ;;  %v1137_v40 = vpop.f32.mrb[1].mxu0 }
 0x31e   : > { %v1138_v41 = vadd.f32 %v6773_v37, %v1137_v40  ;;  %v4634_v42 = vpop.f32.mrb[2].mxu0 }
 0x31f   : > { %v1298_v51 = vmul.f32 0.70710677, %v1146_v39  ;;  %v1149_v52 = vadd.f32 %v4634_v42, %v6773_v37  ;;  %v1140_v53 = vpop.f32.mrb[3].mxu0  ;;  %v1266_v8 = vmul.f32 0.5, %v1146_v39 }
 0x320   : > { %v1296_v54 = vmul.f32 0.70710677, %v1138_v41  ;;  %v1141_v59 = vadd.f32 %v6773_v37, %v1140_v53  ;;  %v1264_v7 = vmul.f32 0.5, %v1138_v41 }
 0x321   : > { %5124 = verf.f32 %v1298_v51  ;;  %v1299_v60 = vmul.f32 0.70710677, %v1149_v52  ;;  %v1267_v22 = vmul.f32 0.5, %v1149_v52 }
 0x322   : > { %5126 = verf.f32 %v1296_v54  ;;  %v1297_v61 = vmul.f32 0.70710677, %v1141_v59 }
 0x323   : > { %5128 = verf.f32 %v1299_v60 }
 0x324   : > { %5130 = verf.f32 %v1297_v61  ;;  %v4637_v62 = vpop.f32.mrb[4].mxu0 }
 0x325   : > { %v1162_v63 = vadd.f32 %v4637_v62, %v6773_v37  ;;  %v1153_v2 = vpop.f32.mrb[5].mxu0 }
 0x326   : > { %v6781_v15 = vadd.f32 %v6773_v37, %v1153_v2  ;;  %v4638_v16 = vpop.f32.mrb[6].mxu0 }
 0x327   : > { %v1302_v17 = vmul.f32 0.70710677, %v1162_v63  ;;  %v1165_v18 = vadd.f32 %v4638_v16, %v6773_v37  ;;  %v1156_v19 = vpop.f32.mrb[7].mxu0 }
 0x328   : > { %v1300_v20 = vmul.f32 0.70710677, %v6781_v15  ;;  %v1157_v23 = vadd.f32 %v6773_v37, %v1156_v19 }
 0x329   : > { %5132 = verf.f32 %v1302_v17  ;;  %v1303_v38 = vmul.f32 0.70710677, %v1165_v18 }
 0x32a   : > { %5134 = verf.f32 %v1300_v20  ;;  %v1301_v40 = vmul.f32 0.70710677, %v1157_v23 }
 0x32b   : > { %v5125_v42 = vpop.eup %5124  ;;  %5136 = verf.f32 %v1303_v38  ;;  %v1265_v38 = vmul.f32 0.5, %v1141_v59 }
 0x32c   : > { %v5127_v51 = vpop.eup %5126  ;;  %v1362_v53 = vadd.f32 1.0, %v5125_v42  ;;  %5138 = verf.f32 %v1301_v40  ;;  %v4641_v54 = vpop.f32.mrb[8].mxu0 }
 0x32d   : > { %v5129_v60 = vpop.eup %5128  ;;  %v1360_v61 = vadd.f32 1.0, %v5127_v51  ;;  %v6787_v62 = vadd.f32 %v4641_v54, %v6773_v37  ;;  %v1169_v2 = vpop.f32.mrb[9].mxu0 }
 0x32e   : > { %v5131_v16 = vpop.eup %5130  ;;  %v1363_v19 = vadd.f32 1.0, %v5129_v60  ;;  %v6790_v17 = vadd.f32 %v6773_v37, %v1169_v2  ;;  %v4642_v20 = vpop.f32.mrb[10].mxu0  ;;  %v1394_v50 = vmul.f32 %v1362_v53, %v1266_v8 }
 0x32f   : > { %v1361_v21 = vadd.f32 1.0, %v5131_v16  ;;  %v1306_v40 = vmul.f32 0.70710677, %v6787_v62  ;;  %v1172_v42 = vpop.f32.mrb[11].mxu0  ;;  %v6795_v6 = vadd.f32 %v4642_v20, %v6773_v37  ;;  %v1392_v39 = vmul.f32 %v1360_v61, %v1264_v7  ;;  %v6802_v20 = vld [vmem:[#allocation20 + $0x8] sm:$0xff]  }
 0x330   : > { %v1395_v51 = vmul.f32 %v1363_v19, %v1267_v22  ;;  %v1304_v54 = vmul.f32 0.70710677, %v6790_v17  ;;  %v6798_v60 = vadd.f32 %v6773_v37, %v1172_v42  ;;  %v1271_v42 = vmul.f32 0.5, %v1165_v18 }
 0x331   : > { %v1393_v52 = vmul.f32 %v1361_v21, %v1265_v38  ;;  %5140 = verf.f32 %v1306_v40  ;;  %v1307_v41 = vmul.f32 0.70710677, %v6795_v6  ;;  %v1270_v40 = vmul.f32 0.5, %v1162_v63 }
 0x332   : > { %v1425_v2 = vpack.c.bf16 %v1395_v51, %v1394_v50  ;;  %5142 = verf.f32 %v1304_v54  ;;  %v1305_v16 = vmul.f32 0.70710677, %v6798_v60 }
 0x333   : > { %v5133_v59 = vpop.eup %5132  ;;  %v1424_v8 = vpack.c.bf16 %v1393_v52, %v1392_v39  ;;  %5144 = verf.f32 %v1307_v41  ;;  %v1268_v52 = vmul.f32 0.5, %v6781_v15  ;;  %v1269_v41 = vmul.f32 0.5, %v1157_v23 }
 0x334   : > { %v5135_v22 = vpop.eup %5134  ;;  %v1366_v53 = vadd.f32 1.0, %v5133_v59  ;;  %v4645_v19 = vpop.f32.mrb[12].mxu0  ;;  %5146 = verf.f32 %v1305_v16 }
 0x335   : > { %v5137_v7 = vpop.eup %5136  ;;  %v1364_v21 = vadd.f32 1.0, %v5135_v22  ;;  %v6805_v61 = vadd.f32 %v4645_v19, %v6773_v37  ;;  %v1185_v50 = vpop.f32.mrb[13].mxu0  ;;  %4679 = vmatprep.mubr.bf16.mxu0 %v1424_v8 }
 0x336   : > { %v5139_v38 = vpop.eup %5138  ;;  %v1367_v51 = vadd.f32 1.0, %v5137_v7  ;;  %v6808_v54 = vadd.f32 %v6773_v37, %v1185_v50  ;;  %v4646_v39 = vpop.f32.mrb[14].mxu0  ;;  %4680 = vmatmul.mubr.bf16.vlgmr.msra.gmra.mrb[32].mxu0 %v1425_v2  ;;  %v1398_v19 = vmul.f32 %v1366_v53, %v1270_v40  ;;  %v6818_v7 = vld [vmem:[#allocation20 + $0x10] sm:$0xff]  }
 0x337   : > { %v1365_v59 = vadd.f32 1.0, %v5139_v38  ;;  %v1310_v16 = vmul.f32 0.70710677, %v6805_v61  ;;  %v1188_v22 = vpop.f32.mrb[15].mxu0  ;;  %4712 = vmatpush3.bf16.msra.mxu0 %v6770_v36  ;;  %v6815_v18 = vadd.f32 %v4646_v39, %v6773_v37  ;;  %v1396_v2 = vmul.f32 %v1364_v21, %v1268_v52  ;;  %v6827_v21 = vld [vmem:[#allocation20 + $0x18] sm:$0xff]  }
 0x338   : > { %v1399_v8 = vmul.f32 %v1367_v51, %v1271_v42  ;;  %v1308_v63 = vmul.f32 0.70710677, %v6808_v54  ;;  %4713 = vmatprep.subr.bf16.mxu0 %v6802_v20  ;;  %v6821_v23 = vadd.f32 %v6773_v37, %v1188_v22  ;;  %v1274_v22 = vmul.f32 0.5, %v6787_v62 }
 0x339   : > { %v1397_v15 = vmul.f32 %v1365_v59, %v1269_v41  ;;  %5148 = verf.f32 %v1310_v16  ;;  %v1311_v50 = vmul.f32 0.70710677, %v6815_v18 }
 0x33a   : > { %5150 = verf.f32 %v1308_v63  ;;  %v1427_v53 = vpack.c.bf16 %v1399_v8, %v1398_v19  ;;  %v1309_v40 = vmul.f32 0.70710677, %v6821_v23 }
 0x33b   : > { %v5141_v38 = vpop.eup %5140  ;;  %v1426_v42 = vpack.c.bf16 %v1397_v15, %v1396_v2  ;;  %4714 = vmatpush3.bf16.msra.mxu0 %v6802_v20  ;;  %5152 = verf.f32 %v1311_v50  ;;  %v1272_v15 = vmul.f32 0.5, %v6790_v17  ;;  %v1275_v50 = vmul.f32 0.5, %v6795_v6 }
 0x33c   : > { %v5143_v51 = vpop.eup %5142  ;;  %v4649_v39 = vpop.f32.mrb[16].mxu0  ;;  %4715 = vmatprep.subr.bf16.mxu0 %v6818_v7  ;;  %v1370_v52 = vadd.f32 1.0, %v5141_v38  ;;  %5154 = verf.f32 %v1309_v40 }
 0x33d   : > { %v6830_v41 = vadd.f32 %v4649_v39, %v6773_v37  ;;  %v1201_v59 = vpop.f32.mrb[17].mxu0  ;;  %4683 = vmatprep.mubr.bf16.mxu0 %v1426_v42  ;;  %v5145_v16 = vpop.eup %5144  ;;  %v1368_v19 = vadd.f32 1.0, %v5143_v51  ;;  %v1273_v42 = vmul.f32 0.5, %v6798_v60 }
 0x33e   : > { %v6834_v8 = vadd.f32 %v6773_v37, %v1201_v59  ;;  %v4650_v63 = vpop.f32.mrb[18].mxu0  ;;  %4684 = vmatmul.mubr.bf16.gmra.mrb[36].mxu0 %v1427_v53  ;;  %v5147_v2 = vpop.eup %5146  ;;  %v1371_v38 = vadd.f32 1.0, %v5145_v16  ;;  %v1402_v53 = vmul.f32 %v1370_v52, %v1274_v22 }
 0x33f   : > { %v1314_v40 = vmul.f32 0.70710677, %v6830_v41  ;;  %v1204_v39 = vpop.f32.mrb[19].mxu0  ;;  %4716 = vmatpush3.bf16.msra.mxu0 %v6818_v7  ;;  %v1369_v62 = vadd.f32 1.0, %v5147_v2  ;;  %v1213_v59 = vadd.f32 %v4650_v63, %v6773_v37  ;;  %v1400_v17 = vmul.f32 %v1368_v19, %v1272_v15 }
 0x340   : > { %v1312_v51 = vmul.f32 0.70710677, %v6834_v8  ;;  %4717 = vmatprep.subr.bf16.mxu0 %v6827_v21  ;;  %v1403_v49 = vmul.f32 %v1371_v38, %v1275_v50  ;;  %v6845_v6 = vadd.f32 %v6773_v37, %v1204_v39  ;;  %v1278_v15 = vmul.f32 0.5, %v6805_v61 }
 0x341   : > { %5156 = verf.f32 %v1314_v40  ;;  %v1401_v16 = vmul.f32 %v1369_v62, %v1273_v42  ;;  %v1315_v3 = vmul.f32 0.70710677, %v1213_v59  ;;  %v1279_v42 = vmul.f32 0.5, %v6815_v18 }
 0x342   : > { %5158 = verf.f32 %v1312_v51  ;;  %v1313_v60 = vmul.f32 0.70710677, %v6845_v6  ;;  %v1429_v2 = vpack.c.bf16 %v1403_v49, %v1402_v53  ;;  %v1277_v53 = vmul.f32 0.5, %v6821_v23 }
 0x343   : > { %v5149_v28 = vpop.eup %5148  ;;  %4718 = vmatpush3.bf16.msra.mxu0 %v6827_v21  ;;  %5160 = verf.f32 %v1315_v3  ;;  %v1428_v27 = vpack.c.bf16 %v1401_v16, %v1400_v17  ;;  %v1276_v3 = vmul.f32 0.5, %v6808_v54 }
 0x344   : > { %v5151_v48 = vpop.eup %5150  ;;  %v4653_v63 = vpop.f32.mrb[20].mxu0  ;;  %v1374_v52 = vadd.f32 1.0, %v5149_v28  ;;  %5162 = verf.f32 %v1313_v60 }
 0x345   : > { %v6850_v22 = vadd.f32 %v4653_v63, %v6773_v37  ;;  %v1217_v50 = vpop.f32.mrb[21].mxu0  ;;  %v5153_v19 = vpop.eup %5152  ;;  %v1372_v38 = vadd.f32 1.0, %v5151_v48  ;;  %4687 = vmatprep.mubr.bf16.mxu0 %v1428_v27 }
 0x346   : > { %v6854_v40 = vadd.f32 %v6773_v37, %v1217_v50  ;;  %v4654_v49 = vpop.f32.mrb[22].mxu0  ;;  %v5155_v39 = vpop.eup %5154  ;;  %v1375_v28 = vadd.f32 1.0, %v5153_v19  ;;  %4688 = vmatmul.mubr.bf16.gmra.mrb[40].mxu0 %v1429_v2  ;;  %v1406_v16 = vmul.f32 %v1374_v52, %v1278_v15 }
 0x347   : > { %v1318_v62 = vmul.f32 0.70710677, %v6850_v22  ;;  %v1220_v51 = vpop.f32.mrb[23].mxu0  ;;  %v1373_v17 = vadd.f32 1.0, %v5155_v39  ;;  %v1229_v61 = vadd.f32 %v4654_v49, %v6773_v37  ;;  %v1404_v54 = vmul.f32 %v1372_v38, %v1276_v3 }
 0x348   : > { %v1316_v48 = vmul.f32 0.70710677, %v6854_v40  ;;  %v1407_v27 = vmul.f32 %v1375_v28, %v1279_v42  ;;  %v6863_v60 = vadd.f32 %v6773_v37, %v1220_v51  ;;  %v1282_v38 = vmul.f32 0.5, %v6830_v41 }
 0x349   : > { %5164 = verf.f32 %v1318_v62  ;;  %v1405_v18 = vmul.f32 %v1373_v17, %v1277_v53  ;;  %v1319_v63 = vmul.f32 0.70710677, %v1229_v61  ;;  %v1280_v3 = vmul.f32 0.5, %v6834_v8 }
 0x34a   : > { %5166 = verf.f32 %v1316_v48  ;;  %v1317_v2 = vmul.f32 0.70710677, %v6863_v60  ;;  %v1431_v19 = vpack.c.bf16 %v1407_v27, %v1406_v16  ;;  %v1283_v42 = vmul.f32 0.5, %v1213_v59 }
 0x34b   : > { %v5157_v50 = vpop.eup %5156  ;;  %5168 = verf.f32 %v1319_v63  ;;  %v1430_v47 = vpack.c.bf16 %v1405_v18, %v1404_v54  ;;  %v1281_v41 = vmul.f32 0.5, %v6845_v6 }
 0x34c   : > { %v5159_v23 = vpop.eup %5158  ;;  %v4657_v39 = vpop.f32.mrb[24].mxu0  ;;  %v1378_v14 = vadd.f32 1.0, %v5157_v50  ;;  %5170 = verf.f32 %v1317_v2 }
 0x34d   : > { %v6867_v52 = vadd.f32 %v4657_v39, %v6773_v37  ;;  %v1233_v15 = vpop.f32.mrb[25].mxu0  ;;  %v5161_v49 = vpop.eup %5160  ;;  %4691 = vmatprep.mubr.bf16.mxu0 %v1430_v47  ;;  %v1376_v27 = vadd.f32 1.0, %v5159_v23 }
 0x34e   : > { %v6872_v28 = vadd.f32 %v6773_v37, %v1233_v15  ;;  %v4658_v62 = vpop.f32.mrb[26].mxu0  ;;  %v5163_v51 = vpop.eup %5162  ;;  %v1379_v53 = vadd.f32 1.0, %v5161_v49  ;;  %4692 = vmatmul.mubr.bf16.gmra.mrb[44].mxu0 %v1431_v19  ;;  %v1410_v47 = vmul.f32 %v1378_v14, %v1282_v38 }
 0x34f   : > { %v1322_v17 = vmul.f32 0.70710677, %v6867_v52  ;;  %v6876_v48 = vadd.f32 %v4658_v62, %v6773_v37  ;;  %v1236_v16 = vpop.f32.mrb[27].mxu0  ;;  %v1377_v54 = vadd.f32 1.0, %v5163_v51  ;;  %v1408_v19 = vmul.f32 %v1376_v27, %v1280_v3 }
 0x350   : > { %v1320_v8 = vmul.f32 0.70710677, %v6872_v28  ;;  %v6881_v59 = vadd.f32 %v6773_v37, %v1236_v16  ;;  %v1411_v18 = vmul.f32 %v1379_v53, %v1283_v42  ;;  %v1286_v51 = vmul.f32 0.5, %v6850_v22 }
 0x351   : > { %5172 = verf.f32 %v1322_v17  ;;  %v1323_v63 = vmul.f32 0.70710677, %v6876_v48  ;;  %v1409_v23 = vmul.f32 %v1377_v54, %v1281_v41  ;;  %v1284_v27 = vmul.f32 0.5, %v6854_v40 }
 0x352   : > { %5174 = verf.f32 %v1320_v8  ;;  %v1321_v50 = vmul.f32 0.70710677, %v6881_v59  ;;  %v1433_v39 = vpack.c.bf16 %v1411_v18, %v1410_v47  ;;  %v1287_v41 = vmul.f32 0.5, %v1229_v61 }
 0x353   : > { %v5165_v2 = vpop.eup %5164  ;;  %5176 = verf.f32 %v1323_v63  ;;  %v1432_v38 = vpack.c.bf16 %v1409_v23, %v1408_v19  ;;  %v1285_v18 = vmul.f32 0.5, %v6863_v60 }
 0x354   : > { %v5167_v6 = vpop.eup %5166  ;;  %5178 = verf.f32 %v1321_v50  ;;  %v4661_v15 = vpop.f32.mrb[28].mxu0  ;;  %v1382_v49 = vadd.f32 1.0, %v5165_v2 }
 0x355   : > { %v6886_v62 = vadd.f32 %v4661_v15, %v6773_v37  ;;  %v1249_v14 = vpop.f32.mrb[29].mxu0  ;;  %v5169_v42 = vpop.eup %5168  ;;  %v1380_v53 = vadd.f32 1.0, %v5167_v6  ;;  %4695 = vmatprep.mubr.bf16.mxu1 %v1432_v38 }
 0x356   : > { %v6890_v17 = vadd.f32 %v6773_v37, %v1249_v14  ;;  %v4662_v16 = vpop.f32.mrb[30].mxu0  ;;  %v5171_v3 = vpop.eup %5170  ;;  %v1383_v8 = vadd.f32 1.0, %v5169_v42  ;;  %4696 = vmatmul.mubr.bf16.vlgmr.msra.gmra.mrb[0].mxu1 %v1433_v39  ;;  %v1414_v2 = vmul.f32 %v1382_v49, %v1286_v51 }
 0x357   : > { %v1326_v54 = vmul.f32 0.70710677, %v6886_v62  ;;  %v1252_v47 = vpop.f32.mrb[31].mxu0  ;;  %v1381_v63 = vadd.f32 1.0, %v5171_v3  ;;  %v1261_v22 = vadd.f32 %v4662_v16, %v6773_v37  ;;  %4760 = vmatpush3.bf16.msra.mxu1 %v6529_v0  ;;  %v1412_v61 = vmul.f32 %v1380_v53, %v1284_v27  ;;  %v5260_v16 = vld [vmem:[#allocation14 + $0x8] sm:$0xff]  }
 0x358   : > { %v1324_v50 = vmul.f32 0.70710677, %v6890_v17  ;;  %v1415_v19 = vmul.f32 %v1383_v8, %v1287_v41  ;;  %v1253_v40 = vadd.f32 %v6773_v37, %v1252_v47  ;;  %4761 = vmatprep.subr.bf16.mxu1 %v6531_v1  ;;  %v1290_v37 = vmul.f32 0.5, %v6867_v52  ;;  %v5261_v1 = vld [vmem:[#allocation14 + $0x10] sm:$0xff]   ;;  %v5262_v52 = vld [vmem:[#allocation14 + $0x18] sm:$0xff]  }
 0x359   : > { %5180 = verf.f32 %v1326_v54  ;;  %v1413_v23 = vmul.f32 %v1381_v63, %v1285_v18  ;;  %v1327_v6 = vmul.f32 0.70710677, %v1261_v22  ;;  %v1291_v53 = vmul.f32 0.5, %v6876_v48 }
 0x35a   : > { %5182 = verf.f32 %v1324_v50  ;;  %v1325_v15 = vmul.f32 0.70710677, %v1253_v40  ;;  %v1435_v14 = vpack.c.bf16 %v1415_v19, %v1414_v2  ;;  %v1288_v27 = vmul.f32 0.5, %v6872_v28  ;;  %v2098_v50 = vld [vmem:[%s6483_s6] sm:$0xff]  ;;  %v2099_v2 = vld [vmem:[%s6483_s6 + $0x8] sm:$0xff] }
 0x35b   : > { %v5173_v60 = vpop.eup %5172  ;;  %5184 = verf.f32 %v1327_v6  ;;  %v1434_v39 = vpack.c.bf16 %v1413_v23, %v1412_v61  ;;  %4762 = vmatpush3.bf16.msra.mxu1 %v5260_v16  ;;  %v1289_v41 = vmul.f32 0.5, %v6881_v59  ;;  %v5263_v28 = vld [vmem:[#allocation9] ss:$0 sm:$0xff]  ;;  %v1292_v16 = vmul.f32 0.5, %v6890_v17 }
 0x35c   : > { %v5175_v38 = vpop.eup %5174  ;;  %v1386_v42 = vadd.f32 1.0, %v5173_v60  ;;  %5186 = verf.f32 %v1325_v15  ;;  %4763 = vmatprep.subr.bf16.mxu1 %v5261_v1  ;;  %v2102_v59 = vmul.f32 %v5263_v28, %v2098_v50  ;;  %v2103_v60 = vmul.f32 %v5263_v28, %v2099_v2 }
 0x35d   : > { %v5177_v49 = vpop.eup %5176  ;;  %v1384_v51 = vadd.f32 1.0, %v5175_v38  ;;  %4699 = vmatprep.mubr.bf16.mxu1 %v1434_v39  ;;  %v1294_v39 = vmul.f32 0.5, %v6886_v62  ;;  %v5266_v62 = vld [vmem:[#allocation14 + $0x28] sm:$0xff]  }
 0x35e   : > { %v5179_v0 = vpop.eup %5178  ;;  %v1387_v3 = vadd.f32 1.0, %v5177_v49  ;;  %v1418_v54 = vmul.f32 %v1386_v42, %v1290_v37  ;;  %4700 = vmatmul.mubr.bf16.gmra.mrb[4].mxu1 %v1435_v14  ;;  %v5264_v14 = vld [vmem:[#allocation14 + $0x20] sm:$0xff]   ;;  %v1295_v49 = vmul.f32 0.5, %v1261_v22 }
 0x35f   : > { %v1385_v8 = vadd.f32 1.0, %v5179_v0  ;;  %v1416_v18 = vmul.f32 %v1384_v51, %v1288_v27  ;;  %4764 = vmatpush3.bf16.msra.mxu1 %v5261_v1  ;;  %v1293_v0 = vmul.f32 0.5, %v1253_v40  ;;  %v5265_v1 = vld [vmem:[#allocation9 + $0x1] ss:$0 sm:$0xff] }
 0x360   : > { %v1419_v47 = vmul.f32 %v1387_v3, %v1291_v53  ;;  %4765 = vmatprep.subr.bf16.mxu1 %v5262_v52  ;;  %v6908_v27 = vadd.f32 %v5265_v1, %v2102_v59 }
 0x361   : > { %v1417_v63 = vmul.f32 %v1385_v8, %v1289_v41  ;;  %v6910_v41 = vadd.f32 %v5265_v1, %v2103_v60  ;;  %v2100_v8 = vld [vmem:[%s6499_s3] sm:$0xff] }
 0x362   : > { %v1437_v48 = vpack.c.bf16 %v1419_v47, %v1418_v54  ;;  %v2101_v54 = vld [vmem:[%s6499_s3 + $0x8] sm:$0xff]  ;;  %v2104_v17 = vmul.f32 %v5263_v28, %v2100_v8 }
 0x363   : > { %v5181_v19 = vpop.eup %5180  ;;  %v1436_v61 = vpack.c.bf16 %v1417_v63, %v1416_v18  ;;  %4766 = vmatpush3.bf16.msra.mxu1 %v5262_v52  ;;  %v2105_v40 = vmul.f32 %v5263_v28, %v2101_v54  ;;  %v2110_v52 = vpack.c.bf16 %v6910_v41, %v6908_v27  ;;  %v6929_v28 = vld [vmem:[#allocation20 + $0x20] sm:$0xff]   ;;  %v5272_v54 = vld [vmem:[%s6493_s2] sm:$0xff] }
 0x364   : > { %v5183_v23 = vpop.eup %5182  ;;  %v1390_v6 = vadd.f32 1.0, %v5181_v19  ;;  %4767 = vmatprep.subr.bf16.mxu1 %v5264_v14  ;;  %v6916_v50 = vadd.f32 %v5265_v1, %v2104_v17  ;;  %v5268_v19 = vld [vmem:[#allocation14 + $0x38] sm:$0xff]   ;;  %4719 = vmatprep.subr.bf16.mxu0 %v6929_v28 }
 0x365   : > { %4703 = vmatprep.mubr.bf16.mxu1 %v1436_v61  ;;  %v5185_v15 = vpop.eup %5184  ;;  %v1388_v38 = vadd.f32 1.0, %v5183_v23  ;;  %v6918_v2 = vadd.f32 %v5265_v1, %v2105_v40  ;;  %v5269_v23 = vld [vmem:[#allocation17] sm:$0xff]   ;;  %4720 = vmatpush3.bf16.msra.mxu0 %v6929_v28 }
 0x366   : > { %v5187_v42 = vpop.eup %5186  ;;  %v1391_v51 = vadd.f32 1.0, %v5185_v15  ;;  %4704 = vmatmul.mubr.bf16.gmra.mrb[8].mxu1 %v1437_v48  ;;  %v1422_v53 = vmul.f32 %v1390_v6, %v1294_v39  ;;  %v5267_v48 = vld [vmem:[#allocation14 + $0x30] sm:$0xff]  }
 0x367   : > { %v1389_v37 = vadd.f32 1.0, %v5187_v42  ;;  %4768 = vmatpush3.bf16.msra.mxu1 %v5264_v14  ;;  %v1420_v47 = vmul.f32 %v1388_v38, %v1292_v16  ;;  %v2111_v61 = vpack.c.bf16 %v6918_v2, %v6916_v50  ;;  %v5270_v6 = vld [vmem:[#allocation17 + $0x8] sm:$0xff]  }
 0x368   : > { %v1423_v3 = vmul.f32 %v1391_v51, %v1295_v49  ;;  %4769 = vmatprep.subr.bf16.mxu1 %v5266_v62 }
 0x369   : > { %v1421_v18 = vmul.f32 %v1389_v37, %v1293_v0 }
 0x36a   : > { %v1439_v22 = vpack.c.bf16 %v1423_v3, %v1422_v53  ;;  %v6965_v3 = vld [vmem:[#allocation11] ss:$0 sm:$0xff] }
 0x36b   : > { %v1438_v63 = vpack.c.bf16 %v1421_v18, %v1420_v47  ;;  %4770 = vmatpush3.bf16.msra.mxu1 %v5266_v62  ;;  %v5273_v62 = vld [vmem:[%s6493_s2 + $0x18] sm:$0xff] }
 0x36c   : > { %4771 = vmatprep.subr.bf16.mxu1 %v5267_v48 }
 0x36d   : > { %4707 = vmatprep.mubr.bf16.mxu1 %v1438_v63 }
 0x36e   : > { %4708 = vmatmul.mubr.bf16.gmra.mrb[12].mxu1 %v1439_v22 }
 0x36f   : > { %4772 = vmatpush3.bf16.msra.mxu1 %v5267_v48  ;;  %4775 = vmatprep.mubr.bf16.mxu1 %v2110_v52 }
 0x370   : > { %4773 = vmatprep.subr.bf16.mxu1 %v5268_v19 }
 0x373   : > { %4774 = vmatpush3.bf16.msra.mxu1 %v5268_v19  ;;  %v6985_v19 = vld [vmem:[#allocation11 + $0x1] ss:$0 sm:$0xff] }
 0x374   : > { %4779 = vmatprep.subr.bf16.mxu1 %v5269_v23 }
 0x376   : > { %4776 = vmatmul.mubr.bf16.vlgmr.msra.gmra.mrb[16].mxu1 %v2111_v61 }
 0x377   : > { %4780 = vmatpush3.bf16.msra.mxu1 %v5269_v23 }
 0x378   : > { %4781 = vmatprep.subr.bf16.mxu1 %v5270_v6 }
 0x37b   : > { %4782 = vmatpush3.bf16.msra.mxu1 %v5270_v6 }
 0x37c   : > { %4783 = vmatprep.subr.bf16.mxu1 %v6733_v24 }
 0x37f   : > { %4784 = vmatpush3.bf16.msra.mxu1 %v6733_v24  ;;  %v6935_v24 = vld [vmem:[#allocation20 + $0x28] sm:$0xff]  }
 0x380   : > { %4785 = vmatprep.subr.bf16.mxu1 %v6739_v4  ;;  %4721 = vmatprep.subr.bf16.mxu0 %v6935_v24 }
 0x381   : > { %4722 = vmatpush3.bf16.msra.mxu0 %v6935_v24 }
 0x383   : > { %4786 = vmatpush3.bf16.msra.mxu1 %v6739_v4  ;;  %v6941_v4 = vld [vmem:[#allocation20 + $0x30] sm:$0xff]  }
 0x384   : > { %4787 = vmatprep.subr.bf16.mxu1 %v6745_v5  ;;  %4723 = vmatprep.subr.bf16.mxu0 %v6941_v4 }
 0x385   : > { %4724 = vmatpush3.bf16.msra.mxu0 %v6941_v4 }
 0x387   : > { %4788 = vmatpush3.bf16.msra.mxu1 %v6745_v5  ;;  %v6946_v5 = vld [vmem:[#allocation20 + $0x38] sm:$0xff]  }
 0x388   : > { %4789 = vmatprep.subr.bf16.mxu1 %v6751_v31  ;;  %4725 = vmatprep.subr.bf16.mxu0 %v6946_v5 }
 0x389   : > { %4726 = vmatpush3.bf16.msra.mxu0 %v6946_v5 }
 0x38a   : > { %4799 = vmatprep.subr.bf16.mxu0 %v6770_v36 }
 0x38b   : > { %4790 = vmatpush3.bf16.msra.mxu1 %v6751_v31  ;;  %v6951_v31 = vld [vmem:[#allocation18] ss:$0 sm:$0xff] }
 0x38c   : > { %4791 = vmatprep.subr.bf16.mxu1 %v6757_v32 }
 0x38f   : > { %4792 = vmatpush3.bf16.msra.mxu1 %v6757_v32 }
 0x390   : > { %4793 = vmatprep.subr.bf16.mxu1 %v6763_v35 }
 0x393   : > { %4794 = vmatpush3.bf16.msra.mxu1 %v6763_v35  ;;  %v6954_v35 = vld [vmem:[#allocation12] ss:$0 sm:$0xff] }
 0x409   : > { %v4681_v32 = vpop.f32.mrb[32].mxu0 }
 0x40a   : > { %v1537_v59 = vadd.f32 %v4681_v32, %v6951_v31  ;;  %v1528_v60 = vpop.f32.mrb[33].mxu0 }
 0x40b   : > { %v1529_v15 = vadd.f32 %v6951_v31, %v1528_v60  ;;  %v4682_v38 = vpop.f32.mrb[34].mxu0 }
 0x40c   : > { %v1657_v14 = vadd.f32 %v1537_v59, %v6564_v29  ;;  %v1540_v42 = vadd.f32 %v4682_v38, %v6951_v31  ;;  %v1531_v39 = vpop.f32.mrb[35].mxu0  ;;  %v5271_v29 = vld [vmem:[%s6493_s2 + $0x10] sm:$0xff] }
 0x40d   : > { %v1655_v49 = vadd.f32 %v1529_v15, %v6546_v10  ;;  %v1532_v51 = vadd.f32 %v6951_v31, %v1531_v39 }
 0x40e   : > { %v1693_v16 = vmul.f32 %v6954_v35, %v1657_v14  ;;  %v1658_v0 = vadd.f32 %v1540_v42, %v6567_v30 }
 0x40f   : > { %v1691_v37 = vmul.f32 %v6954_v35, %v1655_v49  ;;  %v1656_v53 = vadd.f32 %v1532_v51, %v6549_v12  ;;  %v5274_v12 = vld [vmem:[%s6493_s2 + $0x8] sm:$0xff] }
 0x410   : > { %v6968_v1 = vadd.f32 %v5271_v29, %v1693_v16  ;;  %v1694_v8 = vmul.f32 %v6954_v35, %v1658_v0  ;;  %v5275_v0 = vld [vmem:[%s6493_s2 + $0x30] sm:$0xff]  ;;  %v5276_v29 = vld [vmem:[%s6493_s2 + $0x20] sm:$0xff] }
 0x411   : > { %v6972_v10 = vadd.f32 %v5272_v54, %v1691_v37  ;;  %v1692_v47 = vmul.f32 %v6954_v35, %v1656_v53  ;;  %v4685_v18 = vpop.f32.mrb[36].mxu0 }
 0x412   : > { %9351 = vst [vmem:[#allocation61_spill] sm:$0xff] %v6968_v1  ;;  %v6976_v22 = vadd.f32 %v5273_v62, %v1694_v8  ;;  %v1553_v30 = vadd.f32 %v4685_v18, %v6951_v31  ;;  %v1544_v63 = vpop.f32.mrb[37].mxu0  ;;  %v1761_v61 = vmul.f32 %v6965_v3, %v6968_v1 }
 0x413   : > { %9352 = vst [vmem:[#allocation62_spill] sm:$0xff] %v6972_v10  ;;  %v6980_v17 = vadd.f32 %v5274_v12, %v1692_v47  ;;  %v1545_v40 = vadd.f32 %v6951_v31, %v1544_v63  ;;  %v4686_v52 = vpop.f32.mrb[38].mxu0  ;;  %v1759_v48 = vmul.f32 %v6965_v3, %v6972_v10  ;;  %v5277_v47 = vld [vmem:[%s6493_s2 + $0x38] sm:$0xff] }
 0x414   : > { %9353 = vst [vmem:[#allocation63_spill] sm:$0xff] %v6976_v22  ;;  %v1762_v23 = vmul.f32 %v6965_v3, %v6976_v22  ;;  %v1661_v6 = vadd.f32 %v1553_v30, %v6588_v43  ;;  %v1556_v32 = vadd.f32 %v4686_v52, %v6951_v31  ;;  %v1547_v59 = vpop.f32.mrb[39].mxu0  ;;  %v1797_v16 = vadd.f32 %v6985_v19, %v1761_v61  ;;  %v5278_v30 = vld [vmem:[%s6493_s2 + $0x28] sm:$0xff] }
 0x415   : > { %9354 = vst [vmem:[#allocation64_spill] sm:$0xff] %v6980_v17  ;;  %v1659_v60 = vadd.f32 %v1545_v40, %v6572_v33  ;;  %v1548_v15 = vadd.f32 %v6951_v31, %v1547_v59  ;;  %v1760_v38 = vmul.f32 %v6965_v3, %v6980_v17  ;;  %v1795_v51 = vadd.f32 %v6985_v19, %v1759_v48 }
 0x416   : > { %v1798_v14 = vadd.f32 %v6985_v19, %v1762_v23  ;;  %v1697_v42 = vmul.f32 %v6954_v35, %v1661_v6  ;;  %v1662_v39 = vadd.f32 %v1556_v32, %v6591_v44 }
 0x417   : > { %v1695_v43 = vmul.f32 %v6954_v35, %v1659_v60  ;;  %v1660_v49 = vadd.f32 %v1548_v15, %v6575_v34  ;;  %v1796_v33 = vadd.f32 %v6985_v19, %v1760_v38 }
 0x418   : > { %v7006_v37 = vadd.f32 %v5275_v0, %v1697_v42  ;;  %v1698_v53 = vmul.f32 %v6954_v35, %v1662_v39  ;;  %v1828_v62 = vpack.c.bf16 %v1798_v14, %v1797_v16 }
 0x419   : > { %v7010_v8 = vadd.f32 %v5276_v29, %v1695_v43  ;;  %v1696_v44 = vmul.f32 %v6954_v35, %v1660_v49  ;;  %v1827_v54 = vpack.c.bf16 %v1796_v33, %v1795_v51  ;;  %v4689_v34 = vpop.f32.mrb[40].mxu0  ;;  %v5279_v33 = vld [vmem:[%s6493_s2 + $0x50] sm:$0xff] }
 0x41a   : > { %9355 = vst [vmem:[#allocation65_spill] sm:$0xff] %v7006_v37  ;;  %v7014_v18 = vadd.f32 %v5277_v47, %v1698_v53  ;;  %v1569_v12 = vadd.f32 %v4689_v34, %v6951_v31  ;;  %v1560_v40 = vpop.f32.mrb[41].mxu0  ;;  %v1765_v23 = vmul.f32 %v6965_v3, %v7006_v37 }
 0x41b   : > { %9356 = vst [vmem:[#allocation66_spill] sm:$0xff] %v7010_v8  ;;  %v7017_v63 = vadd.f32 %v5278_v30, %v1696_v44  ;;  %4727 = vmatprep.mubr.bf16.mxu0 %v1827_v54  ;;  %v1763_v52 = vmul.f32 %v6965_v3, %v7010_v8  ;;  %v1561_v48 = vadd.f32 %v6951_v31, %v1560_v40  ;;  %v4690_v61 = vpop.f32.mrb[42].mxu0 }
 0x41c   : > { %9357 = vst [vmem:[#allocation67_spill] sm:$0xff] %v7014_v18  ;;  %4728 = vmatmul.mubr.bf16.vlgmr.msra.gmra.mrb[48].mxu0 %v1828_v62  ;;  %v1766_v6 = vmul.f32 %v6965_v3, %v7014_v18  ;;  %v1665_v32 = vadd.f32 %v1569_v12, %v6610_v55  ;;  %v1572_v59 = vadd.f32 %v4690_v61, %v6951_v31  ;;  %v1563_v60 = vpop.f32.mrb[43].mxu0  ;;  %v5282_v12 = vld [vmem:[%s6493_s2 + $0x48] sm:$0xff] }
 0x41d   : > { %9358 = vst [vmem:[#allocation68_spill] sm:$0xff] %v7017_v63  ;;  %v1764_v15 = vmul.f32 %v6965_v3, %v7017_v63  ;;  %4800 = vmatpush3.bf16.msra.mxu0 %v6770_v36  ;;  %v1663_v38 = vadd.f32 %v1561_v48, %v6594_v45  ;;  %v1564_v14 = vadd.f32 %v6951_v31, %v1563_v60 }
 0x41e   : > { %v1802_v42 = vadd.f32 %v6985_v19, %v1766_v6  ;;  %4801 = vmatprep.subr.bf16.mxu0 %v6802_v20  ;;  %v1701_v55 = vmul.f32 %v6954_v35, %v1665_v32  ;;  %v1666_v39 = vadd.f32 %v1572_v59, %v6613_v56  ;;  %v1799_v43 = vadd.f32 %v6985_v19, %v1763_v52  ;;  %v5280_v56 = vld [vmem:[%s6493_s2 + $0x40] sm:$0xff] }
 0x41f   : > { %v1800_v49 = vadd.f32 %v6985_v19, %v1764_v15  ;;  %v1699_v36 = vmul.f32 %v6954_v35, %v1663_v38  ;;  %v1664_v45 = vadd.f32 %v1564_v14, %v6597_v46  ;;  %v1801_v51 = vadd.f32 %v6985_v19, %v1765_v23  ;;  %v5281_v46 = vld [vmem:[%s6493_s2 + $0x58] sm:$0xff] }
 0x420   : > { %v7044_v16 = vadd.f32 %v5279_v33, %v1701_v55  ;;  %v1702_v0 = vmul.f32 %v6954_v35, %v1666_v39 }
 0x421   : > { %v1829_v53 = vpack.c.bf16 %v1800_v49, %v1799_v43  ;;  %4802 = vmatpush3.bf16.msra.mxu0 %v6802_v20  ;;  %v7049_v29 = vadd.f32 %v5280_v56, %v1699_v36  ;;  %v1700_v44 = vmul.f32 %v6954_v35, %v1664_v45  ;;  %v4693_v54 = vpop.f32.mrb[44].mxu0  ;;  %v1830_v47 = vpack.c.bf16 %v1802_v42, %v1801_v51  ;;  %v5283_v43 = vld [vmem:[%s6493_s2 + $0x70] sm:$0xff] }
 0x422   : > { %9359 = vst [vmem:[#allocation69_spill] sm:$0xff] %v7044_v16  ;;  %4803 = vmatprep.subr.bf16.mxu0 %v6818_v7  ;;  %v7054_v34 = vadd.f32 %v5281_v46, %v1702_v0  ;;  %v1585_v62 = vadd.f32 %v4693_v54, %v6951_v31  ;;  %v1576_v30 = vpop.f32.mrb[45].mxu0  ;;  %v1769_v32 = vmul.f32 %v6965_v3, %v7044_v16  ;;  %v5285_v0 = vld [vmem:[%s6493_s2 + $0x78] sm:$0xff]  ;;  %v5286_v54 = vld [vmem:[%s6493_s2 + $0x68] sm:$0xff] }
 0x423   : > { %9360 = vst [vmem:[#allocation70_spill] sm:$0xff] %v7049_v29  ;;  %4731 = vmatprep.mubr.bf16.mxu0 %v1829_v53  ;;  %v7058_v40 = vadd.f32 %v5282_v12, %v1700_v44  ;;  %v1577_v20 = vadd.f32 %v6951_v31, %v1576_v30  ;;  %v4694_v52 = vpop.f32.mrb[46].mxu0  ;;  %v1767_v48 = vmul.f32 %v6965_v3, %v7049_v29 }
 0x424   : > { %9361 = vst [vmem:[#allocation71_spill] sm:$0xff] %v7054_v34  ;;  %4732 = vmatmul.mubr.bf16.gmra.mrb[52].mxu0 %v1830_v47  ;;  %v1669_v61 = vadd.f32 %v1585_v62, %v6634_v9  ;;  %v1588_v23 = vadd.f32 %v4694_v52, %v6951_v31  ;;  %v1579_v6 = vpop.f32.mrb[47].mxu0  ;;  %v1770_v59 = vmul.f32 %v6965_v3, %v7054_v34 }
 0x425   : > { %9362 = vst [vmem:[#allocation72_spill] sm:$0xff] %v7058_v40  ;;  %4804 = vmatpush3.bf16.msra.mxu0 %v6818_v7  ;;  %v1667_v60 = vadd.f32 %v1577_v20, %v6616_v57  ;;  %v1580_v15 = vadd.f32 %v6951_v31, %v1579_v6  ;;  %v1768_v9 = vmul.f32 %v6965_v3, %v7058_v40 }
 0x426   : > { %4805 = vmatprep.subr.bf16.mxu0 %v6827_v21  ;;  %v1705_v38 = vmul.f32 %v6954_v35, %v1669_v61  ;;  %v1670_v14 = vadd.f32 %v1588_v23, %v6637_v11  ;;  %v1806_v42 = vadd.f32 %v6985_v19, %v1770_v59  ;;  %v1803_v57 = vadd.f32 %v6985_v19, %v1767_v48  ;;  %v5284_v11 = vld [vmem:[%s6493_s2 + $0x60] sm:$0xff] }
 0x427   : > { %v1703_v55 = vmul.f32 %v6954_v35, %v1667_v60  ;;  %v1668_v7 = vadd.f32 %v1580_v15, %v6619_v58  ;;  %v1804_v39 = vadd.f32 %v6985_v19, %v1768_v9  ;;  %v1805_v45 = vadd.f32 %v6985_v19, %v1769_v32 }
 0x428   : > { %v7083_v49 = vadd.f32 %v5283_v43, %v1705_v38  ;;  %v1706_v36 = vmul.f32 %v6954_v35, %v1670_v14  ;;  %v9367_v14 = vld [vmem:[#allocation48_spill] sm:$0xff] }
 0x429   : > { %4806 = vmatpush3.bf16.msra.mxu0 %v6827_v21  ;;  %v7089_v51 = vadd.f32 %v5284_v11, %v1703_v55  ;;  %v1704_v33 = vmul.f32 %v6954_v35, %v1668_v7  ;;  %v1831_v58 = vpack.c.bf16 %v1804_v39, %v1803_v57  ;;  %v4697_v56 = vpop.f32.mrb[0].mxu1  ;;  %v1832_v44 = vpack.c.bf16 %v1806_v42, %v1805_v45  ;;  %v5287_v55 = vld [vmem:[%s6493_s2 + $0x90] sm:$0xff] }
 0x42a   : > { %9363 = vst [vmem:[#allocation73_spill] sm:$0xff] %v7083_v49  ;;  %4807 = vmatprep.subr.bf16.mxu0 %v6929_v28  ;;  %v7094_v53 = vadd.f32 %v5285_v0, %v1706_v36  ;;  %v1601_v46 = vadd.f32 %v4697_v56, %v6951_v31  ;;  %v1592_v62 = vpop.f32.mrb[1].mxu1  ;;  %v1773_v20 = vmul.f32 %v6965_v3, %v7083_v49 }
 0x42b   : > { %9364 = vst [vmem:[#allocation74_spill] sm:$0xff] %v7089_v51  ;;  %v7097_v47 = vadd.f32 %v5286_v54, %v1704_v33  ;;  %4735 = vmatprep.mubr.bf16.mxu0 %v1831_v58  ;;  %v1771_v21 = vmul.f32 %v6965_v3, %v7089_v51  ;;  %v1593_v30 = vadd.f32 %v6951_v31, %v1592_v62  ;;  %v4698_v12 = vpop.f32.mrb[2].mxu1  ;;  %v5289_v33 = vld [vmem:[%s6493_s2 + $0x98] sm:$0xff] }
 0x42c   : > { %9365 = vst [vmem:[#allocation75_spill] sm:$0xff] %v7094_v53  ;;  %4736 = vmatmul.mubr.bf16.gmra.mrb[56].mxu0 %v1832_v44  ;;  %v1774_v52 = vmul.f32 %v6965_v3, %v7094_v53  ;;  %v1673_v48 = vadd.f32 %v1601_v46, %v6658_v25  ;;  %v1604_v61 = vadd.f32 %v4698_v12, %v6951_v31  ;;  %v1595_v23 = vpop.f32.mrb[3].mxu1  ;;  %v5290_v44 = vld [vmem:[%s6493_s2 + $0x88] sm:$0xff] }
 0x42d   : > { %9366 = vst [vmem:[#allocation76_spill] sm:$0xff] %v7097_v47  ;;  %v1772_v6 = vmul.f32 %v6965_v3, %v7097_v47  ;;  %4808 = vmatpush3.bf16.msra.mxu0 %v6929_v28  ;;  %v1671_v32 = vadd.f32 %v1593_v30, %v6640_v13  ;;  %v1596_v59 = vadd.f32 %v6951_v31, %v1595_v23 }
 0x42e   : > { %v1810_v60 = vadd.f32 %v6985_v19, %v1774_v52  ;;  %4809 = vmatprep.subr.bf16.mxu0 %v6935_v24  ;;  %v1709_v25 = vmul.f32 %v6954_v35, %v1673_v48  ;;  %v1674_v15 = vadd.f32 %v1604_v61, %v6661_v26  ;;  %v1807_v9 = vadd.f32 %v6985_v19, %v1771_v21  ;;  %v5288_v26 = vld [vmem:[%s6493_s2 + $0x80] sm:$0xff]  ;;  %v9372_v21 = vld [vmem:[#allocation51_spill] sm:$0xff]  ;;  %v9373_v61 = vld [vmem:[#allocation49_spill] sm:$0xff] }
 0x42f   : > { %v1808_v38 = vadd.f32 %v6985_v19, %v1772_v6  ;;  %v1707_v28 = vmul.f32 %v6954_v35, %v1671_v32  ;;  %v1672_v13 = vadd.f32 %v1596_v59, %v9367_v14  ;;  %v1809_v42 = vadd.f32 %v6985_v19, %v1773_v20 }
 0x430   : > { %v7124_v7 = vadd.f32 %v5287_v55, %v1709_v25  ;;  %v1710_v57 = vmul.f32 %v6954_v35, %v1674_v15 }
 0x431   : > { %v1833_v39 = vpack.c.bf16 %v1808_v38, %v1807_v9  ;;  %4810 = vmatpush3.bf16.msra.mxu0 %v6935_v24  ;;  %v7129_v43 = vadd.f32 %v5288_v26, %v1707_v28  ;;  %v1708_v36 = vmul.f32 %v6954_v35, %v1672_v13  ;;  %v4701_v45 = vpop.f32.mrb[4].mxu1  ;;  %v1834_v11 = vpack.c.bf16 %v1810_v60, %v1809_v42  ;;  %v9374_v60 = vld [vmem:[#allocation52_spill] sm:$0xff]  ;;  %v5291_v13 = vld [vmem:[%s6493_s2 + $0xb0] sm:$0xff] }
 0x432   : > { %9368 = vst [vmem:[#allocation48_spill] sm:$0xff] %v7124_v7  ;;  %4811 = vmatprep.subr.bf16.mxu0 %v6941_v4  ;;  %v7134_v58 = vadd.f32 %v5289_v33, %v1710_v57  ;;  %v1617_v0 = vadd.f32 %v4701_v45, %v6951_v31  ;;  %v1608_v56 = vpop.f32.mrb[5].mxu1  ;;  %v1777_v52 = vmul.f32 %v6965_v3, %v7124_v7  ;;  %v5293_v33 = vld [vmem:[%s6493_s2 + $0xb8] sm:$0xff] }
 0x433   : > { %9369 = vst [vmem:[#allocation77_spill] sm:$0xff] %v7129_v43  ;;  %4739 = vmatprep.mubr.bf16.mxu0 %v1833_v39  ;;  %v7138_v54 = vadd.f32 %v5290_v44, %v1708_v36  ;;  %v1609_v24 = vadd.f32 %v6951_v31, %v1608_v56  ;;  %v4702_v46 = vpop.f32.mrb[6].mxu1  ;;  %v1775_v62 = vmul.f32 %v6965_v3, %v7129_v43  ;;  %v5292_v39 = vld [vmem:[%s6493_s2 + $0xa0] sm:$0xff] }
 0x434   : > { %9370 = vst [vmem:[#allocation78_spill] sm:$0xff] %v7134_v58  ;;  %4740 = vmatmul.mubr.bf16.gmra.mrb[60].mxu0 %v1834_v11  ;;  %v1677_v30 = vadd.f32 %v1617_v0, %v9372_v21  ;;  %v1620_v12 = vadd.f32 %v4702_v46, %v6951_v31  ;;  %v1611_v20 = vpop.f32.mrb[7].mxu1  ;;  %v1778_v48 = vmul.f32 %v6965_v3, %v7134_v58  ;;  %v5294_v46 = vld [vmem:[%s6493_s2 + $0xa8] sm:$0xff] }
 0x435   : > { %9371 = vst [vmem:[#allocation79_spill] sm:$0xff] %v7138_v54  ;;  %4812 = vmatpush3.bf16.msra.mxu0 %v6941_v4  ;;  %v1675_v23 = vadd.f32 %v1609_v24, %v9373_v61  ;;  %v1612_v6 = vadd.f32 %v6951_v31, %v1611_v20  ;;  %v1776_v32 = vmul.f32 %v6965_v3, %v7138_v54  ;;  %v9375_v4 = vld [vmem:[#allocation50_spill] sm:$0xff] }
 0x436   : > { %4813 = vmatprep.subr.bf16.mxu0 %v6946_v5  ;;  %v1713_v59 = vmul.f32 %v6954_v35, %v1677_v30  ;;  %v1678_v25 = vadd.f32 %v1620_v12, %v9374_v60  ;;  %v1814_v15 = vadd.f32 %v6985_v19, %v1778_v48  ;;  %v1811_v28 = vadd.f32 %v6985_v19, %v1775_v62  ;;  %v9380_v12 = vld [vmem:[#allocation55_spill] sm:$0xff] }
 0x437   : > { %v1711_v9 = vmul.f32 %v6954_v35, %v1675_v23  ;;  %v1676_v38 = vadd.f32 %v1612_v6, %v9375_v4  ;;  %v1812_v14 = vadd.f32 %v6985_v19, %v1776_v32  ;;  %v1813_v57 = vadd.f32 %v6985_v19, %v1777_v52  ;;  %v9381_v6 = vld [vmem:[#allocation53_spill] sm:$0xff] }
 0x438   : > { %v7163_v42 = vadd.f32 %v5291_v13, %v1713_v59  ;;  %v1714_v55 = vmul.f32 %v6954_v35, %v1678_v25 }
 0x439   : > { %4814 = vmatpush3.bf16.msra.mxu0 %v6946_v5  ;;  %v7169_v26 = vadd.f32 %v5292_v39, %v1711_v9  ;;  %v1712_v36 = vmul.f32 %v6954_v35, %v1676_v38  ;;  %v4705_v45 = vpop.f32.mrb[8].mxu1  ;;  %v1835_v11 = vpack.c.bf16 %v1812_v14, %v1811_v28  ;;  %v1836_v24 = vpack.c.bf16 %v1814_v15, %v1813_v57  ;;  %v9382_v15 = vld [vmem:[#allocation56_spill] sm:$0xff]  ;;  %v9383_v28 = vld [vmem:[#allocation54_spill] sm:$0xff] }
 0x43a   : > { %9376 = vst [vmem:[#allocation51_spill] sm:$0xff] %v7163_v42  ;;  %v7173_v0 = vadd.f32 %v5293_v33, %v1714_v55  ;;  %v1633_v56 = vadd.f32 %v4705_v45, %v6951_v31  ;;  %v1624_v44 = vpop.f32.mrb[9].mxu1  ;;  %v1781_v61 = vmul.f32 %v6965_v3, %v7163_v42  ;;  %v5295_v57 = vld [vmem:[%s6493_s2 + $0xd0] sm:$0xff] }
 0x43b   : > { %9377 = vst [vmem:[#allocation49_spill] sm:$0xff] %v7169_v26  ;;  %v7177_v62 = vadd.f32 %v5294_v46, %v1712_v36  ;;  %v1625_v21 = vadd.f32 %v6951_v31, %v1624_v44  ;;  %v4706_v5 = vpop.f32.mrb[10].mxu1  ;;  %4743 = vmatprep.mubr.bf16.mxu0 %v1835_v11  ;;  %v1779_v30 = vmul.f32 %v6965_v3, %v7169_v26  ;;  %v5296_v11 = vld [vmem:[%s6493_s2 + $0xc0] sm:$0xff]  ;;  %v5297_v46 = vld [vmem:[%s6493_s2 + $0xd8] sm:$0xff] }
 0x43c   : > { %9378 = vst [vmem:[#allocation52_spill] sm:$0xff] %v7173_v0  ;;  %v1681_v20 = vadd.f32 %v1633_v56, %v9380_v12  ;;  %v1636_v52 = vadd.f32 %v4706_v5, %v6951_v31  ;;  %v1627_v48 = vpop.f32.mrb[11].mxu1  ;;  %4744 = vmatmul.mubr.bf16.gmra.mrb[64].mxu0 %v1836_v24  ;;  %v1782_v23 = vmul.f32 %v6965_v3, %v7173_v0 }
 0x43d   : > { %9379 = vst [vmem:[#allocation50_spill] sm:$0xff] %v7177_v62  ;;  %v1679_v32 = vadd.f32 %v1625_v21, %v9381_v6  ;;  %v1628_v59 = vadd.f32 %v6951_v31, %v1627_v48  ;;  %v1780_v60 = vmul.f32 %v6965_v3, %v7177_v62  ;;  %v1815_v13 = vadd.f32 %v6985_v19, %v1779_v30  ;;  %v9388_v6 = vld [vmem:[#allocation59_spill] sm:$0xff] }
 0x43e   : > { %v1717_v25 = vmul.f32 %v6954_v35, %v1681_v20  ;;  %v1682_v9 = vadd.f32 %v1636_v52, %v9382_v15  ;;  %v1818_v4 = vadd.f32 %v6985_v19, %v1782_v23  ;;  %v1817_v45 = vadd.f32 %v6985_v19, %v1781_v61  ;;  %v5298_v20 = vld [vmem:[%s6493_s2 + $0xc8] sm:$0xff] }
 0x43f   : > { %v1715_v38 = vmul.f32 %v6954_v35, %v1679_v32  ;;  %v1680_v14 = vadd.f32 %v1628_v59, %v9383_v28  ;;  %v1816_v55 = vadd.f32 %v6985_v19, %v1780_v60 }
 0x440   : > { %v7200_v39 = vadd.f32 %v5295_v57, %v1717_v25  ;;  %v1718_v36 = vmul.f32 %v6954_v35, %v1682_v9  ;;  %v1838_v12 = vpack.c.bf16 %v1818_v4, %v1817_v45  ;;  %v9389_v9 = vld [vmem:[#allocation57_spill] sm:$0xff]  ;;  %v9391_v45 = vld [vmem:[#allocation58_spill] sm:$0xff] }
 0x441   : > { %v7205_v33 = vadd.f32 %v5296_v11, %v1715_v38  ;;  %v1716_v56 = vmul.f32 %v6954_v35, %v1680_v14  ;;  %v4709_v44 = vpop.f32.mrb[12].mxu1  ;;  %v1837_v24 = vpack.c.bf16 %v1816_v55, %v1815_v13  ;;  %v9390_v13 = vld [vmem:[#allocation60_spill] sm:$0xff] }
 0x442   : > { %9384 = vst [vmem:[#allocation55_spill] sm:$0xff] %v7200_v39  ;;  %v7209_v21 = vadd.f32 %v5297_v46, %v1718_v36  ;;  %v1649_v5 = vadd.f32 %v4709_v44, %v6951_v31  ;;  %v1640_v30 = vpop.f32.mrb[13].mxu1  ;;  %v1785_v25 = vmul.f32 %v6965_v3, %v7200_v39 }
 0x443   : > { %9385 = vst [vmem:[#allocation53_spill] sm:$0xff] %v7205_v33  ;;  %v7213_v52 = vadd.f32 %v5298_v20, %v1716_v56  ;;  %v1641_v48 = vadd.f32 %v6951_v31, %v1640_v30  ;;  %v4710_v61 = vpop.f32.mrb[14].mxu1  ;;  %4747 = vmatprep.mubr.bf16.mxu0 %v1837_v24  ;;  %v1783_v23 = vmul.f32 %v6965_v3, %v7205_v33  ;;  %v5300_v30 = vld [vmem:[%s6493_s2 + $0xe0] sm:$0xff] }
 0x444   : > { %9386 = vst [vmem:[#allocation56_spill] sm:$0xff] %v7209_v21  ;;  %v1685_v32 = vadd.f32 %v1649_v5, %v9388_v6  ;;  %v1652_v59 = vadd.f32 %v4710_v61, %v6951_v31  ;;  %v1643_v60 = vpop.f32.mrb[15].mxu1  ;;  %4748 = vmatmul.mubr.bf16.gmra.mrb[68].mxu0 %v1838_v12  ;;  %v1786_v15 = vmul.f32 %v6965_v3, %v7209_v21  ;;  %v5301_v6 = vld [vmem:[%s6493_s2 + $0xf8] sm:$0xff] }
 0x445   : > { %9387 = vst [vmem:[#allocation54_spill] sm:$0xff] %v7213_v52  ;;  %v1683_v4 = vadd.f32 %v1641_v48, %v9389_v9  ;;  %v1644_v38 = vadd.f32 %v6951_v31, %v1643_v60  ;;  %v1784_v28 = vmul.f32 %v6965_v3, %v7213_v52  ;;  %v1819_v56 = vadd.f32 %v6985_v19, %v1783_v23  ;;  %v5299_v31 = vld [vmem:[%s6493_s2 + $0xf0] sm:$0xff]  ;;  %v5302_v23 = vld [vmem:[#allocation15] ss:$0 sm:$0xff]  ;;  %v5303_v9 = vld [vmem:[%s6493_s2 + $0xe8] sm:$0xff] }
 0x446   : > { %v1721_v14 = vmul.f32 %v6954_v35, %v1685_v32  ;;  %v1686_v55 = vadd.f32 %v1652_v59, %v9390_v13  ;;  %v1822_v57 = vadd.f32 %v6985_v19, %v1786_v15  ;;  %v1821_v5 = vadd.f32 %v6985_v19, %v1785_v25 }
 0x447   : > { %v1719_v36 = vmul.f32 %v6954_v35, %v1683_v4  ;;  %v1684_v11 = vadd.f32 %v1644_v38, %v9391_v45  ;;  %v1820_v44 = vadd.f32 %v6985_v19, %v1784_v28 }
 0x448   : > { %v7236_v24 = vadd.f32 %v5299_v31, %v1721_v14  ;;  %v1722_v46 = vmul.f32 %v6954_v35, %v1686_v55  ;;  %v1840_v15 = vpack.c.bf16 %v1822_v57, %v1821_v5 }
 0x449   : > { %v7241_v12 = vadd.f32 %v5300_v30, %v1719_v36  ;;  %v1720_v20 = vmul.f32 %v6954_v35, %v1684_v11  ;;  %v4777_v48 = vpop.f32.mrb[16].mxu1  ;;  %v1839_v61 = vpack.c.bf16 %v1820_v44, %v1819_v56 }
 0x44a   : > { %9392 = vst [vmem:[#allocation59_spill] sm:$0xff] %v7236_v24  ;;  %v7245_v32 = vadd.f32 %v5301_v6, %v1722_v46  ;;  %v2155_v59 = vadd.f32 %v5302_v23, %v4777_v48  ;;  %v2146_v60 = vpop.f32.mrb[17].mxu1  ;;  %v1789_v55 = vmul.f32 %v6965_v3, %v7236_v24 }
 0x44b   : > { %9393 = vst [vmem:[#allocation57_spill] sm:$0xff] %v7241_v12  ;;  %v7248_v4 = vadd.f32 %v5303_v9, %v1720_v20  ;;  %v2147_v38 = vadd.f32 %v5302_v23, %v2146_v60  ;;  %4751 = vmatprep.mubr.bf16.mxu0 %v1839_v61  ;;  %v4778_v25 = vpop.f32.mrb[18].mxu1  ;;  %v1787_v28 = vmul.f32 %v6965_v3, %v7241_v12 }
 0x44c   : > { %9394 = vst [vmem:[#allocation60_spill] sm:$0xff] %v7245_v32  ;;  %v2167_v14 = vmul.f32 0.70710677, %v2155_v59  ;;  %v2158_v35 = vadd.f32 %v5302_v23, %v4778_v25  ;;  %4752 = vmatmul.mubr.bf16.gmra.mrb[72].mxu0 %v1840_v15  ;;  %v2149_v13 = vpop.f32.mrb[19].mxu1  ;;  %v1790_v36 = vmul.f32 %v6965_v3, %v7245_v32  ;;  %v1825_v5 = vadd.f32 %v6985_v19, %v1789_v55 }
 0x44d   : > { %9395 = vst [vmem:[#allocation58_spill] sm:$0xff] %v7248_v4  ;;  %v2165_v57 = vmul.f32 0.70710677, %v2147_v38  ;;  %v2150_v45 = vadd.f32 %v5302_v23, %v2149_v13  ;;  %v1788_v11 = vmul.f32 %v6965_v3, %v7248_v4  ;;  %v1823_v31 = vadd.f32 %v6985_v19, %v1787_v28 }
 0x44e   : > { %5188 = verf.f32 %v2167_v14  ;;  %v2168_v56 = vmul.f32 0.70710677, %v2158_v35  ;;  %v1826_v30 = vadd.f32 %v6985_v19, %v1790_v36  ;;  %v2163_v9 = vmul.f32 0.5, %v2155_v59 }
 0x44f   : > { %5190 = verf.f32 %v2165_v57  ;;  %v2166_v44 = vmul.f32 0.70710677, %v2150_v45  ;;  %v1824_v46 = vadd.f32 %v6985_v19, %v1788_v11  ;;  %v2164_v25 = vmul.f32 0.5, %v2158_v35  ;;  %v926_v35 = vld [vmem:[#allocation23] sm:$0xff] }
 0x450   : > { %5192 = verf.f32 %v2168_v56  ;;  %v1842_v48 = vpack.c.bf16 %v1826_v30, %v1825_v5  ;;  %v2161_v14 = vmul.f32 0.5, %v2147_v38  ;;  %v2162_v13 = vmul.f32 0.5, %v2150_v45  ;;  %v7266_v30 = vld [vmem:[#allocation21] ss:$0 sm:$0xff] }
 0x451   : > { %5194 = verf.f32 %v2166_v44  ;;  %v1841_v20 = vpack.c.bf16 %v1824_v46, %v1823_v31  ;;  %v2314_v31 = vlaneseq }
 0x453   : > { %4755 = vmatprep.mubr.bf16.mxu0 %v1841_v20  ;;  %v7262_v46 = vshrl.u32 %v2314_v31, 7 }
 0x454   : > { %4756 = vmatmul.mubr.bf16.gmra.mrb[76].mxu0 %v1842_v48 }
 0x455   : > { %v2599_v5 = vsub.s32 1, %v7262_v46  ;;  %v3027_v59 = vsub.s32 4, %v7262_v46  ;;  %v3456_v38 = vsub.s32 7, %v7262_v46  ;;  %v2563_v45 = vsub.s32 0, %v7262_v46 }
 0x456   : > { %v2991_v20 = vsub.s32 3, %v7262_v46  ;;  %v2667_v48 = vsub.s32 2, %v7262_v46  ;;  %vm2391_vm0 = vcmp.lt.s32.totalorder %v7262_v46, 1  ;;  %vm2317_vm1 = vcmp.gt.s32.totalorder %v7262_v46, 0 }
 0x457   : > { %vm2492_vm2 = vcmp.lt.s32.totalorder %v7262_v46, 7 }
 0x458   : > { %v5189_v61 = vpop.eup %5188 }
 0x459   : > { %v5191_v3 = vpop.eup %5190  ;;  %v2175_v6 = vadd.f32 1.0, %v5189_v61 }
 0x45a   : > { %v5193_v23 = vpop.eup %5192  ;;  %v2173_v60 = vadd.f32 1.0, %v5191_v3  ;;  %v7273_v3 = vadd.s32 8, %v7262_v46 }
 0x45b   : > { %v5195_v15 = vpop.eup %5194  ;;  %v2176_v28 = vadd.f32 1.0, %v5193_v23  ;;  %v2179_v55 = vmul.f32 %v2175_v6, %v2163_v9  ;;  %v3095_v6 = vsub.s32 5, %v7262_v46  ;;  %v3420_v23 = vsub.s32 6, %v7262_v46 }
 0x45c   : > { %v2174_v57 = vadd.f32 1.0, %v5195_v15  ;;  %v2177_v19 = vmul.f32 %v2173_v60, %v2161_v14  ;;  %v7280_v15 = vrot.slane %v926_v35, %v2599_v5  ;;  %v7282_v9 = vrot.slane %v926_v35, %v3027_v59 }
 0x45d   : > { %v2180_v11 = vmul.f32 %v2176_v28, %v2164_v25  ;;  %v7284_v28 = vrot.slane %v926_v35, %v3456_v38  ;;  %vm2320_vm3 = vcmp.lt.s32.totalorder %v7273_v3, 15 }
 0x45e   : > { %v2178_v36 = vmul.f32 %v2174_v57, %v2162_v13  ;;  %9396 = vst [vmem:[#allocation80_spill] sm:$0xff] %v7280_v15  ;;  %v7288_v57 = vrot.slane %v926_v35, %v2563_v45 }
 0x45f   : > { %v2182_v56 = vpack.c.bf16 %v2180_v11, %v2179_v55  ;;  %v7290_v55 = vrot.slane %v926_v35, %v2991_v20 }
 0x460   : > { %v2181_v44 = vpack.c.bf16 %v2178_v36, %v2177_v19  ;;  %v7294_v19 = vrot.slane %v926_v35, %v2667_v48 }
 0x462   : > { %4795 = vmatprep.mubr.bf16.mxu1 %v2181_v44  ;;  %v7300_v44 = vrot.slane %v926_v35, %v3420_v23 }
 0x463   : > { %4796 = vmatmul.mubr.bf16.vlgmr.msra.gmra.mrb[20].mxu1 %v2182_v56  ;;  %v7298_v56 = vrot.slane %v926_v35, %v3095_v6 }
 0x4ef   : > { %v4729_v61 = vpop.f32.mrb[48].mxu0 }
 0x4f0   : > { %v7278_v60 = vadd.f32 %v4729_v61, %v7266_v30  ;;  %v1931_v25 = vpop.f32.mrb[49].mxu0 }
 0x4f1   : > { %v1932_v14 = vadd.f32 %v7266_v30, %v1931_v25  ;;  %v4730_v13 = vpop.f32.mrb[50].mxu0 }
 0x4f2   : > { %v1934_v11 = vpop.f32.mrb[51].mxu0  ;;  %v2361_v36 = vrot.slane %v7278_v60, 7  ;;  %v7305_v5 = vmul.f32 %v7280_v15, %v7278_v60  ;;  %v7308_v59 = vadd.f32 %v4730_v13, %v7266_v30  ;;  %v7313_v45 = vmul.f32 %v7282_v9, %v7278_v60 }
 0x4f3   : > { %v1935_v38 = vadd.f32 %v7266_v30, %v1934_v11  ;;  %v7317_v20 = vmul.f32 %v7284_v28, %v7278_v60  ;;  %v2360_v35 = vrot.slane %v1932_v14, 7  ;;  %v2461_v48 = vrot.slane %v1932_v14, 1 }
 0x4f4   : > { %v2603_v61 = vmul.f32 %v7280_v15, %v1932_v14  ;;  %v7321_v6 = vmul.f32 %v7282_v9, %v1932_v14  ;;  %v2377_v23 = vrot.slane %v7308_v59, 7  ;;  %v2606_v13 = vmul.f32 %v7280_v15, %v7308_v59 }
 0x4f5   : > { %v3032_v11 = vmul.f32 %v7282_v9, %v7308_v59  ;;  %v2376_v31 = vrot.slane %v1935_v38, 7  ;;  %v2477_v4 = vrot.slane %v1935_v38, 1  ;;  %v2604_v24 = vmul.f32 %v7280_v15, %v1935_v38 }
 0x4f6   : > { %v7331_v12 = vsel %vm2391_vm0, %v2361_v36, %v2377_v23  ;;  %v2410_v14 = vsel %vm2391_vm0, %v2377_v23, %v2361_v36 }
 0x4f7   : > { %v4733_v32 = vpop.f32.mrb[52].mxu0  ;;  %v2570_v21 = vmul.f32 %v7288_v57, %v7331_v12  ;;  %v2996_v33 = vmul.f32 %v7290_v55, %v7331_v12  ;;  %v2393_v39 = vsel %vm2391_vm0, %v2360_v35, %v2376_v31  ;;  %v2409_v62 = vsel %vm2391_vm0, %v2376_v31, %v2360_v35 }
 0x4f8   : > { %v7337_v25 = vadd.f32 %v4733_v32, %v7266_v30  ;;  %v1947_v52 = vpop.f32.mrb[53].mxu0  ;;  %v2430_v36 = vsel %vm2317_vm1, %v2409_v62, 0.0  ;;  %v2494_v32 = vsel %vm2492_vm2, %v2461_v48, %v2477_v4  ;;  %v2510_v23 = vsel %vm2492_vm2, %v2477_v4, %v2461_v48 }
 0x4f9   : > { %v4734_v0 = vpop.f32.mrb[54].mxu0  ;;  %v2568_v26 = vmul.f32 %v7288_v57, %v2393_v39  ;;  %v7354_v54 = vadd.f32 %v2606_v13, %v2570_v21  ;;  %v7356_v58 = vadd.f32 %v3032_v11, %v2996_v33  ;;  %v2532_v31 = vsel %vm2320_vm3, %v2510_v23, 0.0  ;;  %v7370_v11 = vld [vmem:[#allocation24] ss:$0 sm:$0xff] }
 0x4fa   : > { %v1950_v42 = vpop.f32.mrb[55].mxu0  ;;  %v2567_v35 = vmul.f32 %v7288_v57, %v2430_v36  ;;  %v7363_v62 = vmul.f32 %v7284_v28, %v7308_v59  ;;  %v2672_v7 = vmul.f32 %v7294_v19, %v2532_v31  ;;  %v3030_v4 = vmul.f32 %v7282_v9, %v1935_v38 }
 0x4fb   : > { %v2636_v43 = vadd.f32 %v2604_v24, %v2568_v26  ;;  %v2671_v21 = vmul.f32 %v7294_v19, %v2494_v32  ;;  %v2994_v33 = vmul.f32 %v7290_v55, %v2393_v39  ;;  %v3098_v13 = vmul.f32 %v7298_v56, %v2532_v31 }
 0x4fc   : > { %v2635_v48 = vadd.f32 %v2603_v61, %v2567_v35  ;;  %v7373_v47 = vmul.f32 %v7290_v55, %v2430_v36  ;;  %v7376_v53 = vmul.f32 %v7298_v56, %v2494_v32  ;;  %v2363_v26 = vrot.slane %v7337_v25, 7 }
 0x4fd   : > { %v2704_v23 = vadd.f32 %v2672_v7, %v2636_v43  ;;  %v3062_v38 = vadd.f32 %v3030_v4, %v2994_v33  ;;  %v7384_v39 = vmul.f32 %v7280_v15, %v7337_v25  ;;  %v7388_v7 = vmul.f32 %v7282_v9, %v7337_v25 }
 0x4fe   : > { %v7379_v24 = vadd.f32 %v2671_v21, %v2635_v48  ;;  %v1948_v43 = vadd.f32 %v7266_v30, %v1947_v52  ;;  %v7392_v36 = vadd.f32 %v4734_v0, %v7266_v30  ;;  %v1951_v32 = vadd.f32 %v7266_v30, %v1950_v42 }
 0x4ff   : > { %9397 = vst [vmem:[#allocation81_spill] sm:$0xff] %v7384_v39  ;;  %9398 = vst [vmem:[#allocation82_spill] sm:$0xff] %v7388_v7  ;;  %v4737_v31 = vpop.f32.mrb[56].mxu0  ;;  %v7396_v35 = vadd.f32 %v7370_v11, %v2704_v23  ;;  %v7398_v4 = vadd.f32 %v3098_v13, %v3062_v38  ;;  %v7402_v48 = vmul.f32 %v7284_v28, %v7337_v25  ;;  %v9401_v33 = vrot.slane %v7308_v59, 1 }
 0x500   : > { %v1963_v21 = vpop.f32.mrb[57].mxu0  ;;  %v9402_v52 = vrot.slane %v7278_v60, 1  ;;  %v2362_v42 = vrot.slane %v1948_v43, 7  ;;  %v2463_v61 = vrot.slane %v1948_v43, 1  ;;  %v7413_v23 = vadd.f32 %v4737_v31, %v7266_v30 }
 0x501   : > { %9399 = vst [vmem:[#allocation83_spill] sm:$0xff] %v7398_v4  ;;  %9400 = vst [vmem:[#allocation84_spill] sm:$0xff] %v7402_v48  ;;  %v4738_v13 = vpop.f32.mrb[58].mxu0  ;;  %v7417_v38 = vsel %vm2317_vm1, %v2410_v14, 0.0  ;;  %v7420_v51 = vmul.f32 %v7280_v15, %v1948_v43  ;;  %v7423_v49 = vmul.f32 %v7282_v9, %v1948_v43  ;;  %v7426_v40 = vmul.f32 %v7284_v28, %v1948_v43 }
 0x502   : > { %v7410_v0 = vsel %vm2492_vm2, %v9402_v52, %v9401_v33  ;;  %9403 = vst [vmem:[#allocation85_spill] sm:$0xff] %v7413_v23  ;;  %v2379_v33 = vrot.slane %v7392_v36, 7  ;;  %v1966_v52 = vpop.f32.mrb[59].mxu0  ;;  %v2610_v34 = vmul.f32 %v7280_v15, %v7392_v36  ;;  %v2378_v29 = vrot.slane %v1951_v32, 7 }
 0x503   : > { %9404 = vst [vmem:[#allocation86_spill] sm:$0xff] %v7420_v51  ;;  %9405 = vst [vmem:[#allocation87_spill] sm:$0xff] %v7423_v49  ;;  %v2479_v14 = vrot.slane %v1951_v32, 1  ;;  %v3036_v43 = vmul.f32 %v7282_v9, %v7392_v36  ;;  %v7444_v18 = vmul.f32 %v7284_v28, %v7392_v36  ;;  %v2608_v10 = vmul.f32 %v7280_v15, %v1951_v32 }
 0x504   : > { %v7434_v16 = vsel %vm2391_vm0, %v2363_v26, %v2379_v33  ;;  %v7438_v63 = vsel %vm2391_vm0, %v2379_v33, %v2363_v26  ;;  %v2395_v37 = vsel %vm2391_vm0, %v2362_v42, %v2378_v29  ;;  %v2411_v26 = vsel %vm2391_vm0, %v2378_v29, %v2362_v42 }
 0x505   : > { %9406 = vst [vmem:[#allocation88_spill] sm:$0xff] %v7434_v16  ;;  %9407 = vst [vmem:[#allocation89_spill] sm:$0xff] %v7444_v18  ;;  %v2574_v31 = vmul.f32 %v7288_v57, %v7434_v16  ;;  %v3000_v8 = vmul.f32 %v7290_v55, %v7434_v16  ;;  %v7456_v33 = vsel %vm2492_vm2, %v2463_v61, %v2479_v14  ;;  %v7470_v42 = vsel %vm2317_vm1, %v2411_v26, 0.0 }
 0x506   : > { %v2512_v17 = vsel %vm2492_vm2, %v2479_v14, %v2463_v61  ;;  %v2572_v22 = vmul.f32 %v7288_v57, %v2395_v37  ;;  %v2998_v39 = vmul.f32 %v7290_v55, %v2395_v37  ;;  %v3034_v7 = vmul.f32 %v7282_v9, %v1951_v32 }
 0x507   : > { %v7462_v1 = vadd.f32 %v2610_v34, %v2574_v31  ;;  %v7464_v4 = vadd.f32 %v3036_v43, %v3000_v8  ;;  %v4741_v29 = vpop.f32.mrb[60].mxu0  ;;  %v3425_v61 = vmul.f32 %v7300_v44, %v2395_v37  ;;  %v3461_v14 = vmul.f32 %v7284_v28, %v1951_v32 }
 0x508   : > { %v7472_v51 = vadd.f32 %v2608_v10, %v2572_v22  ;;  %v1979_v18 = vpop.f32.mrb[61].mxu0  ;;  %v7478_v8 = vsel %vm2320_vm3, %v2512_v17, 0.0  ;;  %v7480_v34 = vadd.f32 %v3034_v7, %v2998_v39  ;;  %v2365_v31 = vrot.slane %v7413_v23, 7 }
 0x509   : > { %9408 = vst [vmem:[#allocation90_spill] sm:$0xff] %v7462_v1  ;;  %9409 = vst [vmem:[#allocation91_spill] sm:$0xff] %v7464_v4  ;;  %v4742_v1 = vpop.f32.mrb[62].mxu0  ;;  %v7484_v26 = vadd.f32 %v3461_v14, %v3425_v61  ;;  %v7488_v10 = vmul.f32 %v7280_v15, %v7413_v23  ;;  %v7491_v22 = vadd.f32 %v7266_v30, %v1963_v21 }
 0x50a   : > { %9410 = vst [vmem:[#allocation92_spill] sm:$0xff] %v7472_v51  ;;  %9411 = vst [vmem:[#allocation93_spill] sm:$0xff] %v7480_v34  ;;  %v7494_v37 = vadd.f32 %v4738_v13, %v7266_v30  ;;  %v1982_v17 = vpop.f32.mrb[63].mxu0  ;;  %v7498_v39 = vmul.f32 %v7282_v9, %v7413_v23  ;;  %v7502_v7 = vmul.f32 %v7284_v28, %v7413_v23 }
 0x50b   : > { %9412 = vst [vmem:[#allocation94_spill] sm:$0xff] %v7488_v10  ;;  %9413 = vst [vmem:[#allocation95_spill] sm:$0xff] %v7491_v22  ;;  %v7505_v32 = vadd.f32 %v7266_v30, %v1966_v52  ;;  %v7508_v61 = vadd.f32 %v4741_v29, %v7266_v30  ;;  %v2364_v21 = vrot.slane %v7491_v22, 7  ;;  %v7513_v14 = vadd.f32 %v7266_v30, %v1979_v18 }
 0x50c   : > { %9414 = vst [vmem:[#allocation96_spill] sm:$0xff] %v7494_v37  ;;  %9415 = vst [vmem:[#allocation97_spill] sm:$0xff] %v7498_v39  ;;  %v7516_v43 = vadd.f32 %v4742_v1, %v7266_v30  ;;  %v7520_v10 = vmul.f32 %v7280_v15, %v7491_v22  ;;  %v7524_v52 = vmul.f32 %v7282_v9, %v7491_v22  ;;  %v2381_v13 = vrot.slane %v7494_v37, 7 }
 0x50d   : > { %9416 = vst [vmem:[#allocation98_spill] sm:$0xff] %v7502_v7  ;;  %9417 = vst [vmem:[#allocation99_spill] sm:$0xff] %v7508_v61  ;;  %v7528_v29 = vmul.f32 %v7284_v28, %v7491_v22  ;;  %v2614_v1 = vmul.f32 %v7280_v15, %v7494_v37  ;;  %v3040_v39 = vmul.f32 %v7282_v9, %v7494_v37 }
 0x50e   : > { %9418 = vst [vmem:[#allocation100_spill] sm:$0xff] %v7513_v14  ;;  %9419 = vst [vmem:[#allocation101_spill] sm:$0xff] %v7516_v43  ;;  %v7539_v7 = vsel %vm2391_vm0, %v2365_v31, %v2381_v13  ;;  %v7547_v23 = vmul.f32 %v7284_v28, %v7494_v37  ;;  %v2612_v18 = vmul.f32 %v7280_v15, %v7505_v32 }
 0x50f   : > { %9420 = vst [vmem:[#allocation102_spill] sm:$0xff] %v7520_v10  ;;  %9421 = vst [vmem:[#allocation103_spill] sm:$0xff] %v7524_v52  ;;  %v2380_v10 = vrot.slane %v7505_v32, 7  ;;  %v7543_v52 = vsel %vm2391_vm0, %v2381_v13, %v2365_v31  ;;  %v3004_v4 = vmul.f32 %v7290_v55, %v7539_v7  ;;  %v4745_v13 = vpop.f32.mrb[64].mxu0  ;;  %v7586_v49 = vmul.f32 %v7280_v15, %v7508_v61 }
 0x510   : > { %9422 = vst [vmem:[#allocation104_spill] sm:$0xff] %v7528_v29  ;;  %9423 = vst [vmem:[#allocation105_spill] sm:$0xff] %v7539_v7  ;;  %v2578_v29 = vmul.f32 %v7288_v57, %v7539_v7  ;;  %v3038_v7 = vmul.f32 %v7282_v9, %v7505_v32  ;;  %v1995_v37 = vpop.f32.mrb[65].mxu0 }
 0x511   : > { %9424 = vst [vmem:[#allocation106_spill] sm:$0xff] %v7543_v52  ;;  %9425 = vst [vmem:[#allocation107_spill] sm:$0xff] %v7547_v23  ;;  %v7556_v51 = vsel %vm2391_vm0, %v2364_v21, %v2380_v10  ;;  %v7560_v31 = vsel %vm2391_vm0, %v2380_v10, %v2364_v21  ;;  %v7572_v48 = vadd.f32 %v3040_v39, %v3004_v4  ;;  %v2367_v21 = vrot.slane %v7508_v61, 7 }
 0x512   : > { %9426 = vst [vmem:[#allocation108_spill] sm:$0xff] %v7556_v51  ;;  %9427 = vst [vmem:[#allocation109_spill] sm:$0xff] %v7560_v31  ;;  %v2576_v23 = vmul.f32 %v7288_v57, %v7556_v51  ;;  %v3002_v52 = vmul.f32 %v7290_v55, %v7556_v51  ;;  %v7570_v22 = vadd.f32 %v2614_v1, %v2578_v29  ;;  %v4746_v31 = vpop.f32.mrb[66].mxu0  ;;  %v2383_v51 = vrot.slane %v7516_v43, 7 }
 0x513   : > { %9429 = vst [vmem:[#allocation111_spill] sm:$0xff] %v7572_v48  ;;  %v7576_v10 = vmul.f32 %v7284_v28, %v7505_v32  ;;  %9433 = vst [vmem:[#allocation115_spill] sm:$0xff] %v7586_v49  ;;  %v1998_v29 = vpop.f32.mrb[67].mxu0  ;;  %v7590_v4 = vmul.f32 %v7282_v9, %v7508_v61  ;;  %v7594_v39 = vmul.f32 %v7284_v28, %v7508_v61 }
 0x514   : > { %9428 = vst [vmem:[#allocation110_spill] sm:$0xff] %v7570_v22  ;;  %v7579_v16 = vadd.f32 %v2612_v18, %v2576_v23  ;;  %v7581_v34 = vadd.f32 %v3038_v7, %v3002_v52  ;;  %v2366_v23 = vrot.slane %v7513_v14, 7  ;;  %v7600_v52 = vmul.f32 %v7280_v15, %v7513_v14 }
 0x515   : > { %9430 = vst [vmem:[#allocation112_spill] sm:$0xff] %v7576_v10  ;;  %9434 = vst [vmem:[#allocation116_spill] sm:$0xff] %v7590_v4  ;;  %v7604_v18 = vmul.f32 %v7282_v9, %v7513_v14  ;;  %v7608_v1 = vmul.f32 %v7284_v28, %v7513_v14  ;;  %v2618_v4 = vmul.f32 %v7280_v15, %v7516_v43 }
 0x516   : > { %9431 = vst [vmem:[#allocation113_spill] sm:$0xff] %v7579_v16  ;;  %9432 = vst [vmem:[#allocation114_spill] sm:$0xff] %v7581_v34  ;;  %v3044_v7 = vmul.f32 %v7282_v9, %v7516_v43  ;;  %v7629_v49 = vmul.f32 %v7284_v28, %v7516_v43  ;;  %v7632_v22 = vadd.f32 %v4745_v13, %v7266_v30 }
 0x517   : > { %9435 = vst [vmem:[#allocation117_spill] sm:$0xff] %v7594_v39  ;;  %9436 = vst [vmem:[#allocation118_spill] sm:$0xff] %v7600_v52  ;;  %v7617_v52 = vadd.f32 %v7266_v30, %v1982_v17  ;;  %v7621_v39 = vsel %vm2391_vm0, %v2367_v21, %v2383_v51  ;;  %v7640_v48 = vadd.f32 %v7266_v30, %v1995_v37 }
 0x518   : > { %9437 = vst [vmem:[#allocation119_spill] sm:$0xff] %v7604_v18  ;;  %9438 = vst [vmem:[#allocation120_spill] sm:$0xff] %v7608_v1  ;;  %v7625_v18 = vsel %vm2391_vm0, %v2383_v51, %v2367_v21  ;;  %v2582_v61 = vmul.f32 %v7288_v57, %v7621_v39  ;;  %v3008_v17 = vmul.f32 %v7290_v55, %v7621_v39  ;;  %v4749_v51 = vpop.f32.mrb[68].mxu0 }
 0x519   : > { %9439 = vst [vmem:[#allocation121_spill] sm:$0xff] %v7617_v52  ;;  %9440 = vst [vmem:[#allocation122_spill] sm:$0xff] %v7621_v39  ;;  %v2382_v1 = vrot.slane %v7617_v52, 7  ;;  %v3042_v13 = vmul.f32 %v7282_v9, %v7617_v52  ;;  %v2011_v43 = vpop.f32.mrb[69].mxu0 }
 0x51a   : > { %9441 = vst [vmem:[#allocation123_spill] sm:$0xff] %v7625_v18  ;;  %9442 = vst [vmem:[#allocation124_spill] sm:$0xff] %v7629_v49  ;;  %v2616_v49 = vmul.f32 %v7280_v15, %v7617_v52  ;;  %v7648_v18 = vadd.f32 %v4746_v31, %v7266_v30  ;;  %v7650_v16 = vadd.f32 %v2618_v4, %v2582_v61  ;;  %v4750_v14 = vpop.f32.mrb[70].mxu0  ;;  %v2369_v4 = vrot.slane %v7632_v22, 7 }
 0x51b   : > { %9443 = vst [vmem:[#allocation125_spill] sm:$0xff] %v7632_v22  ;;  %9444 = vst [vmem:[#allocation126_spill] sm:$0xff] %v7640_v48  ;;  %v7652_v39 = vadd.f32 %v3044_v7, %v3008_v17  ;;  %v7656_v37 = vsel %vm2391_vm0, %v2366_v23, %v2382_v1  ;;  %v7660_v21 = vsel %vm2391_vm0, %v2382_v1, %v2366_v23  ;;  %v2014_v7 = vpop.f32.mrb[71].mxu0 }
 0x51c   : > { %9445 = vst [vmem:[#allocation127_spill] sm:$0xff] %v7648_v18  ;;  %9446 = vst [vmem:[#allocation128_spill] sm:$0xff] %v7650_v16  ;;  %v2580_v34 = vmul.f32 %v7288_v57, %v7656_v37  ;;  %v3006_v31 = vmul.f32 %v7290_v55, %v7656_v37  ;;  %v7668_v61 = vmul.f32 %v7284_v28, %v7617_v52 }
 0x51d   : > { %9447 = vst [vmem:[#allocation129_spill] sm:$0xff] %v7652_v39  ;;  %9448 = vst [vmem:[#allocation130_spill] sm:$0xff] %v7656_v37  ;;  %v7674_v23 = vmul.f32 %v7280_v15, %v7632_v22  ;;  %v7678_v1 = vmul.f32 %v7282_v9, %v7632_v22  ;;  %v7682_v16 = vmul.f32 %v7284_v28, %v7632_v22  ;;  %v2368_v37 = vrot.slane %v7640_v48, 7 }
 0x51e   : > { %9449 = vst [vmem:[#allocation131_spill] sm:$0xff] %v7660_v21  ;;  %9450 = vst [vmem:[#allocation132_spill] sm:$0xff] %v7668_v61  ;;  %v7684_v39 = vadd.f32 %v2616_v49, %v2580_v34  ;;  %v7686_v61 = vadd.f32 %v3042_v13, %v3006_v31  ;;  %v7692_v21 = vmul.f32 %v7280_v15, %v7640_v48  ;;  %v2385_v49 = vrot.slane %v7648_v18, 7 }
 0x51f   : > { %9451 = vst [vmem:[#allocation133_spill] sm:$0xff] %v7674_v23  ;;  %9452 = vst [vmem:[#allocation134_spill] sm:$0xff] %v7678_v1  ;;  %v7696_v23 = vmul.f32 %v7282_v9, %v7640_v48  ;;  %v7700_v1 = vmul.f32 %v7284_v28, %v7640_v48  ;;  %v2622_v13 = vmul.f32 %v7280_v15, %v7648_v18  ;;  %v4753_v22 = vpop.f32.mrb[72].mxu0 }
 0x520   : > { %9453 = vst [vmem:[#allocation135_spill] sm:$0xff] %v7682_v16  ;;  %9454 = vst [vmem:[#allocation136_spill] sm:$0xff] %v7684_v39  ;;  %v3048_v31 = vmul.f32 %v7282_v9, %v7648_v18  ;;  %v7709_v17 = vadd.f32 %v7266_v30, %v1998_v29  ;;  %v7717_v16 = vsel %vm2391_vm0, %v2385_v49, %v2369_v4 }
 0x521   : > { %9455 = vst [vmem:[#allocation137_spill] sm:$0xff] %v7686_v61  ;;  %9456 = vst [vmem:[#allocation138_spill] sm:$0xff] %v7692_v21  ;;  %v7713_v21 = vsel %vm2391_vm0, %v2369_v4, %v2385_v49  ;;  %v7721_v34 = vmul.f32 %v7284_v28, %v7648_v18  ;;  %v7732_v48 = vadd.f32 %v7266_v30, %v2011_v43  ;;  %v2027_v4 = vpop.f32.mrb[73].mxu0 }
 0x522   : > { %9457 = vst [vmem:[#allocation139_spill] sm:$0xff] %v7696_v23  ;;  %9458 = vst [vmem:[#allocation140_spill] sm:$0xff] %v7700_v1  ;;  %v7724_v23 = vadd.f32 %v4749_v51, %v7266_v30  ;;  %v2586_v29 = vmul.f32 %v7288_v57, %v7713_v21  ;;  %v3012_v1 = vmul.f32 %v7290_v55, %v7713_v21  ;;  %v2384_v39 = vrot.slane %v7709_v17, 7  ;;  %v4754_v18 = vpop.f32.mrb[74].mxu0 }
 0x523   : > { %9459 = vst [vmem:[#allocation141_spill] sm:$0xff] %v7709_v17  ;;  %9460 = vst [vmem:[#allocation142_spill] sm:$0xff] %v7713_v21  ;;  %v3046_v51 = vmul.f32 %v7282_v9, %v7709_v17  ;;  %v2030_v52 = vpop.f32.mrb[75].mxu0 }
 0x524   : > { %9461 = vst [vmem:[#allocation143_spill] sm:$0xff] %v7717_v16  ;;  %9462 = vst [vmem:[#allocation144_spill] sm:$0xff] %v7721_v34  ;;  %v2620_v34 = vmul.f32 %v7280_v15, %v7709_v17  ;;  %v7740_v16 = vadd.f32 %v4750_v14, %v7266_v30  ;;  %v7742_v61 = vadd.f32 %v2622_v13, %v2586_v29 }
 0x525   : > { %9463 = vst [vmem:[#allocation145_spill] sm:$0xff] %v7724_v23  ;;  %9464 = vst [vmem:[#allocation146_spill] sm:$0xff] %v7732_v48  ;;  %v7744_v21 = vadd.f32 %v3048_v31, %v3012_v1  ;;  %v7748_v43 = vsel %vm2391_vm0, %v2368_v37, %v2384_v39  ;;  %v7752_v49 = vsel %vm2391_vm0, %v2384_v39, %v2368_v37  ;;  %v2371_v1 = vrot.slane %v7724_v23, 7 }
 0x526   : > { %9465 = vst [vmem:[#allocation147_spill] sm:$0xff] %v7740_v16  ;;  %9466 = vst [vmem:[#allocation148_spill] sm:$0xff] %v7742_v61  ;;  %v2584_v10 = vmul.f32 %v7288_v57, %v7748_v43  ;;  %v3010_v14 = vmul.f32 %v7290_v55, %v7748_v43  ;;  %v7760_v13 = vmul.f32 %v7284_v28, %v7709_v17 }
 0x527   : > { %9467 = vst [vmem:[#allocation149_spill] sm:$0xff] %v7744_v21  ;;  %9468 = vst [vmem:[#allocation150_spill] sm:$0xff] %v7748_v43  ;;  %v7766_v29 = vmul.f32 %v7280_v15, %v7724_v23  ;;  %v7770_v39 = vmul.f32 %v7282_v9, %v7724_v23  ;;  %v7774_v37 = vmul.f32 %v7284_v28, %v7724_v23 }
 0x528   : > { %9469 = vst [vmem:[#allocation151_spill] sm:$0xff] %v7752_v49  ;;  %9470 = vst [vmem:[#allocation152_spill] sm:$0xff] %v7760_v13  ;;  %v7776_v61 = vadd.f32 %v2620_v34, %v2584_v10  ;;  %v7778_v21 = vadd.f32 %v3046_v51, %v3010_v14  ;;  %v2370_v13 = vrot.slane %v7732_v48, 7  ;;  %v7784_v43 = vmul.f32 %v7280_v15, %v7732_v48 }
 0x529   : > { %9471 = vst [vmem:[#allocation153_spill] sm:$0xff] %v7766_v29  ;;  %9472 = vst [vmem:[#allocation154_spill] sm:$0xff] %v7770_v39  ;;  %v7788_v29 = vmul.f32 %v7282_v9, %v7732_v48  ;;  %v7792_v39 = vmul.f32 %v7284_v28, %v7732_v48  ;;  %v2387_v10 = vrot.slane %v7740_v16, 7  ;;  %v2626_v51 = vmul.f32 %v7280_v15, %v7740_v16 }
 0x52a   : > { %9473 = vst [vmem:[#allocation155_spill] sm:$0xff] %v7774_v37  ;;  %9474 = vst [vmem:[#allocation156_spill] sm:$0xff] %v7776_v61  ;;  %v3052_v14 = vmul.f32 %v7282_v9, %v7740_v16  ;;  %v7801_v31 = vadd.f32 %v7266_v30, %v2014_v7  ;;  %v7813_v34 = vmul.f32 %v7284_v28, %v7740_v16 }
 0x52b   : > { %9475 = vst [vmem:[#allocation157_spill] sm:$0xff] %v7778_v21  ;;  %9476 = vst [vmem:[#allocation158_spill] sm:$0xff] %v7784_v43  ;;  %v4757_v43 = vpop.f32.mrb[76].mxu0  ;;  %v7805_v37 = vsel %vm2391_vm0, %v2371_v1, %v2387_v10  ;;  %v7816_v23 = vadd.f32 %v4753_v22, %v7266_v30  ;;  %v7824_v21 = vadd.f32 %v7266_v30, %v2027_v4 }
 0x52c   : > { %9477 = vst [vmem:[#allocation159_spill] sm:$0xff] %v7788_v29  ;;  %9478 = vst [vmem:[#allocation160_spill] sm:$0xff] %v7792_v39  ;;  %v7809_v29 = vsel %vm2391_vm0, %v2387_v10, %v2371_v1  ;;  %v2043_v39 = vpop.f32.mrb[77].mxu0  ;;  %v2590_v7 = vmul.f32 %v7288_v57, %v7805_v37  ;;  %v3016_v61 = vmul.f32 %v7290_v55, %v7805_v37  ;;  %v2386_v48 = vrot.slane %v7801_v31, 7 }
 0x52d   : > { %9479 = vst [vmem:[#allocation161_spill] sm:$0xff] %v7805_v37  ;;  %9480 = vst [vmem:[#allocation162_spill] sm:$0xff] %v7809_v29  ;;  %v4758_v1 = vpop.f32.mrb[78].mxu0  ;;  %v3050_v22 = vmul.f32 %v7282_v9, %v7801_v31  ;;  %v7832_v29 = vadd.f32 %v4754_v18, %v7266_v30 }
 0x52e   : > { %9481 = vst [vmem:[#allocation163_spill] sm:$0xff] %v7813_v34  ;;  %9482 = vst [vmem:[#allocation164_spill] sm:$0xff] %v7816_v23  ;;  %v2624_v34 = vmul.f32 %v7280_v15, %v7801_v31  ;;  %v2046_v16 = vpop.f32.mrb[79].mxu0  ;;  %v7834_v49 = vadd.f32 %v2626_v51, %v2590_v7  ;;  %v7836_v37 = vadd.f32 %v3052_v14, %v3016_v61  ;;  %v2373_v61 = vrot.slane %v7816_v23, 7 }
 0x52f   : > { %9483 = vst [vmem:[#allocation165_spill] sm:$0xff] %v7824_v21  ;;  %9484 = vst [vmem:[#allocation166_spill] sm:$0xff] %v7832_v29  ;;  %v7840_v4 = vsel %vm2391_vm0, %v2370_v13, %v2386_v48  ;;  %v7844_v10 = vsel %vm2391_vm0, %v2386_v48, %v2370_v13  ;;  %v7852_v51 = vmul.f32 %v7284_v28, %v7801_v31 }
 0x530   : > { %9485 = vst [vmem:[#allocation167_spill] sm:$0xff] %v7834_v49  ;;  %9486 = vst [vmem:[#allocation168_spill] sm:$0xff] %v7836_v37  ;;  %v2588_v17 = vmul.f32 %v7288_v57, %v7840_v4  ;;  %v3014_v18 = vmul.f32 %v7290_v55, %v7840_v4  ;;  %v7858_v7 = vmul.f32 %v7280_v15, %v7816_v23 }
 0x531   : > { %9487 = vst [vmem:[#allocation169_spill] sm:$0xff] %v7840_v4  ;;  %9488 = vst [vmem:[#allocation170_spill] sm:$0xff] %v7844_v10  ;;  %v7862_v48 = vmul.f32 %v7282_v9, %v7816_v23  ;;  %v7866_v13 = vmul.f32 %v7284_v28, %v7816_v23  ;;  %v7876_v4 = vmul.f32 %v7280_v15, %v7824_v21 }
 0x532   : > { %9489 = vst [vmem:[#allocation171_spill] sm:$0xff] %v7852_v51  ;;  %9490 = vst [vmem:[#allocation172_spill] sm:$0xff] %v7858_v7  ;;  %v7868_v49 = vadd.f32 %v2624_v34, %v2588_v17  ;;  %v7870_v37 = vadd.f32 %v3050_v22, %v3014_v18  ;;  %v2372_v51 = vrot.slane %v7824_v21, 7  ;;  %v7880_v7 = vmul.f32 %v7282_v9, %v7824_v21 }
 0x533   : > { %9491 = vst [vmem:[#allocation173_spill] sm:$0xff] %v7862_v48  ;;  %9492 = vst [vmem:[#allocation174_spill] sm:$0xff] %v7866_v13  ;;  %v7884_v48 = vmul.f32 %v7284_v28, %v7824_v21  ;;  %v2389_v17 = vrot.slane %v7832_v29, 7  ;;  %v2630_v22 = vmul.f32 %v7280_v15, %v7832_v29  ;;  %v3056_v18 = vmul.f32 %v7282_v9, %v7832_v29 }
 0x534   : > { %9493 = vst [vmem:[#allocation175_spill] sm:$0xff] %v7868_v49  ;;  %9494 = vst [vmem:[#allocation176_spill] sm:$0xff] %v7870_v37  ;;  %v7893_v14 = vadd.f32 %v7266_v30, %v2030_v52  ;;  %v7905_v34 = vmul.f32 %v7284_v28, %v7832_v29  ;;  %v7914_v49 = vadd.f32 %v7266_v30, %v2043_v39 }
 0x535   : > { %9495 = vst [vmem:[#allocation177_spill] sm:$0xff] %v7876_v4  ;;  %9496 = vst [vmem:[#allocation178_spill] sm:$0xff] %v7880_v7  ;;  %v7897_v4 = vsel %vm2391_vm0, %v2373_v61, %v2389_v17  ;;  %v7901_v13 = vsel %vm2391_vm0, %v2389_v17, %v2373_v61  ;;  %v2052_v7 = vadd.f32 %v4757_v43, %v7266_v30 }
 0x536   : > { %9497 = vst [vmem:[#allocation179_spill] sm:$0xff] %v7884_v48  ;;  %9498 = vst [vmem:[#allocation180_spill] sm:$0xff] %v7893_v14  ;;  %v2594_v23 = vmul.f32 %v7288_v57, %v7897_v4  ;;  %v3020_v52 = vmul.f32 %v7290_v55, %v7897_v4  ;;  %v2388_v48 = vrot.slane %v7893_v14, 7  ;;  %v2628_v17 = vmul.f32 %v7280_v15, %v7893_v14 }
 0x537   : > { %9499 = vst [vmem:[#allocation181_spill] sm:$0xff] %v7897_v4  ;;  %9500 = vst [vmem:[#allocation182_spill] sm:$0xff] %v7901_v13  ;;  %v2055_v43 = vadd.f32 %v4758_v1, %v7266_v30  ;;  %v2812_v1 = vrot.slane %v2052_v7, 7 }
 0x538   : > { %9501 = vst [vmem:[#allocation183_spill] sm:$0xff] %v7905_v34  ;;  %9502 = vst [vmem:[#allocation184_spill] sm:$0xff] %v7914_v49  ;;  %v3054_v34 = vmul.f32 %v7282_v9, %v7893_v14  ;;  %v7922_v13 = vadd.f32 %v2630_v22, %v2594_v23  ;;  %v7924_v29 = vadd.f32 %v3056_v18, %v3020_v52  ;;  %v2908_v22 = vrot.slane %v2052_v7, 1 }
 0x539   : > { %v7928_v4 = vsel %vm2391_vm0, %v2372_v51, %v2388_v48  ;;  %v7932_v39 = vsel %vm2391_vm0, %v2388_v48, %v2372_v51  ;;  %v7940_v23 = vmul.f32 %v7284_v28, %v7893_v14  ;;  %v7943_v18 = vmul.f32 %v7282_v9, %v2052_v7  ;;  %v4797_v48 = vpop.f32.mrb[20].mxu1 }
 0x53a   : > { %9503 = vst [vmem:[#allocation185_spill] sm:$0xff] %v7922_v13  ;;  %9504 = vst [vmem:[#allocation186_spill] sm:$0xff] %v7924_v29  ;;  %v2592_v61 = vmul.f32 %v7288_v57, %v7928_v4  ;;  %v3018_v21 = vmul.f32 %v7290_v55, %v7928_v4  ;;  %v7946_v52 = vmul.f32 %v7284_v28, %v2052_v7  ;;  %v2374_v51 = vrot.slane %v7914_v49, 7 }
 0x53b   : > { %9505 = vst [vmem:[#allocation187_spill] sm:$0xff] %v7928_v4  ;;  %9506 = vst [vmem:[#allocation188_spill] sm:$0xff] %v7932_v39  ;;  %v2217_v39 = vpop.f32.mrb[21].mxu1  ;;  %v7964_v7 = vmul.f32 %v7284_v28, %v7914_v49  ;;  %v7969_v4 = vadd.f32 %v7266_v30, %v2046_v16 }
 0x53c   : > { %9507 = vst [vmem:[#allocation189_spill] sm:$0xff] %v7940_v23  ;;  %9508 = vst [vmem:[#allocation190_spill] sm:$0xff] %v7943_v18  ;;  %v7949_v13 = vadd.f32 %v2628_v17, %v2592_v61  ;;  %v7951_v29 = vadd.f32 %v3054_v34, %v3018_v21  ;;  %v7956_v23 = vmul.f32 %v7280_v15, %v7914_v49  ;;  %v2924_v61 = vrot.slane %v2055_v43, 1  ;;  %v4798_v17 = vpop.f32.mrb[22].mxu1 }
 0x53d   : > { %9509 = vst [vmem:[#allocation191_spill] sm:$0xff] %v7946_v52  ;;  %v7960_v18 = vmul.f32 %v7282_v9, %v7914_v49  ;;  %9514 = vst [vmem:[#allocation196_spill] sm:$0xff] %v7964_v7  ;;  %v2828_v52 = vrot.slane %v2055_v43, 7  ;;  %v3060_v21 = vmul.f32 %v7282_v9, %v2055_v43  ;;  %v3487_v34 = vmul.f32 %v7284_v28, %v2055_v43 }
 0x53e   : > { %9510 = vst [vmem:[#allocation192_spill] sm:$0xff] %v7949_v13  ;;  %9511 = vst [vmem:[#allocation193_spill] sm:$0xff] %v7951_v29  ;;  %v2220_v29 = vpop.f32.mrb[23].mxu1  ;;  %v7977_v7 = vsel %vm2492_vm2, %v2908_v22, %v2924_v61  ;;  %v2956_v14 = vsel %vm2492_vm2, %v2924_v61, %v2908_v22  ;;  %v2390_v10 = vrot.slane %v7969_v4, 7 }
 0x53f   : > { %9512 = vst [vmem:[#allocation194_spill] sm:$0xff] %v7956_v23  ;;  %9513 = vst [vmem:[#allocation195_spill] sm:$0xff] %v7960_v18  ;;  %v5304_v23 = vld [vmem:[#allocation18] ss:$0 sm:$0xff]  ;;  %v2844_v18 = vsel %vm2391_vm0, %v2812_v1, %v2828_v52  ;;  %v2860_v49 = vsel %vm2391_vm0, %v2828_v52, %v2812_v1  ;;  %v7985_v30 = vsel %vm2320_vm3, %v2956_v14, 0.0  ;;  %v7990_v1 = vmul.f32 %v7298_v56, %v7977_v7 }
 0x540   : > { %v2226_v13 = vadd.f32 %v5304_v23, %v4797_v48  ;;  %v2891_v16 = vsel %vm2317_vm1, %v2860_v49, 0.0  ;;  %9515 = vst [vmem:[#allocation197_spill] sm:$0xff] %v7985_v30  ;;  %v3024_v43 = vmul.f32 %v7290_v55, %v2844_v18  ;;  %v2218_v48 = vadd.f32 %v5304_v23, %v2217_v39 }
 0x541   : > { %9516 = vst [vmem:[#allocation198_spill] sm:$0xff] %v7990_v1  ;;  %v3128_v52 = vmul.f32 %v7298_v56, %v7985_v30  ;;  %v3451_v37 = vmul.f32 %v7300_v44, %v2844_v18  ;;  %v2229_v22 = vadd.f32 %v5304_v23, %v4798_v17  ;;  %v7996_v61 = vmul.f32 %v7290_v55, %v2891_v16 }
 0x542   : > { %v3092_v49 = vadd.f32 %v3060_v21, %v3024_v43  ;;  %v7999_v14 = vmul.f32 %v7300_v44, %v2891_v16  ;;  %v2632_v1 = vmul.f32 %v7280_v15, %v7969_v4  ;;  %v3058_v30 = vmul.f32 %v7282_v9, %v7969_v4  ;;  %v5305_v9 = vld [vmem:[#allocation12] ss:$0 sm:$0xff] }
 0x543   : > { %9517 = vst [vmem:[#allocation199_spill] sm:$0xff] %v7996_v61  ;;  %v8002_v39 = vadd.f32 %v3487_v34, %v3451_v37  ;;  %v2234_v18 = vadd.f32 %v2226_v13, %v6916_v50  ;;  %v8013_v21 = vsel %vm2391_vm0, %v2374_v51, %v2390_v10  ;;  %v8017_v16 = vsel %vm2391_vm0, %v2390_v10, %v2374_v51 }
 0x544   : > { %v8009_v17 = vadd.f32 %v3128_v52, %v3092_v49  ;;  %v2232_v37 = vadd.f32 %v2218_v48, %v6908_v27  ;;  %v2596_v34 = vmul.f32 %v7288_v57, %v8013_v21  ;;  %v3022_v50 = vmul.f32 %v7290_v55, %v8013_v21 }
 0x545   : > { %v2238_v13 = vmul.f32 %v5305_v9, %v2234_v18  ;;  %v2235_v43 = vadd.f32 %v2229_v22, %v6918_v2  ;;  %v2221_v49 = vadd.f32 %v5304_v23, %v2220_v29  ;;  %v9519_v15 = vrot.slane %v7278_v60, 1  ;;  %v5306_v18 = vld [vmem:[%s6499_s3] sm:$0xff] }
 0x546   : > { %9518 = vst [vmem:[#allocation200_spill] sm:$0xff] %v8009_v17  ;;  %v2236_v52 = vmul.f32 %v5305_v9, %v2232_v37  ;;  %v9520_v10 = vrot.slane %v7308_v59, 1  ;;  %v2995_v51 = vmul.f32 %v7290_v55, %v7417_v38  ;;  %v8033_v48 = vadd.f32 %v2632_v1, %v2596_v34  ;;  %v5307_v22 = vld [vmem:[%s6483_s6] sm:$0xff] }
 0x547   : > { %v8035_v17 = vadd.f32 %v3058_v30, %v3022_v50  ;;  %v2242_v61 = vadd.f32 %v5306_v18, %v2238_v13  ;;  %v2239_v2 = vmul.f32 %v5305_v9, %v2235_v43  ;;  %v2233_v60 = vadd.f32 %v2221_v49, %v6910_v41  ;;  %v8040_v23 = vld [vmem:[#allocation23 + $0x8] ss:$0 sm:$0xff]  ;;  %v5308_v1 = vld [vmem:[#allocation11] ss:$0 sm:$0xff]  ;;  %v5309_v30 = vld [vmem:[%s6499_s3 + $0x8] sm:$0xff] }
 0x548   : > { %v2511_v27 = vsel %vm2492_vm2, %v9520_v10, %v9519_v15  ;;  %v2240_v29 = vadd.f32 %v5307_v22, %v2236_v52  ;;  %v3061_v15 = vadd.f32 %v7321_v6, %v7373_v47  ;;  %v3099_v50 = vmul.f32 %v7298_v56, %v7410_v0  ;;  %v5310_v10 = vld [vmem:[#allocation11 + $0x1] ss:$0 sm:$0xff]  ;;  %v5311_v18 = vld [vmem:[%s6483_s6 + $0x8] sm:$0xff] }
 0x549   : > { %v2534_v59 = vsel %vm2320_vm3, %v2511_v27, 0.0  ;;  %v2246_v37 = vmul.f32 %v5308_v1, %v2242_v61  ;;  %v2243_v34 = vadd.f32 %v5309_v30, %v2239_v2  ;;  %v2237_v43 = vmul.f32 %v5305_v9, %v2233_v60 }
 0x54a   : > { %v3100_v13 = vmul.f32 %v7298_v56, %v2534_v59  ;;  %v2244_v41 = vmul.f32 %v5308_v1, %v2240_v29  ;;  %v8051_v52 = vadd.f32 %v7376_v53, %v3061_v15  ;;  %v3422_v49 = vmul.f32 %v7300_v44, %v7417_v38 }
 0x54b   : > { %v2250_v47 = vadd.f32 %v5310_v10, %v2246_v37  ;;  %v2247_v6 = vmul.f32 %v5308_v1, %v2243_v34  ;;  %v3423_v61 = vmul.f32 %v7300_v44, %v7331_v12  ;;  %v3526_v27 = vmul.f32 %v8040_v23, %v7410_v0 }
 0x54c   : > { %v2241_v2 = vadd.f32 %v5311_v18, %v2237_v43  ;;  %v2248_v22 = vadd.f32 %v5310_v10, %v2244_v41  ;;  %v3490_v9 = vadd.f32 %v7317_v20, %v3422_v49  ;;  %v3527_v53 = vmul.f32 %v8040_v23, %v2534_v59 }
 0x54d   : > { %v2251_v29 = vadd.f32 %v5310_v10, %v2247_v6  ;;  %v3491_v60 = vadd.f32 %v7363_v62, %v3423_v61  ;;  %v2735_v15 = vadd.f32 %v7370_v11, %v7379_v24  ;;  %v3063_v37 = vadd.f32 %v7313_v45, %v2995_v51 }
 0x54e   : > { %v2245_v30 = vmul.f32 %v5308_v1, %v2241_v2  ;;  %v8066_v12 = vadd.f32 %v3526_v27, %v3490_v9  ;;  %v3132_v34 = vadd.f32 %v3100_v13, %v7356_v58  ;;  %v3424_v43 = vmul.f32 %v7300_v44, %v7470_v42  ;;  %v9600_v58 = vld [vmem:[#allocation152_spill] sm:$0xff] }
 0x54f   : > { %v2253_v41 = vpack.c.bf16 %v2251_v29, %v2250_v47  ;;  %v8071_v20 = vadd.f32 %v3527_v53, %v3491_v60  ;;  %v3131_v49 = vadd.f32 %v3099_v50, %v3063_v37  ;;  %v3528_v62 = vmul.f32 %v8040_v23, %v7456_v33 }
 0x550   : > { %v2249_v6 = vadd.f32 %v5310_v10, %v2245_v30  ;;  %v3164_v24 = vadd.f32 %v3132_v34, %v7396_v35  ;;  %v3492_v45 = vadd.f32 %v7426_v40, %v3424_v43  ;;  %v3529_v51 = vmul.f32 %v8040_v23, %v7478_v8 }
 0x551   : > { %v3163_v1 = vadd.f32 %v3131_v49, %v2735_v15  ;;  %v9521_v13 = vrot.slane %v7392_v36, 1  ;;  %v9522_v47 = vrot.slane %v7337_v25, 1  ;;  %v8098_v2 = vsel %vm2317_vm1, %v7438_v63, 0.0 }
 0x552   : > { %v2252_v61 = vpack.c.bf16 %v2249_v6, %v2248_v22  ;;  %v3560_v27 = vadd.f32 %v3528_v62, %v3492_v45  ;;  %v3561_v18 = vadd.f32 %v3529_v51, %v7484_v26  ;;  %v2569_v9 = vmul.f32 %v7288_v57, %v7417_v38  ;;  %v9527_v6 = vld [vmem:[#allocation88_spill] sm:$0xff] }
 0x553   : > { %v8086_v50 = vsel %vm2492_vm2, %v9522_v47, %v9521_v13  ;;  %v9523_v10 = vmov %v9522_v47  ;;  %v9524_v35 = vmov %v9521_v13  ;;  %v2673_v25 = vmul.f32 %v7294_v19, %v7410_v0  ;;  %v9525_v0 = vld [vmem:[#allocation87_spill] sm:$0xff]  ;;  %v9528_v45 = vld [vmem:[#allocation84_spill] sm:$0xff] }
 0x554   : > { %v2513_v40 = vsel %vm2492_vm2, %v9524_v35, %v9523_v10  ;;  %v2674_v36 = vmul.f32 %v7294_v19, %v2534_v59  ;;  %v2997_v53 = vmul.f32 %v7290_v55, %v7470_v42  ;;  %4815 = vmatprep.mubr.bf16.mxu0 %v2252_v61  ;;  %v3592_v22 = vadd.f32 %v3560_v27, %v3163_v1 }
 0x555   : > { %v3593_v29 = vadd.f32 %v3561_v18, %v3164_v24  ;;  %v3101_v26 = vmul.f32 %v7298_v56, %v7456_v33  ;;  %v3102_v63 = vmul.f32 %v7298_v56, %v7478_v8  ;;  %4816 = vmatmul.mubr.bf16.vlgmr.msra.gmra.mrb[80].mxu0 %v2253_v41  ;;  %v2637_v38 = vadd.f32 %v7305_v5, %v2569_v9  ;;  %v9531_v9 = vld [vmem:[#allocation95_spill] sm:$0xff] }
 0x556   : > { %v2706_v60 = vadd.f32 %v2674_v36, %v7354_v54  ;;  %v3065_v15 = vadd.f32 %v9525_v0, %v2997_v53  ;;  %v3426_v59 = vmul.f32 %v7300_v44, %v8098_v2  ;;  %v8118_v37 = vmul.f32 %v7284_v28, %v7969_v4  ;;  %v9526_v54 = vld [vmem:[#allocation93_spill] sm:$0xff] }
 0x557   : > { %v3656_v30 = vmul.f32 0.70710677, %v3592_v22  ;;  %v3657_v34 = vmul.f32 0.70710677, %v3593_v29  ;;  %v8122_v43 = vsel %vm2320_vm3, %v2513_v40, 0.0  ;;  %v2705_v41 = vadd.f32 %v2673_v25, %v2637_v38  ;;  %v9529_v40 = vld [vmem:[#allocation89_spill] sm:$0xff] }
 0x558   : > { %v2738_v5 = vadd.f32 %v7370_v11, %v2706_v60  ;;  %v3133_v49 = vadd.f32 %v3101_v26, %v3065_v15  ;;  %v3134_v62 = vadd.f32 %v3102_v63, %v9526_v54  ;;  %v3427_v24 = vmul.f32 %v7300_v44, %v9527_v6  ;;  %v9533_v26 = vld [vmem:[#allocation109_spill] sm:$0xff] }
 0x559   : > { %5196 = verf.f32 %v3656_v30  ;;  %v3494_v51 = vadd.f32 %v9528_v45, %v3426_v59  ;;  %v3530_v1 = vmul.f32 %v8040_v23, %v8086_v50  ;;  %v2737_v13 = vadd.f32 %v7370_v11, %v2705_v41 }
 0x55a   : > { %5198 = verf.f32 %v3657_v34  ;;  %v3166_v47 = vadd.f32 %v3134_v62, %v2738_v5  ;;  %v3531_v10 = vmul.f32 %v8040_v23, %v8122_v43  ;;  %v3624_v35 = vmul.f32 0.5, %v3592_v22  ;;  %v9536_v5 = vld [vmem:[#allocation86_spill] sm:$0xff]  ;;  %v9537_v62 = vld [vmem:[#allocation92_spill] sm:$0xff] }
 0x55b   : > { %v3495_v61 = vadd.f32 %v9529_v40, %v3427_v24  ;;  %v3562_v27 = vadd.f32 %v3530_v1, %v3494_v51  ;;  %v9530_v18 = vrot.slane %v7505_v32, 1  ;;  %v9532_v25 = vrot.slane %v9531_v9, 1  ;;  %v9538_v24 = vld [vmem:[#allocation82_spill] sm:$0xff]  ;;  %v9540_v9 = vld [vmem:[#allocation108_spill] sm:$0xff] }
 0x55c   : > { %v3165_v53 = vadd.f32 %v3133_v49, %v2737_v13  ;;  %v8146_v63 = vsel %vm2317_vm1, %v9533_v26, 0.0  ;;  %v2571_v0 = vmul.f32 %v7288_v57, %v7470_v42  ;;  %v2675_v59 = vmul.f32 %v7294_v19, %v7456_v33  ;;  %v9539_v13 = vld [vmem:[#allocation91_spill] sm:$0xff] }
 0x55d   : > { %v8141_v36 = vsel %vm2492_vm2, %v9532_v25, %v9530_v18  ;;  %v9534_v38 = vmov %v9532_v25  ;;  %v9535_v22 = vmov %v9530_v18  ;;  %v3563_v15 = vadd.f32 %v3531_v10, %v3495_v61 }
 0x55e   : > { %v2514_v60 = vsel %vm2492_vm2, %v9535_v22, %v9534_v38  ;;  %v2676_v30 = vmul.f32 %v7294_v19, %v7478_v8  ;;  %v2999_v34 = vmul.f32 %v7290_v55, %v8098_v2  ;;  %v3594_v41 = vadd.f32 %v3562_v27, %v3165_v53  ;;  %v9541_v53 = vld [vmem:[#allocation104_spill] sm:$0xff] }
 0x55f   : > { %v2639_v49 = vadd.f32 %v9536_v5, %v2571_v0  ;;  %v3103_v32 = vmul.f32 %v7298_v56, %v8086_v50  ;;  %v3104_v54 = vmul.f32 %v7298_v56, %v8122_v43  ;;  %v3595_v42 = vadd.f32 %v3563_v15, %v3166_v47 }
 0x560   : > { %v2708_v6 = vadd.f32 %v2676_v30, %v9537_v62  ;;  %v3067_v33 = vadd.f32 %v9538_v24, %v2999_v34  ;;  %v3428_v8 = vmul.f32 %v7300_v44, %v8146_v63  ;;  %v3658_v45 = vmul.f32 0.70710677, %v3594_v41  ;;  %v9542_v34 = vld [vmem:[#allocation112_spill] sm:$0xff] }
 0x561   : > { %v8173_v51 = vsel %vm2320_vm3, %v2514_v60, 0.0  ;;  %v2707_v1 = vadd.f32 %v2675_v59, %v2639_v49  ;;  %v3136_v10 = vadd.f32 %v3104_v54, %v9539_v13  ;;  %v3625_v40 = vmul.f32 0.5, %v3593_v29  ;;  %v9543_v54 = vld [vmem:[#allocation96_spill] sm:$0xff] }
 0x562   : > { %v3659_v61 = vmul.f32 0.70710677, %v3595_v42  ;;  %v2740_v27 = vadd.f32 %v7370_v11, %v2708_v6  ;;  %v3135_v47 = vadd.f32 %v3103_v32, %v3067_v33  ;;  %5200 = verf.f32 %v3658_v45  ;;  %v9545_v6 = vld [vmem:[#allocation85_spill] sm:$0xff] }
 0x563   : > { %v2739_v18 = vadd.f32 %v7370_v11, %v2707_v1  ;;  %v3429_v25 = vmul.f32 %v7300_v44, %v9540_v9  ;;  %v3496_v26 = vadd.f32 %v9541_v53, %v3428_v8  ;;  %v5197_v38 = vpop.eup %5196  ;;  %v3532_v60 = vmul.f32 %v8040_v23, %v8141_v36 }
 0x564   : > { %5202 = verf.f32 %v3659_v61  ;;  %v3168_v22 = vadd.f32 %v3136_v10, %v2740_v27  ;;  %v3533_v29 = vmul.f32 %v8040_v23, %v8173_v51  ;;  %v5199_v0 = vpop.eup %5198  ;;  %v3720_v15 = vadd.f32 1.0, %v5197_v38 }
 0x565   : > { %v3626_v59 = vmul.f32 0.5, %v3594_v41  ;;  %v3167_v30 = vadd.f32 %v3135_v47, %v2739_v18  ;;  %v3497_v5 = vadd.f32 %v9542_v34, %v3429_v25  ;;  %v3721_v49 = vadd.f32 1.0, %v5199_v0  ;;  %v9549_v18 = vld [vmem:[#allocation106_spill] sm:$0xff] }
 0x566   : > { %v3564_v32 = vadd.f32 %v3532_v60, %v3496_v26  ;;  %v9544_v62 = vrot.slane %v9543_v54, 1  ;;  %v9546_v24 = vrot.slane %v9545_v6, 1  ;;  %v8200_v1 = vmul.f32 %v3720_v15, %v3624_v35  ;;  %v9550_v26 = vld [vmem:[#allocation81_spill] sm:$0xff]  ;;  %v9552_v15 = vld [vmem:[#allocation103_spill] sm:$0xff] }
 0x567   : > { %v3627_v13 = vmul.f32 0.5, %v3595_v42  ;;  %v3565_v10 = vadd.f32 %v3533_v29, %v3497_v5  ;;  %v2573_v61 = vmul.f32 %v7288_v57, %v8098_v2  ;;  %v8204_v27 = vmul.f32 %v3721_v49, %v3625_v40  ;;  %v9551_v29 = vld [vmem:[#allocation90_spill] sm:$0xff]  ;;  %v9553_v6 = vld [vmem:[#allocation105_spill] sm:$0xff] }
 0x568   : > { %v8192_v33 = vsel %vm2492_vm2, %v9546_v24, %v9544_v62  ;;  %v9547_v8 = vmov %v9546_v24  ;;  %v9548_v45 = vmov %v9544_v62  ;;  %v3596_v47 = vadd.f32 %v3564_v32, %v3167_v30 }
 0x569   : > { %v2515_v41 = vsel %vm2492_vm2, %v9548_v45, %v9547_v8  ;;  %v8209_v9 = vsel %vm2317_vm1, %v9549_v18, 0.0  ;;  %v2678_v25 = vmul.f32 %v7294_v19, %v8122_v43  ;;  %v3597_v53 = vadd.f32 %v3565_v10, %v3168_v22 }
 0x56a   : > { %v2641_v35 = vadd.f32 %v9550_v26, %v2573_v61  ;;  %v2677_v42 = vmul.f32 %v7294_v19, %v8086_v50  ;;  %v3001_v2 = vmul.f32 %v7290_v55, %v8146_v63  ;;  %v3660_v38 = vmul.f32 0.70710677, %v3596_v47  ;;  %v9555_v61 = vld [vmem:[#allocation98_spill] sm:$0xff] }
 0x56b   : > { %v8222_v60 = vsel %vm2320_vm3, %v2515_v41, 0.0  ;;  %v2710_v0 = vadd.f32 %v2678_v25, %v9551_v29  ;;  %v3661_v43 = vmul.f32 0.70710677, %v3597_v53  ;;  %v3105_v50 = vmul.f32 %v7298_v56, %v8141_v36  ;;  %v9554_v41 = vld [vmem:[#allocation114_spill] sm:$0xff] }
 0x56c   : > { %v2709_v22 = vadd.f32 %v2677_v42, %v2641_v35  ;;  %v3069_v30 = vadd.f32 %v9552_v15, %v3001_v2  ;;  %5204 = verf.f32 %v3660_v38  ;;  %v3106_v5 = vmul.f32 %v7298_v56, %v8173_v51  ;;  %v5201_v32 = vpop.eup %5200  ;;  %v9556_v42 = vld [vmem:[#allocation107_spill] sm:$0xff] }
 0x56d   : > { %v2742_v34 = vadd.f32 %v7370_v11, %v2710_v0  ;;  %v3430_v49 = vmul.f32 %v7300_v44, %v8209_v9  ;;  %5206 = verf.f32 %v3661_v43  ;;  %v3431_v24 = vmul.f32 %v7300_v44, %v9553_v6 }
 0x56e   : > { %v2741_v54 = vadd.f32 %v7370_v11, %v2709_v22  ;;  %v3137_v62 = vadd.f32 %v3105_v50, %v3069_v30  ;;  %v5203_v8 = vpop.eup %5202  ;;  %v3722_v45 = vadd.f32 1.0, %v5201_v32  ;;  %v3138_v10 = vadd.f32 %v3106_v5, %v9554_v41  ;;  %v9557_v50 = vld [vmem:[#allocation121_spill] sm:$0xff] }
 0x56f   : > { %v3498_v18 = vadd.f32 %v9555_v61, %v3430_v49  ;;  %v3534_v25 = vmul.f32 %v8040_v23, %v8192_v33  ;;  %v3723_v26 = vadd.f32 1.0, %v5203_v8  ;;  %v3499_v2 = vadd.f32 %v9556_v42, %v3431_v24  ;;  %v9559_v49 = vld [vmem:[#allocation100_spill] sm:$0xff]  ;;  %v9565_v42 = vld [vmem:[#allocation113_spill] sm:$0xff] }
 0x570   : > { %v3169_v35 = vadd.f32 %v3137_v62, %v2741_v54  ;;  %v3535_v38 = vmul.f32 %v8040_v23, %v8222_v60  ;;  %v8243_v29 = vmul.f32 %v3722_v45, %v3626_v59  ;;  %v3628_v0 = vmul.f32 0.5, %v3596_v47 }
 0x571   : > { %v3170_v43 = vadd.f32 %v3138_v10, %v2742_v34  ;;  %v3566_v22 = vadd.f32 %v3534_v25, %v3498_v18  ;;  %v8245_v15 = vmul.f32 %v3723_v26, %v3627_v13  ;;  %v9558_v5 = vrot.slane %v9557_v50, 1  ;;  %v9563_v13 = vld [vmem:[#allocation131_spill] sm:$0xff]  ;;  %v9564_v25 = vld [vmem:[#allocation102_spill] sm:$0xff] }
 0x572   : > { %v3567_v30 = vadd.f32 %v3535_v38, %v3499_v2  ;;  %v9560_v32 = vrot.slane %v9559_v49, 1  ;;  %v3629_v47 = vmul.f32 0.5, %v3597_v53  ;;  %v8264_v24 = vsel %vm2317_vm1, %v9563_v13, 0.0  ;;  %v9566_v38 = vld [vmem:[#allocation97_spill] sm:$0xff]  ;;  %v9567_v13 = vld [vmem:[#allocation111_spill] sm:$0xff] }
 0x573   : > { %v9562_v6 = vmov %v9558_v5  ;;  %v3598_v34 = vadd.f32 %v3566_v22, %v3169_v35  ;;  %v2575_v8 = vmul.f32 %v7288_v57, %v8146_v63  ;;  %v2680_v10 = vmul.f32 %v7294_v19, %v8173_v51 }
 0x574   : > { %v8253_v54 = vsel %vm2492_vm2, %v9560_v32, %v9558_v5  ;;  %v9561_v62 = vmov %v9560_v32  ;;  %v3599_v41 = vadd.f32 %v3567_v30, %v3170_v43  ;;  %v3003_v61 = vmul.f32 %v7290_v55, %v8209_v9 }
 0x575   : > { %v2516_v59 = vsel %vm2492_vm2, %v9562_v6, %v9561_v62  ;;  %v3662_v53 = vmul.f32 0.70710677, %v3598_v34  ;;  %v2643_v26 = vadd.f32 %v9564_v25, %v2575_v8  ;;  %v2679_v63 = vmul.f32 %v7294_v19, %v8141_v36  ;;  %v9569_v25 = vld [vmem:[#allocation120_spill] sm:$0xff] }
 0x576   : > { %v8276_v18 = vsel %vm2320_vm3, %v2516_v59, 0.0  ;;  %v3663_v35 = vmul.f32 0.70710677, %v3599_v41  ;;  %v2712_v2 = vadd.f32 %v2680_v10, %v9565_v42  ;;  %v3071_v43 = vadd.f32 %v9566_v38, %v3003_v61  ;;  %v5205_v22 = vpop.eup %5204  ;;  %v9568_v10 = vld [vmem:[#allocation130_spill] sm:$0xff] }
 0x577   : > { %v3107_v51 = vmul.f32 %v7298_v56, %v8192_v33  ;;  %5208 = verf.f32 %v3662_v53  ;;  %v2711_v30 = vadd.f32 %v2679_v63, %v2643_v26  ;;  %v3108_v50 = vmul.f32 %v7298_v56, %v8222_v60  ;;  %v5207_v49 = vpop.eup %5206 }
 0x578   : > { %v3432_v5 = vmul.f32 %v7300_v44, %v8264_v24  ;;  %v3724_v32 = vadd.f32 1.0, %v5205_v22  ;;  %5210 = verf.f32 %v3663_v35  ;;  %v2744_v36 = vadd.f32 %v7370_v11, %v2712_v2 }
 0x579   : > { %v3139_v62 = vadd.f32 %v3107_v51, %v3071_v43  ;;  %v3725_v6 = vadd.f32 1.0, %v5207_v49  ;;  %v2743_v59 = vadd.f32 %v7370_v11, %v2711_v30  ;;  %v3140_v8 = vadd.f32 %v3108_v50, %v9567_v13  ;;  %v9570_v11 = vld [vmem:[#allocation132_spill] sm:$0xff]  ;;  %v9571_v30 = vld [vmem:[#allocation101_spill] sm:$0xff] }
 0x57a   : > { %v3433_v61 = vmul.f32 %v7300_v44, %v9568_v10  ;;  %v8294_v53 = vmul.f32 %v3724_v32, %v3628_v0  ;;  %v3500_v26 = vadd.f32 %v9569_v25, %v3432_v5  ;;  %v3536_v63 = vmul.f32 %v8040_v23, %v8253_v54  ;;  %v9573_v0 = vld [vmem:[#allocation99_spill] sm:$0xff] }
 0x57b   : > { %v3537_v35 = vmul.f32 %v8040_v23, %v8276_v18  ;;  %v8301_v42 = vmul.f32 %v3725_v6, %v3629_v47  ;;  %v3171_v2 = vadd.f32 %v3139_v62, %v2743_v59  ;;  %v3172_v38 = vadd.f32 %v3140_v8, %v2744_v36  ;;  %v9577_v8 = vld [vmem:[#allocation123_spill] sm:$0xff] }
 0x57c   : > { %v3501_v43 = vadd.f32 %v9570_v11, %v3433_v61  ;;  %v3630_v51 = vmul.f32 0.5, %v3598_v34  ;;  %v3568_v22 = vadd.f32 %v3536_v63, %v3500_v26  ;;  %v9572_v50 = vrot.slane %v9571_v30, 1  ;;  %v9578_v63 = vld [vmem:[#allocation94_spill] sm:$0xff] }
 0x57d   : > { %v9574_v49 = vrot.slane %v9573_v0, 1  ;;  %v3631_v34 = vmul.f32 0.5, %v3599_v41  ;;  %v2577_v6 = vmul.f32 %v7288_v57, %v8209_v9  ;;  %v8325_v10 = vsel %vm2317_vm1, %v9577_v8, 0.0 }
 0x57e   : > { %v9576_v13 = vmov %v9572_v50  ;;  %v3569_v62 = vadd.f32 %v3537_v35, %v3501_v43  ;;  %v3600_v59 = vadd.f32 %v3568_v22, %v3171_v2  ;;  %v2682_v61 = vmul.f32 %v7294_v19, %v8222_v60  ;;  %v9579_v2 = vld [vmem:[#allocation110_spill] sm:$0xff]  ;;  %v9580_v22 = vld [vmem:[#allocation119_spill] sm:$0xff] }
 0x57f   : > { %v8310_v5 = vsel %vm2492_vm2, %v9574_v49, %v9572_v50  ;;  %v9575_v32 = vmov %v9574_v49  ;;  %v3005_v25 = vmul.f32 %v7290_v55, %v8264_v24  ;;  %v2645_v11 = vadd.f32 %v9578_v63, %v2577_v6  ;;  %v8345_v6 = vld [vmem:[#allocation24] ss:$0 sm:$0xff] }
 0x580   : > { %v2517_v47 = vsel %vm2492_vm2, %v9576_v13, %v9575_v32  ;;  %v3601_v26 = vadd.f32 %v3569_v62, %v3172_v38  ;;  %v2681_v41 = vmul.f32 %v7294_v19, %v8192_v33  ;;  %v3110_v9 = vmul.f32 %v7298_v56, %v8276_v18  ;;  %v9581_v32 = vld [vmem:[#allocation137_spill] sm:$0xff] }
 0x581   : > { %v3664_v35 = vmul.f32 0.70710677, %v3600_v59  ;;  %v2714_v43 = vadd.f32 %v2682_v61, %v9579_v2  ;;  %v3073_v30 = vadd.f32 %v9580_v22, %v3005_v25  ;;  %v3109_v60 = vmul.f32 %v7298_v56, %v8253_v54  ;;  %v5209_v50 = vpop.eup %5208 }
 0x582   : > { %v3665_v0 = vmul.f32 0.70710677, %v3601_v26  ;;  %v8342_v38 = vsel %vm2320_vm3, %v2517_v47, 0.0  ;;  %v2713_v49 = vadd.f32 %v2681_v41, %v2645_v11  ;;  %v3142_v33 = vadd.f32 %v3110_v9, %v9581_v32  ;;  %v5211_v13 = vpop.eup %5210  ;;  %v9583_v41 = vld [vmem:[#allocation122_spill] sm:$0xff] }
 0x583   : > { %v3726_v62 = vadd.f32 1.0, %v5209_v50  ;;  %5212 = verf.f32 %v3664_v35  ;;  %v2746_v8 = vadd.f32 %v8345_v6, %v2714_v43  ;;  %v3141_v61 = vadd.f32 %v3109_v60, %v3073_v30  ;;  %v9584_v30 = vld [vmem:[#allocation117_spill] sm:$0xff] }
 0x584   : > { %v3727_v25 = vadd.f32 1.0, %v5211_v13  ;;  %5214 = verf.f32 %v3665_v0  ;;  %v2745_v63 = vadd.f32 %v8345_v6, %v2713_v49  ;;  %v3434_v2 = vmul.f32 %v7300_v44, %v8325_v10  ;;  %v9585_v49 = vld [vmem:[#allocation124_spill] sm:$0xff] }
 0x585   : > { %v8351_v47 = vmul.f32 %v3726_v62, %v3630_v51  ;;  %v3174_v11 = vadd.f32 %v3142_v33, %v2746_v8  ;;  %v3435_v9 = vmul.f32 %v7300_v44, %v9583_v41  ;;  %v3538_v35 = vmul.f32 %v8040_v23, %v8310_v5  ;;  %v9586_v51 = vld [vmem:[#allocation141_spill] sm:$0xff]  ;;  %v9588_v33 = vld [vmem:[#allocation126_spill] sm:$0xff] }
 0x586   : > { %v8357_v22 = vmul.f32 %v3727_v25, %v3631_v34  ;;  %v3173_v43 = vadd.f32 %v3141_v61, %v2745_v63  ;;  %v3502_v60 = vadd.f32 %v9584_v30, %v3434_v2  ;;  %v3539_v50 = vmul.f32 %v8040_v23, %v8342_v38  ;;  %v9592_v2 = vld [vmem:[#allocation151_spill] sm:$0xff] }
 0x587   : > { %9582 = vst [vmem:[#allocation87_spill] sm:$0xff] %v8351_v47  ;;  %v3632_v0 = vmul.f32 0.5, %v3600_v59  ;;  %v3503_v32 = vadd.f32 %v9585_v49, %v3435_v9  ;;  %v9587_v13 = vrot.slane %v9586_v51, 1  ;;  %v9589_v62 = vrot.slane %v9588_v33, 1 }
 0x588   : > { %v3570_v63 = vadd.f32 %v3538_v35, %v3502_v60  ;;  %v8382_v41 = vsel %vm2317_vm1, %v9592_v2, 0.0  ;;  %v2579_v9 = vmul.f32 %v7288_v57, %v8264_v24  ;;  %v2683_v49 = vmul.f32 %v7294_v19, %v8253_v54  ;;  %v9593_v35 = vld [vmem:[#allocation118_spill] sm:$0xff] }
 0x589   : > { %v8369_v8 = vsel %vm2492_vm2, %v9589_v62, %v9587_v13  ;;  %v9590_v34 = vmov %v9589_v62  ;;  %v9591_v61 = vmov %v9587_v13  ;;  %v3571_v30 = vadd.f32 %v3539_v50, %v3503_v32  ;;  %v9594_v50 = vld [vmem:[#allocation136_spill] sm:$0xff] }
 0x58a   : > { %v2518_v25 = vsel %vm2492_vm2, %v9591_v61, %v9590_v34  ;;  %v2684_v51 = vmul.f32 %v7294_v19, %v8276_v18  ;;  %v3007_v13 = vmul.f32 %v7290_v55, %v8325_v10  ;;  %v3602_v33 = vadd.f32 %v3570_v63, %v3173_v43  ;;  %v9595_v61 = vld [vmem:[#allocation116_spill] sm:$0xff]  ;;  %v9596_v43 = vld [vmem:[#allocation129_spill] sm:$0xff] }
 0x58b   : > { %v2647_v60 = vadd.f32 %v9593_v35, %v2579_v9  ;;  %v3111_v62 = vmul.f32 %v7298_v56, %v8310_v5  ;;  %v3112_v34 = vmul.f32 %v7298_v56, %v8342_v38  ;;  %v3603_v24 = vadd.f32 %v3571_v30, %v3174_v11 }
 0x58c   : > { %v2716_v32 = vadd.f32 %v2684_v51, %v9594_v50  ;;  %v3075_v54 = vadd.f32 %v9595_v61, %v3007_v13  ;;  %v3436_v18 = vmul.f32 %v7300_v44, %v8382_v41  ;;  %v3633_v2 = vmul.f32 0.5, %v3601_v26  ;;  %v9597_v61 = vld [vmem:[#allocation150_spill] sm:$0xff] }
 0x58d   : > { %v3666_v59 = vmul.f32 0.70710677, %v3602_v33  ;;  %v2715_v36 = vadd.f32 %v2683_v49, %v2647_v60  ;;  %v3144_v63 = vadd.f32 %v3112_v34, %v9596_v43  ;;  %v5213_v9 = vpop.eup %5212  ;;  %v3667_v35 = vmul.f32 0.70710677, %v3603_v24  ;;  %v9598_v34 = vld [vmem:[#allocation140_spill] sm:$0xff] }
 0x58e   : > { %v8404_v45 = vsel %vm2320_vm3, %v2518_v25, 0.0  ;;  %v2748_v11 = vadd.f32 %v8345_v6, %v2716_v32  ;;  %v3143_v30 = vadd.f32 %v3111_v62, %v3075_v54  ;;  %v5215_v51 = vpop.eup %5214  ;;  %v3728_v50 = vadd.f32 1.0, %v5213_v9  ;;  %v9602_v54 = vld [vmem:[#allocation127_spill] sm:$0xff] }
 0x58f   : > { %5216 = verf.f32 %v3666_v59  ;;  %v2747_v13 = vadd.f32 %v8345_v6, %v2715_v36  ;;  %v3437_v26 = vmul.f32 %v7300_v44, %v9597_v61  ;;  %v3729_v49 = vadd.f32 1.0, %v5215_v51 }
 0x590   : > { %5218 = verf.f32 %v3667_v35  ;;  %v3176_v60 = vadd.f32 %v3144_v63, %v2748_v11  ;;  %v3504_v43 = vadd.f32 %v9598_v34, %v3436_v18  ;;  %v8411_v40 = vmul.f32 %v3728_v50, %v3632_v0  ;;  %v9604_v35 = vld [vmem:[#allocation125_spill] sm:$0xff]  ;;  %v9606_v11 = vld [vmem:[#allocation143_spill] sm:$0xff] }
 0x591   : > { %v3175_v25 = vadd.f32 %v3143_v30, %v2747_v13  ;;  %v3505_v47 = vadd.f32 %v9600_v58, %v3437_v26  ;;  %v3540_v62 = vmul.f32 %v8040_v23, %v8369_v8  ;;  %v8416_v32 = vmul.f32 %v3729_v49, %v3633_v2  ;;  %v9609_v34 = vld [vmem:[#allocation115_spill] sm:$0xff] }
 0x592   : > { %9599 = vst [vmem:[#allocation93_spill] sm:$0xff] %v8411_v40  ;;  %v3634_v59 = vmul.f32 0.5, %v3602_v33  ;;  %v3541_v36 = vmul.f32 %v8040_v23, %v8404_v45  ;;  %v9603_v9 = vrot.slane %v9602_v54, 1  ;;  %v9605_v63 = vrot.slane %v9604_v35, 1  ;;  %v9610_v35 = vld [vmem:[#allocation128_spill] sm:$0xff] }
 0x593   : > { %9601 = vst [vmem:[#allocation88_spill] sm:$0xff] %v8416_v32  ;;  %v3572_v18 = vadd.f32 %v3540_v62, %v3504_v43  ;;  %v8431_v58 = vsel %vm2317_vm1, %v9606_v11, 0.0  ;;  %v2581_v51 = vmul.f32 %v7288_v57, %v8325_v10  ;;  %v3635_v13 = vmul.f32 0.5, %v3603_v24  ;;  %v9615_v32 = vld [vmem:[#allocation144_spill] sm:$0xff] }
 0x594   : > { %v8426_v0 = vsel %vm2492_vm2, %v9605_v63, %v9603_v9  ;;  %v9607_v2 = vmov %v9605_v63  ;;  %v9608_v33 = vmov %v9603_v9  ;;  %v3573_v61 = vadd.f32 %v3541_v36, %v3505_v47 }
 0x595   : > { %v2519_v30 = vsel %vm2492_vm2, %v9608_v33, %v9607_v2  ;;  %v2686_v26 = vmul.f32 %v7294_v19, %v8342_v38  ;;  %v3604_v49 = vadd.f32 %v3572_v18, %v3175_v25  ;;  %v2649_v43 = vadd.f32 %v9609_v34, %v2581_v51  ;;  %v9611_v25 = vld [vmem:[#allocation139_spill] sm:$0xff]  ;;  %v9612_v2 = vld [vmem:[#allocation157_spill] sm:$0xff]  ;;  %v9613_v34 = vld [vmem:[#allocation142_spill] sm:$0xff] }
 0x596   : > { %v2685_v62 = vmul.f32 %v7294_v19, %v8310_v5  ;;  %v3009_v54 = vmul.f32 %v7290_v55, %v8382_v41  ;;  %v3605_v9 = vadd.f32 %v3573_v61, %v3176_v60  ;;  %v3114_v63 = vmul.f32 %v7298_v56, %v8404_v45 }
 0x597   : > { %v2718_v10 = vadd.f32 %v2686_v26, %v9610_v35  ;;  %v3438_v47 = vmul.f32 %v7300_v44, %v8431_v58  ;;  %v3668_v24 = vmul.f32 0.70710677, %v3604_v49  ;;  %v3113_v18 = vmul.f32 %v7298_v56, %v8369_v8 }
 0x598   : > { %v2717_v38 = vadd.f32 %v2685_v62, %v2649_v43  ;;  %v3077_v36 = vadd.f32 %v9611_v25, %v3009_v54  ;;  %v3669_v5 = vmul.f32 0.70710677, %v3605_v9  ;;  %v8460_v11 = vsel %vm2320_vm3, %v2519_v30, 0.0  ;;  %v9614_v25 = vld [vmem:[#allocation135_spill] sm:$0xff] }
 0x599   : > { %v2750_v60 = vadd.f32 %v8345_v6, %v2718_v10  ;;  %v3146_v33 = vadd.f32 %v3114_v63, %v9612_v2  ;;  %v5217_v51 = vpop.eup %5216  ;;  %5220 = verf.f32 %v3668_v24  ;;  %v3439_v43 = vmul.f32 %v7300_v44, %v9613_v34  ;;  %v9618_v2 = vld [vmem:[#allocation146_spill] sm:$0xff] }
 0x59a   : > { %v2749_v61 = vadd.f32 %v8345_v6, %v2717_v38  ;;  %v3145_v26 = vadd.f32 %v3113_v18, %v3077_v36  ;;  %v5219_v62 = vpop.eup %5218  ;;  %v3730_v54 = vadd.f32 1.0, %v5217_v51  ;;  %5222 = verf.f32 %v3669_v5 }
 0x59b   : > { %v3178_v35 = vadd.f32 %v3146_v33, %v2750_v60  ;;  %v3506_v50 = vadd.f32 %v9614_v25, %v3438_v47  ;;  %v3731_v30 = vadd.f32 1.0, %v5219_v62  ;;  %v3507_v10 = vadd.f32 %v9615_v32, %v3439_v43  ;;  %v9622_v62 = vld [vmem:[#allocation138_spill] sm:$0xff] }
 0x59c   : > { %v3177_v40 = vadd.f32 %v3145_v26, %v2749_v61  ;;  %v3542_v63 = vmul.f32 %v8040_v23, %v8426_v0  ;;  %v8471_v24 = vmul.f32 %v3730_v54, %v3634_v59  ;;  %v3636_v38 = vmul.f32 0.5, %v3604_v49 }
 0x59d   : > { %v3543_v36 = vmul.f32 %v8040_v23, %v8460_v11  ;;  %v9617_v18 = vrot.slane %v7801_v31, 1  ;;  %v9619_v5 = vrot.slane %v9618_v2, 1  ;;  %v8483_v60 = vmul.f32 %v3731_v30, %v3635_v13  ;;  %v9623_v30 = vld [vmem:[#allocation170_spill] sm:$0xff] }
 0x59e   : > { %9616 = vst [vmem:[#allocation84_spill] sm:$0xff] %v8471_v24  ;;  %v3574_v32 = vadd.f32 %v3542_v63, %v3506_v50  ;;  %v2583_v51 = vmul.f32 %v7288_v57, %v8382_v41  ;;  %v3637_v61 = vmul.f32 0.5, %v3605_v9  ;;  %v2687_v34 = vmul.f32 %v7294_v19, %v8369_v8  ;;  %v9624_v9 = vld [vmem:[#allocation156_spill] sm:$0xff] }
 0x59f   : > { %v8481_v47 = vsel %vm2492_vm2, %v9619_v5, %v9617_v18  ;;  %v9620_v33 = vmov %v9619_v5  ;;  %v9621_v59 = vmov %v9617_v18  ;;  %v3575_v26 = vadd.f32 %v3543_v36, %v3507_v10  ;;  %v9625_v36 = vld [vmem:[#allocation134_spill] sm:$0xff] }
 0x5a0   : > { %v2520_v49 = vsel %vm2492_vm2, %v9621_v59, %v9620_v33  ;;  %v2688_v13 = vmul.f32 %v7294_v19, %v8404_v45  ;;  %v3606_v43 = vadd.f32 %v3574_v32, %v3177_v40  ;;  %v2651_v31 = vadd.f32 %v9622_v62, %v2583_v51  ;;  %v9626_v32 = vld [vmem:[#allocation149_spill] sm:$0xff] }
 0x5a1   : > { %v3011_v54 = vmul.f32 %v7290_v55, %v8431_v58  ;;  %v3607_v25 = vadd.f32 %v3575_v26, %v3178_v35  ;;  %v8505_v41 = vsel %vm2317_vm1, %v9623_v30, 0.0  ;;  %v3116_v45 = vmul.f32 %v7298_v56, %v8460_v11 }
 0x5a2   : > { %v2720_v8 = vadd.f32 %v2688_v13, %v9624_v9  ;;  %v3670_v10 = vmul.f32 0.70710677, %v3606_v43  ;;  %v2719_v63 = vadd.f32 %v2687_v34, %v2651_v31  ;;  %v3115_v18 = vmul.f32 %v7298_v56, %v8426_v0 }
 0x5a3   : > { %v3079_v40 = vadd.f32 %v9625_v36, %v3011_v54  ;;  %v3671_v2 = vmul.f32 0.70710677, %v3607_v25  ;;  %v8515_v35 = vsel %vm2320_vm3, %v2520_v49, 0.0  ;;  %v3148_v33 = vadd.f32 %v3116_v45, %v9626_v32  ;;  %v5221_v59 = vpop.eup %5220  ;;  %v9627_v54 = vld [vmem:[#allocation169_spill] sm:$0xff] }
 0x5a4   : > { %v2752_v5 = vadd.f32 %v8345_v6, %v2720_v8  ;;  %5224 = verf.f32 %v3670_v10  ;;  %v2751_v51 = vadd.f32 %v8345_v6, %v2719_v63  ;;  %v3440_v34 = vmul.f32 %v7300_v44, %v8505_v41  ;;  %v5223_v13 = vpop.eup %5222  ;;  %v9628_v8 = vld [vmem:[#allocation160_spill] sm:$0xff] }
 0x5a5   : > { %v3147_v26 = vadd.f32 %v3115_v18, %v3079_v40  ;;  %v3732_v62 = vadd.f32 1.0, %v5221_v59  ;;  %5226 = verf.f32 %v3671_v2  ;;  %v3441_v49 = vmul.f32 %v7300_v44, %v9627_v54  ;;  %v9630_v40 = vld [vmem:[#allocation171_spill] sm:$0xff] }
 0x5a6   : > { %v3180_v31 = vadd.f32 %v3148_v33, %v2752_v5  ;;  %v3733_v30 = vadd.f32 1.0, %v5223_v13  ;;  %v3508_v36 = vadd.f32 %v9628_v8, %v3440_v34  ;;  %v3544_v45 = vmul.f32 %v8040_v23, %v8481_v47  ;;  %v9632_v33 = vld [vmem:[#allocation147_spill] sm:$0xff]  ;;  %v9634_v13 = vld [vmem:[#allocation145_spill] sm:$0xff] }
 0x5a7   : > { %v3179_v9 = vadd.f32 %v3147_v26, %v2751_v51  ;;  %v8527_v10 = vmul.f32 %v3732_v62, %v3636_v38  ;;  %v3638_v63 = vmul.f32 0.5, %v3606_v43  ;;  %v3509_v18 = vadd.f32 %v9630_v40, %v3441_v49  ;;  %v9643_v8 = vld [vmem:[#allocation161_spill] sm:$0xff] }
 0x5a8   : > { %v3545_v32 = vmul.f32 %v8040_v23, %v8515_v35  ;;  %v8532_v2 = vmul.f32 %v3733_v30, %v3637_v61  ;;  %v3576_v5 = vadd.f32 %v3544_v45, %v3508_v36  ;;  %v9633_v59 = vrot.slane %v9632_v33, 1  ;;  %v9638_v61 = vld [vmem:[#allocation162_spill] sm:$0xff] }
 0x5a9   : > { %9629 = vst [vmem:[#allocation89_spill] sm:$0xff] %v8527_v10  ;;  %v9635_v51 = vrot.slane %v9634_v13, 1  ;;  %v3639_v62 = vmul.f32 0.5, %v3607_v25  ;;  %v8551_v49 = vsel %vm2317_vm1, %v9638_v61, 0.0  ;;  %v2585_v30 = vmul.f32 %v7288_v57, %v8431_v58  ;;  %v9640_v13 = vld [vmem:[#allocation148_spill] sm:$0xff] }
 0x5aa   : > { %9631 = vst [vmem:[#allocation95_spill] sm:$0xff] %v8532_v2  ;;  %v9637_v43 = vmov %v9633_v59  ;;  %v3577_v54 = vadd.f32 %v3545_v32, %v3509_v18  ;;  %v3608_v36 = vadd.f32 %v3576_v5, %v3179_v9  ;;  %v2690_v45 = vmul.f32 %v7294_v19, %v8460_v11  ;;  %v9639_v18 = vld [vmem:[#allocation133_spill] sm:$0xff] }
 0x5ab   : > { %v8540_v26 = vsel %vm2492_vm2, %v9635_v51, %v9633_v59  ;;  %v9636_v38 = vmov %v9635_v51  ;;  %v3013_v40 = vmul.f32 %v7290_v55, %v8505_v41  ;;  %v2653_v32 = vadd.f32 %v9639_v18, %v2585_v30 }
 0x5ac   : > { %v2521_v34 = vsel %vm2492_vm2, %v9637_v43, %v9636_v38  ;;  %v3609_v25 = vadd.f32 %v3577_v54, %v3180_v31  ;;  %v2689_v33 = vmul.f32 %v7294_v19, %v8426_v0  ;;  %v3118_v59 = vmul.f32 %v7298_v56, %v8515_v35  ;;  %v9641_v38 = vld [vmem:[#allocation159_spill] sm:$0xff]  ;;  %v9642_v54 = vld [vmem:[#allocation176_spill] sm:$0xff] }
 0x5ad   : > { %v3672_v58 = vmul.f32 0.70710677, %v3608_v36  ;;  %v2722_v51 = vadd.f32 %v2690_v45, %v9640_v13  ;;  %v3081_v9 = vadd.f32 %v9641_v38, %v3013_v40  ;;  %v3117_v11 = vmul.f32 %v7298_v56, %v8481_v47 }
 0x5ae   : > { %v3673_v5 = vmul.f32 0.70710677, %v3609_v25  ;;  %v8572_v31 = vsel %vm2320_vm3, %v2521_v34, 0.0  ;;  %v2721_v43 = vadd.f32 %v2689_v33, %v2653_v32  ;;  %v3150_v61 = vadd.f32 %v3118_v59, %v9642_v54  ;;  %v5225_v0 = vpop.eup %5224  ;;  %v9644_v33 = vld [vmem:[#allocation155_spill] sm:$0xff] }
 0x5af   : > { %5228 = verf.f32 %v3672_v58  ;;  %v2754_v30 = vadd.f32 %v8345_v6, %v2722_v51  ;;  %v3149_v18 = vadd.f32 %v3117_v11, %v3081_v9  ;;  %v3442_v45 = vmul.f32 %v7300_v44, %v8551_v49  ;;  %v5227_v40 = vpop.eup %5226  ;;  %v9646_v11 = vld [vmem:[#allocation163_spill] sm:$0xff] }
 0x5b0   : > { %v3734_v13 = vadd.f32 1.0, %v5225_v0  ;;  %5230 = verf.f32 %v3673_v5  ;;  %v2753_v38 = vadd.f32 %v8345_v6, %v2721_v43  ;;  %v3443_v34 = vmul.f32 %v7300_v44, %v9643_v8  ;;  %v9648_v8 = vld [vmem:[#allocation180_spill] sm:$0xff] }
 0x5b1   : > { %v3735_v50 = vadd.f32 1.0, %v5227_v40  ;;  %v3182_v32 = vadd.f32 %v3150_v61, %v2754_v30  ;;  %v3510_v59 = vadd.f32 %v9644_v33, %v3442_v45  ;;  %v3546_v58 = vmul.f32 %v8040_v23, %v8540_v26  ;;  %v9650_v61 = vld [vmem:[#allocation165_spill] sm:$0xff]  ;;  %v9654_v33 = vld [vmem:[#allocation188_spill] sm:$0xff] }
 0x5b2   : > { %v8584_v51 = vmul.f32 %v3734_v13, %v3638_v63  ;;  %v3181_v9 = vadd.f32 %v3149_v18, %v2753_v38  ;;  %v3511_v54 = vadd.f32 %v9646_v11, %v3443_v34  ;;  %v3547_v5 = vmul.f32 %v8040_v23, %v8572_v31  ;;  %v9655_v11 = vld [vmem:[#allocation158_spill] sm:$0xff] }
 0x5b3   : > { %v8589_v0 = vmul.f32 %v3735_v50, %v3639_v62  ;;  %v3640_v43 = vmul.f32 0.5, %v3608_v36  ;;  %v3578_v10 = vadd.f32 %v3546_v58, %v3510_v59  ;;  %v9649_v40 = vrot.slane %v9648_v8, 1 }
 0x5b4   : > { %9645 = vst [vmem:[#allocation109_spill] sm:$0xff] %v8584_v51  ;;  %v9651_v30 = vrot.slane %v9650_v61, 1  ;;  %v3641_v63 = vmul.f32 0.5, %v3609_v25  ;;  %v3579_v13 = vadd.f32 %v3547_v5, %v3511_v54  ;;  %v2587_v62 = vmul.f32 %v7288_v57, %v8505_v41  ;;  %v9660_v51 = vld [vmem:[#allocation179_spill] sm:$0xff] }
 0x5b5   : > { %9647 = vst [vmem:[#allocation86_spill] sm:$0xff] %v8589_v0  ;;  %v9653_v38 = vmov %v9649_v40  ;;  %v3610_v34 = vadd.f32 %v3578_v10, %v3181_v9  ;;  %v8612_v59 = vsel %vm2317_vm1, %v9654_v33, 0.0  ;;  %v2692_v25 = vmul.f32 %v7294_v19, %v8515_v35  ;;  %v9656_v9 = vld [vmem:[#allocation175_spill] sm:$0xff] }
 0x5b6   : > { %v8597_v45 = vsel %vm2492_vm2, %v9651_v30, %v9649_v40  ;;  %v9652_v18 = vmov %v9651_v30  ;;  %v3611_v58 = vadd.f32 %v3579_v13, %v3182_v32  ;;  %v2655_v54 = vadd.f32 %v9655_v11, %v2587_v62  ;;  %v9657_v30 = vld [vmem:[#allocation154_spill] sm:$0xff]  ;;  %v9658_v62 = vld [vmem:[#allocation168_spill] sm:$0xff] }
 0x5b7   : > { %v2522_v50 = vsel %vm2492_vm2, %v9653_v38, %v9652_v18  ;;  %v2691_v5 = vmul.f32 %v7294_v19, %v8481_v47  ;;  %v3015_v41 = vmul.f32 %v7290_v55, %v8551_v49  ;;  %v3674_v8 = vmul.f32 0.70710677, %v3610_v34 }
 0x5b8   : > { %v8623_v10 = vsel %vm2320_vm3, %v2522_v50, 0.0  ;;  %v2724_v40 = vadd.f32 %v2692_v25, %v9656_v9  ;;  %v3120_v61 = vmul.f32 %v7298_v56, %v8572_v31  ;;  %v3675_v35 = vmul.f32 0.70710677, %v3611_v58 }
 0x5b9   : > { %v2723_v32 = vadd.f32 %v2691_v5, %v2655_v54  ;;  %v3083_v13 = vadd.f32 %v9657_v30, %v3015_v41  ;;  %v3119_v47 = vmul.f32 %v7298_v56, %v8540_v26  ;;  %v5229_v18 = vpop.eup %5228  ;;  %5232 = verf.f32 %v3674_v8  ;;  %v9659_v30 = vld [vmem:[#allocation187_spill] sm:$0xff] }
 0x5ba   : > { %v2756_v38 = vadd.f32 %v8345_v6, %v2724_v40  ;;  %v3152_v33 = vadd.f32 %v3120_v61, %v9658_v62  ;;  %v3444_v50 = vmul.f32 %v7300_v44, %v8612_v59  ;;  %v5231_v25 = vpop.eup %5230  ;;  %v3736_v11 = vadd.f32 1.0, %v5229_v18 }
 0x5bb   : > { %5234 = verf.f32 %v3675_v35  ;;  %v2755_v9 = vadd.f32 %v8345_v6, %v2723_v32  ;;  %v3151_v54 = vadd.f32 %v3119_v47, %v3083_v13  ;;  %v3737_v5 = vadd.f32 1.0, %v5231_v25  ;;  %v9663_v13 = vld [vmem:[#allocation189_spill] sm:$0xff] }
 0x5bc   : > { %v3184_v41 = vadd.f32 %v3152_v33, %v2756_v38  ;;  %v3445_v36 = vmul.f32 %v7300_v44, %v9659_v30  ;;  %v3512_v8 = vadd.f32 %v9660_v51, %v3444_v50  ;;  %v8639_v0 = vmul.f32 %v3736_v11, %v3640_v43  ;;  %v9664_v38 = vld [vmem:[#allocation166_spill] sm:$0xff]  ;;  %v9666_v33 = vld [vmem:[#allocation164_spill] sm:$0xff] }
 0x5bd   : > { %v3183_v40 = vadd.f32 %v3151_v54, %v2755_v9  ;;  %v3548_v61 = vmul.f32 %v8040_v23, %v8597_v45  ;;  %v3549_v18 = vmul.f32 %v8040_v23, %v8623_v10  ;;  %v8645_v35 = vmul.f32 %v3737_v5, %v3641_v63  ;;  %v9670_v5 = vld [vmem:[#allocation182_spill] sm:$0xff] }
 0x5be   : > { %9661 = vst [vmem:[#allocation92_spill] sm:$0xff] %v8639_v0  ;;  %v3642_v32 = vmul.f32 0.5, %v3610_v34  ;;  %v3513_v47 = vadd.f32 %v9663_v13, %v3445_v36  ;;  %v9665_v62 = vrot.slane %v9664_v38, 1  ;;  %v9667_v25 = vrot.slane %v9666_v33, 1  ;;  %v9672_v33 = vld [vmem:[#allocation167_spill] sm:$0xff] }
 0x5bf   : > { %9662 = vst [vmem:[#allocation82_spill] sm:$0xff] %v8645_v35  ;;  %v3643_v43 = vmul.f32 0.5, %v3611_v58  ;;  %v3580_v50 = vadd.f32 %v3548_v61, %v3512_v8  ;;  %v2589_v36 = vmul.f32 %v7288_v57, %v8551_v49  ;;  %v8669_v30 = vsel %vm2317_vm1, %v9670_v5, 0.0  ;;  %v9671_v61 = vld [vmem:[#allocation153_spill] sm:$0xff] }
 0x5c0   : > { %v8654_v51 = vsel %vm2492_vm2, %v9667_v25, %v9665_v62  ;;  %v9668_v11 = vmov %v9667_v25  ;;  %v9669_v9 = vmov %v9665_v62  ;;  %v3581_v54 = vadd.f32 %v3549_v18, %v3513_v47  ;;  %v9675_v35 = vld [vmem:[#allocation181_spill] sm:$0xff] }
 0x5c1   : > { %v2523_v63 = vsel %vm2492_vm2, %v9669_v9, %v9668_v11  ;;  %v2694_v58 = vmul.f32 %v7294_v19, %v8572_v31  ;;  %v3612_v8 = vadd.f32 %v3580_v50, %v3183_v40  ;;  %v2657_v13 = vadd.f32 %v9671_v61, %v2589_v36  ;;  %v5116_v11 = vld [vmem:[#allocation26] sm:$0xff]   ;;  %v5117_v31 = vld [vmem:[#allocation26 + $0x8] sm:$0xff]   ;;  %v9673_v9 = vld [vmem:[#allocation178_spill] sm:$0xff] }
 0x5c2   : > { %v2693_v38 = vmul.f32 %v7294_v19, %v8540_v26  ;;  %v3017_v49 = vmul.f32 %v7290_v55, %v8612_v59  ;;  %v3613_v62 = vadd.f32 %v3581_v54, %v3184_v41  ;;  %v3121_v47 = vmul.f32 %v7298_v56, %v8597_v45  ;;  %4819 = vmatprep.subr.bf16.mxu1 %v5116_v11 }
 0x5c3   : > { %v2726_v18 = vadd.f32 %v2694_v58, %v9672_v33  ;;  %v3122_v25 = vmul.f32 %v7298_v56, %v8623_v10  ;;  %v3676_v40 = vmul.f32 0.70710677, %v3612_v8  ;;  %v3446_v26 = vmul.f32 %v7300_v44, %v8669_v30  ;;  %v5233_v5 = vpop.eup %5232  ;;  %v9674_v58 = vld [vmem:[#allocation193_spill] sm:$0xff]  ;;  %4820 = vmatpush3.bf16.msra.mxu1 %v5116_v11 }
 0x5c4   : > { %v2725_v50 = vadd.f32 %v2693_v38, %v2657_v13  ;;  %v3085_v36 = vadd.f32 %v9673_v9, %v3017_v49  ;;  %v3677_v61 = vmul.f32 0.70710677, %v3613_v62  ;;  %v8688_v41 = vsel %vm2320_vm3, %v2523_v63, 0.0  ;;  %4821 = vmatprep.subr.bf16.mxu1 %v5117_v31  ;;  %v5118_v63 = vld [vmem:[#allocation26 + $0x10] sm:$0xff]  }
 0x5c5   : > { %v2758_v54 = vadd.f32 %v8345_v6, %v2726_v18  ;;  %v3154_v33 = vadd.f32 %v3122_v25, %v9674_v58  ;;  %v5235_v34 = vpop.eup %5234  ;;  %v3738_v0 = vadd.f32 1.0, %v5233_v5  ;;  %5236 = verf.f32 %v3676_v40  ;;  %v9676_v25 = vld [vmem:[#allocation174_spill] sm:$0xff] }
 0x5c6   : > { %v2757_v13 = vadd.f32 %v8345_v6, %v2725_v50  ;;  %v3153_v38 = vadd.f32 %v3121_v47, %v3085_v36  ;;  %v3739_v49 = vadd.f32 1.0, %v5235_v34  ;;  %5238 = verf.f32 %v3677_v61  ;;  %v9677_v47 = vld [vmem:[#allocation183_spill] sm:$0xff]  ;;  %v9679_v50 = vld [vmem:[#allocation184_spill] sm:$0xff] }
 0x5c7   : > { %v3186_v9 = vadd.f32 %v3154_v33, %v2758_v54  ;;  %v3447_v2 = vmul.f32 %v7300_v44, %v9675_v35  ;;  %v8695_v24 = vmul.f32 %v3738_v0, %v3642_v32  ;;  %v3514_v58 = vadd.f32 %v9676_v25, %v3446_v26  ;;  %4822 = vmatpush3.bf16.msra.mxu1 %v5117_v31  ;;  %v9683_v25 = vld [vmem:[#allocation177_spill] sm:$0xff] }
 0x5c8   : > { %v3185_v18 = vadd.f32 %v3153_v38, %v2757_v13  ;;  %v3550_v40 = vmul.f32 %v8040_v23, %v8654_v51  ;;  %v8700_v5 = vmul.f32 %v3739_v49, %v3643_v43  ;;  %v3551_v34 = vmul.f32 %v8040_v23, %v8688_v41  ;;  %4823 = vmatprep.subr.bf16.mxu1 %v5118_v63  ;;  %v5119_v38 = vld [vmem:[#allocation26 + $0x18] sm:$0xff]  }
 0x5c9   : > { %v3515_v11 = vadd.f32 %v9677_v47, %v3447_v2  ;;  %v8708_v35 = vsel %vm2317_vm1, %v8017_v16, 0.0  ;;  %v9678_v32 = vrot.slane %v7969_v4, 1  ;;  %v9680_v36 = vrot.slane %v9679_v50, 1 }
 0x5ca   : > { %v3582_v0 = vadd.f32 %v3550_v40, %v3514_v58  ;;  %v2591_v16 = vmul.f32 %v7288_v57, %v8612_v59  ;;  %v3792_v61 = vpack.c.bf16 %v8700_v5, %v8695_v24  ;;  %v3644_v54 = vmul.f32 0.5, %v3612_v8  ;;  %v8915_v24 = vld [vmem:[#allocation12 + $0x1] ss:$0 sm:$0xff] }
 0x5cb   : > { %v8716_v26 = vsel %vm2492_vm2, %v9680_v36, %v9678_v32  ;;  %v9681_v43 = vmov %v9680_v36  ;;  %v9682_v2 = vmov %v9678_v32  ;;  %v3583_v33 = vadd.f32 %v3551_v34, %v3515_v11  ;;  %v9684_v34 = vld [vmem:[#allocation192_spill] sm:$0xff]  ;;  %4824 = vmatpush3.bf16.msra.mxu1 %v5118_v63  ;;  %v9685_v32 = vld [vmem:[#allocation173_spill] sm:$0xff] }
 0x5cc   : > { %v2524_v23 = vsel %vm2492_vm2, %v9682_v2, %v9681_v43  ;;  %v2695_v13 = vmul.f32 %v7294_v19, %v8597_v45  ;;  %v3614_v49 = vadd.f32 %v3582_v0, %v3185_v18  ;;  %v2659_v4 = vadd.f32 %v9683_v25, %v2591_v16  ;;  %4825 = vmatprep.subr.bf16.mxu1 %v5119_v38  ;;  %v5120_v2 = vld [vmem:[#allocation26 + $0x20] sm:$0xff]  }
 0x5cd   : > { %v2696_v58 = vmul.f32 %v7294_v19, %v8623_v10  ;;  %v3019_v59 = vmul.f32 %v7290_v55, %v8669_v30  ;;  %v3645_v31 = vmul.f32 0.5, %v3613_v62  ;;  %v3615_v40 = vadd.f32 %v3583_v33, %v3186_v9  ;;  %v9686_v9 = vld [vmem:[#allocation186_spill] sm:$0xff] }
 0x5ce   : > { %v3124_v8 = vmul.f32 %v7298_v56, %v8688_v41  ;;  %v3448_v47 = vmul.f32 %v7300_v44, %v8708_v35  ;;  %v3678_v45 = vmul.f32 0.70710677, %v3614_v49  ;;  %v8741_v18 = vsel %vm2320_vm3, %v2524_v23, 0.0 }
 0x5cf   : > { %v2727_v11 = vadd.f32 %v2695_v13, %v2659_v4  ;;  %v2728_v0 = vadd.f32 %v2696_v58, %v9684_v34  ;;  %v3679_v10 = vmul.f32 0.70710677, %v3615_v40  ;;  %v3087_v50 = vadd.f32 %v9685_v32, %v3019_v59  ;;  %v5237_v43 = vpop.eup %5236  ;;  %v9687_v4 = vld [vmem:[#allocation196_spill] sm:$0xff]  ;;  %v8754_v32 = vld [vmem:[#allocation23 + $0x8] ss:$0 sm:$0xff]  ;;  %4826 = vmatpush3.bf16.msra.mxu1 %v5119_v38 }
 0x5d0   : > { %v3123_v62 = vmul.f32 %v7298_v56, %v8654_v51  ;;  %v3156_v36 = vadd.f32 %v3124_v8, %v9686_v9  ;;  %5240 = verf.f32 %v3678_v45  ;;  %v3449_v33 = vmul.f32 %v7300_v44, %v8013_v21  ;;  %v5239_v63 = vpop.eup %5238  ;;  %4827 = vmatprep.subr.bf16.mxu1 %v5120_v2  ;;  %v9688_v9 = vld [vmem:[#allocation172_spill] sm:$0xff] }
 0x5d1   : > { %v2759_v16 = vadd.f32 %v8345_v6, %v2727_v11  ;;  %v2760_v23 = vadd.f32 %v8345_v6, %v2728_v0  ;;  %v3740_v13 = vadd.f32 1.0, %v5237_v43  ;;  %5242 = verf.f32 %v3679_v10 }
 0x5d2   : > { %v3155_v25 = vadd.f32 %v3123_v62, %v3087_v50  ;;  %v3516_v58 = vadd.f32 %v9687_v4, %v3448_v47  ;;  %v3741_v59 = vadd.f32 1.0, %v5239_v63  ;;  %v3517_v8 = vadd.f32 %v8118_v37, %v3449_v33  ;;  %v5121_v47 = vld [vmem:[#allocation26 + $0x28] sm:$0xff]   ;;  %v9691_v4 = vld [vmem:[#allocation191_spill] sm:$0xff] }
 0x5d3   : > { %v3188_v34 = vadd.f32 %v3156_v36, %v2760_v23  ;;  %v3552_v45 = vmul.f32 %v8754_v32, %v8716_v26  ;;  %v8758_v11 = vmul.f32 %v3740_v13, %v3644_v54  ;;  %v3553_v21 = vmul.f32 %v8754_v32, %v8741_v18  ;;  %v9689_v23 = vld [vmem:[#allocation185_spill] sm:$0xff]  ;;  %4828 = vmatpush3.bf16.msra.mxu1 %v5120_v2  ;;  %v9690_v13 = vld [vmem:[#allocation195_spill] sm:$0xff] }
 0x5d4   : > { %v3187_v0 = vadd.f32 %v3155_v25, %v2759_v16  ;;  %v2593_v10 = vmul.f32 %v7288_v57, %v8669_v30  ;;  %v8764_v50 = vmul.f32 %v3741_v59, %v3645_v31  ;;  %v2697_v62 = vmul.f32 %v7294_v19, %v8654_v51  ;;  %4829 = vmatprep.subr.bf16.mxu1 %v5121_v47 }
 0x5d5   : > { %v3584_v37 = vadd.f32 %v3552_v45, %v3516_v58  ;;  %v2698_v38 = vmul.f32 %v7294_v19, %v8688_v41  ;;  %v3585_v54 = vadd.f32 %v3553_v21, %v3517_v8  ;;  %v3021_v43 = vmul.f32 %v7290_v55, %v8708_v35  ;;  %v5122_v58 = vld [vmem:[#allocation26 + $0x30] sm:$0xff]  }
 0x5d6   : > { %v2661_v36 = vadd.f32 %v9688_v9, %v2593_v10  ;;  %v3125_v30 = vmul.f32 %v7298_v56, %v8716_v26  ;;  %v3793_v31 = vpack.c.bf16 %v8764_v50, %v8758_v11  ;;  %v3126_v51 = vmul.f32 %v7298_v56, %v8741_v18 }
 0x5d7   : > { %v3616_v16 = vadd.f32 %v3584_v37, %v3187_v0  ;;  %v2730_v33 = vadd.f32 %v2698_v38, %v9689_v23  ;;  %v3617_v41 = vadd.f32 %v3585_v54, %v3188_v34  ;;  %v3089_v25 = vadd.f32 %v9690_v13, %v3021_v43  ;;  %4830 = vmatpush3.bf16.msra.mxu1 %v5121_v47  ;;  %v9695_v13 = vld [vmem:[#allocation190_spill] sm:$0xff] }
 0x5d8   : > { %v2729_v63 = vadd.f32 %v2697_v62, %v2661_v36  ;;  %v3518_v55 = vadd.f32 %v9691_v4, %v7999_v14  ;;  %v3646_v59 = vmul.f32 0.5, %v3614_v49  ;;  %v3158_v0 = vadd.f32 %v3126_v51, %v8035_v17  ;;  %v9692_v14 = vld [vmem:[#allocation197_spill] sm:$0xff]  ;;  %4831 = vmatprep.subr.bf16.mxu1 %v5122_v58 }
 0x5d9   : > { %v3680_v8 = vmul.f32 0.70710677, %v3616_v16  ;;  %v2762_v45 = vadd.f32 %v8345_v6, %v2730_v33  ;;  %v3647_v21 = vmul.f32 0.5, %v3615_v40  ;;  %v3681_v10 = vmul.f32 0.70710677, %v3617_v41  ;;  %v5123_v40 = vld [vmem:[#allocation26 + $0x38] sm:$0xff]  }
 0x5da   : > { %v2761_v56 = vadd.f32 %v8345_v6, %v2729_v63  ;;  %v3157_v2 = vadd.f32 %v3125_v30, %v3089_v25  ;;  %v5241_v34 = vpop.eup %5240  ;;  %v3554_v62 = vmul.f32 %v8754_v32, %v7977_v7  ;;  %v3555_v38 = vmul.f32 %v8754_v32, %v9692_v14  ;;  %v9693_v33 = vld [vmem:[#allocation194_spill] sm:$0xff]  ;;  %v9694_v63 = vld [vmem:[#allocation199_spill] sm:$0xff] }
 0x5db   : > { %5244 = verf.f32 %v3680_v8  ;;  %v3190_v37 = vadd.f32 %v3158_v0, %v2762_v45  ;;  %v5243_v49 = vpop.eup %5242  ;;  %v3742_v54 = vadd.f32 1.0, %v5241_v34  ;;  %v2595_v17 = vmul.f32 %v7288_v57, %v8708_v35  ;;  %4832 = vmatpush3.bf16.msra.mxu1 %v5122_v58  ;;  %v9696_v45 = vld [vmem:[#allocation198_spill] sm:$0xff]  ;;  %v9697_v58 = vld [vmem:[#allocation200_spill] sm:$0xff] }
 0x5dc   : > { %5246 = verf.f32 %v3681_v10  ;;  %v3189_v9 = vadd.f32 %v3157_v2, %v2761_v56  ;;  %v3743_v36 = vadd.f32 1.0, %v5243_v49  ;;  %v3586_v43 = vadd.f32 %v3554_v62, %v3518_v55  ;;  %4833 = vmatprep.subr.bf16.mxu1 %v5123_v40 }
 0x5dd   : > { %v3587_v30 = vadd.f32 %v3555_v38, %v8002_v39  ;;  %v2699_v7 = vmul.f32 %v7294_v19, %v8716_v26  ;;  %v8795_v23 = vmul.f32 %v3742_v54, %v3646_v59  ;;  %v2663_v51 = vadd.f32 %v9693_v33, %v2595_v17 }
 0x5de   : > { %v2700_v47 = vmul.f32 %v7294_v19, %v8741_v18  ;;  %v3091_v25 = vadd.f32 %v9695_v13, %v9694_v63  ;;  %v8802_v35 = vmul.f32 %v3743_v36, %v3647_v21  ;;  %v3618_v4 = vadd.f32 %v3586_v43, %v3189_v9 }
 0x5df   : > { %v3619_v8 = vadd.f32 %v3587_v30, %v3190_v37  ;;  %v2731_v55 = vadd.f32 %v2699_v7, %v2663_v51  ;;  %4834 = vmatpush3.bf16.msra.mxu1 %v5123_v40  ;;  %v3648_v37 = vmul.f32 0.5, %v3616_v16  ;;  %v3649_v14 = vmul.f32 0.5, %v3617_v41 }
 0x5e0   : > { %v2732_v39 = vadd.f32 %v2700_v47, %v8033_v48  ;;  %v3159_v26 = vadd.f32 %v9696_v45, %v3091_v25  ;;  %v3794_v59 = vpack.c.bf16 %v8802_v35, %v8795_v23  ;;  %v3682_v0 = vmul.f32 0.70710677, %v3618_v4  ;;  %v5314_v47 = vld [vmem:[#allocation21] ss:$0 sm:$0xff] }
 0x5e1   : > { %v3683_v10 = vmul.f32 0.70710677, %v3619_v8  ;;  %v2763_v18 = vadd.f32 %v8345_v6, %v2731_v55  ;;  %v3650_v36 = vmul.f32 0.5, %v3618_v4  ;;  %v3651_v30 = vmul.f32 0.5, %v3619_v8 }
 0x5e2   : > { %v2764_v56 = vadd.f32 %v8345_v6, %v2732_v39  ;;  %5248 = verf.f32 %v3682_v0 }
 0x5e3   : > { %5250 = verf.f32 %v3683_v10  ;;  %v8810_v21 = vadd.f32 %v3159_v26, %v2763_v18 }
 0x5e4   : > { %v8813_v2 = vadd.f32 %v9697_v58, %v2764_v56 }
 0x5e5   : > { %v5245_v48 = vpop.eup %5244 }
 0x5e6   : > { %v5247_v34 = vpop.eup %5246  ;;  %v3744_v62 = vadd.f32 1.0, %v5245_v48 }
 0x5e7   : > { %v3745_v38 = vadd.f32 1.0, %v5247_v34 }
 0x5e8   : > { %v8815_v49 = vmul.f32 %v3744_v62, %v3648_v37 }
 0x5e9   : > { %v8817_v54 = vmul.f32 %v3745_v38, %v3649_v14  ;;  %v9698_v14 = vld [vmem:[#allocation80_spill] sm:$0xff] }
 0x5eb   : > { %v3795_v9 = vpack.c.bf16 %v8817_v54, %v8815_v49 }
 0x5ec   : > { %v5249_v17 = vpop.eup %5248 }
 0x5ed   : > { %v5251_v40 = vpop.eup %5250  ;;  %v3746_v43 = vadd.f32 1.0, %v5249_v17 }
 0x5ee   : > { %v3747_v7 = vadd.f32 1.0, %v5251_v40 }
 0x5ef   : > { %v8821_v33 = vmul.f32 %v3746_v43, %v3650_v36 }
 0x5f0   : > { %v8823_v51 = vmul.f32 %v3747_v7, %v3651_v30 }
 0x5f2   : > { %v3796_v16 = vpack.c.bf16 %v8823_v51, %v8821_v33 }
 0x628   : > { %v4817_v41 = vpop.f32.mrb[80].mxu0 }
 0x629   : > { %v2297_v63 = vadd.f32 %v5314_v47, %v4817_v41  ;;  %v2288_v13 = vpop.f32.mrb[81].mxu0 }
 0x62a   : > { %v2289_v25 = vadd.f32 %v5314_v47, %v2288_v13  ;;  %v4818_v55 = vpop.f32.mrb[82].mxu0 }
 0x62b   : > { %v2309_v39 = vmul.f32 0.0, %v2297_v63  ;;  %v2300_v45 = vadd.f32 %v5314_v47, %v4818_v55  ;;  %v2291_v26 = vpop.f32.mrb[83].mxu0 }
 0x62c   : > { %v2304_v4 = vmul.f32 0.0, %v2289_v25  ;;  %v2292_v0 = vadd.f32 %v5314_v47, %v2291_v26 }
 0x62d   : > { %v2310_v8 = vmul.f32 0.0, %v2300_v45  ;;  %v3241_v10 = vrot.slane %v2309_v39, 7  ;;  %v3337_v18 = vrot.slane %v2309_v39, 1  ;;  %v3488_v58 = vmul.f32 %v7284_v28, %v2309_v39 }
 0x62e   : > { %v2305_v56 = vmul.f32 0.0, %v2292_v0  ;;  %v2359_v48 = vrot.slane %v2304_v4, 7  ;;  %v2460_v62 = vrot.slane %v2304_v4, 1  ;;  %v2601_v38 = vmul.f32 %v9698_v14, %v2304_v4 }
 0x62f   : > { %v3257_v34 = vrot.slane %v2310_v8, 7  ;;  %v3353_v37 = vrot.slane %v2310_v8, 1  ;;  %v3489_v13 = vmul.f32 %v7284_v28, %v2310_v8 }
 0x630   : > { %v2375_v17 = vrot.slane %v2305_v56, 7  ;;  %v2476_v40 = vrot.slane %v2305_v56, 1 }
 0x631   : > { %v3273_v36 = vsel %vm2391_vm0, %v3241_v10, %v3257_v34  ;;  %v3289_v43 = vsel %vm2391_vm0, %v3257_v34, %v3241_v10  ;;  %v3369_v30 = vsel %vm2492_vm2, %v3337_v18, %v3353_v37  ;;  %v3385_v7 = vsel %vm2492_vm2, %v3353_v37, %v3337_v18 }
 0x632   : > { %v3320_v41 = vsel %vm2317_vm1, %v3289_v43, 0.0  ;;  %v3417_v47 = vsel %vm2320_vm3, %v3385_v7, 0.0  ;;  %v3453_v63 = vmul.f32 %v7300_v44, %v3273_v36  ;;  %v2392_v39 = vsel %vm2391_vm0, %v2359_v48, %v2375_v17 }
 0x633   : > { %v3452_v25 = vmul.f32 %v7300_v44, %v3320_v41  ;;  %v3557_v55 = vmul.f32 %v8754_v32, %v3417_v47  ;;  %v2408_v45 = vsel %vm2391_vm0, %v2375_v17, %v2359_v48  ;;  %v2493_v0 = vsel %vm2492_vm2, %v2460_v62, %v2476_v40 }
 0x634   : > { %v3521_v26 = vadd.f32 %v3489_v13, %v3453_v63  ;;  %v2428_v4 = vsel %vm2317_vm1, %v2408_v45, 0.0  ;;  %v2509_v28 = vsel %vm2492_vm2, %v2476_v40, %v2460_v62  ;;  %v2566_v10 = vmul.f32 %v7288_v57, %v2392_v39 }
 0x635   : > { %v2530_v44 = vsel %vm2320_vm3, %v2509_v28, 0.0  ;;  %v2565_v8 = vmul.f32 %v7288_v57, %v2428_v4  ;;  %v2602_v18 = vmul.f32 %v9698_v14, %v2305_v56  ;;  %v3556_v48 = vmul.f32 %v8754_v32, %v3369_v30 }
 0x636   : > { %v3589_v34 = vadd.f32 %v3557_v55, %v3521_v26  ;;  %v2670_v37 = vmul.f32 %v7294_v19, %v2530_v44  ;;  %v3520_v17 = vadd.f32 %v3488_v58, %v3452_v25  ;;  %v2669_v46 = vmul.f32 %v7294_v19, %v2493_v0 }
 0x637   : > { %v2633_v36 = vadd.f32 %v2601_v38, %v2565_v8  ;;  %v2634_v43 = vadd.f32 %v2602_v18, %v2566_v10  ;;  %v9699_v38 = vld [vmem:[#allocation83_spill] sm:$0xff] }
 0x638   : > { %v3588_v62 = vadd.f32 %v3556_v48, %v3520_v17  ;;  %v3621_v3 = vadd.f32 %v3589_v34, %v8813_v2  ;;  %v9700_v48 = vpack.c.bf16 %v8204_v27, %v8200_v1  ;;  %v9701_v34 = vpack.c.bf16 %v8245_v15, %v8243_v29  ;;  %v9703_v17 = vld [vmem:[#allocation87_spill] sm:$0xff]  ;;  %v9713_v15 = vld [vmem:[#allocation86_spill] sm:$0xff] }
 0x639   : > { %v2701_v40 = vadd.f32 %v2669_v46, %v2633_v36  ;;  %v2702_v7 = vadd.f32 %v2670_v37, %v2634_v43  ;;  %v9702_v37 = vpack.c.bf16 %v8301_v42, %v8294_v53  ;;  %v9704_v36 = vpack.c.bf16 %v8357_v22, %v9703_v17  ;;  %v9705_v43 = vld [vmem:[#allocation88_spill] sm:$0xff]  ;;  %v9706_v46 = vld [vmem:[#allocation93_spill] sm:$0xff]  ;;  %v9710_v27 = vld [vmem:[#allocation95_spill] sm:$0xff] }
 0x63a   : > { %v3620_v41 = vadd.f32 %v3588_v62, %v8810_v21  ;;  %v3685_v57 = vmul.f32 0.70710677, %v3621_v3  ;;  %v3653_v13 = vmul.f32 0.5, %v3621_v3  ;;  %v9707_v62 = vpack.c.bf16 %v9705_v43, %v9706_v46  ;;  %v9708_v3 = vld [vmem:[#allocation84_spill] sm:$0xff]  ;;  %v9716_v42 = vld [vmem:[#allocation82_spill] sm:$0xff] }
 0x63b   : > { %v2734_v56 = vadd.f32 %v8345_v6, %v2702_v7  ;;  %v2733_v32 = vadd.f32 %v8345_v6, %v2701_v40  ;;  %v9709_v1 = vpack.c.bf16 %v8483_v60, %v9708_v3  ;;  %v9711_v40 = vld [vmem:[#allocation89_spill] sm:$0xff]  ;;  %v8913_v60 = vld [vmem:[#allocation27] ss:$0 sm:$0xff] }
 0x63c   : > { %v3684_v14 = vmul.f32 0.70710677, %v3620_v41  ;;  %5252 = verf.f32 %v3685_v57  ;;  %v3652_v6 = vmul.f32 0.5, %v3620_v41  ;;  %v9712_v29 = vpack.c.bf16 %v9710_v27, %v9711_v40  ;;  %v9714_v7 = vld [vmem:[#allocation109_spill] sm:$0xff]  ;;  %v9717_v41 = vld [vmem:[#allocation92_spill] sm:$0xff]  ;;  %v9728_v27 = vld [vmem:[#allocation70_spill] sm:$0xff] }
 0x63d   : > { %v3161_v58 = vadd.f32 %v8051_v52, %v2733_v32  ;;  %v3162_v30 = vadd.f32 %v9699_v38, %v2734_v56  ;;  %v9715_v53 = vpack.c.bf16 %v9713_v15, %v9714_v7  ;;  %v9718_v22 = vpack.c.bf16 %v9716_v42, %v9717_v41  ;;  %v9721_v32 = vld [vmem:[#allocation63_spill] sm:$0xff] }
 0x63e   : > { %5254 = verf.f32 %v3684_v14  ;;  %v9729_v15 = vld [vmem:[#allocation71_spill] sm:$0xff] }
 0x63f   : > { %v3590_v19 = vadd.f32 %v8066_v12, %v3161_v58  ;;  %v3591_v2 = vadd.f32 %v8071_v20, %v3162_v30  ;;  %v9722_v58 = vld [vmem:[#allocation64_spill] sm:$0xff] }
 0x641   : > { %v3654_v47 = vmul.f32 0.70710677, %v3590_v19  ;;  %v3655_v63 = vmul.f32 0.70710677, %v3591_v2  ;;  %v3622_v28 = vmul.f32 0.5, %v3590_v19  ;;  %v3623_v12 = vmul.f32 0.5, %v3591_v2 }
 0x643   : > { %5256 = verf.f32 %v3654_v47 }
 0x644   : > { %5258 = verf.f32 %v3655_v63 }
 0x646   : > { %v5253_v21 = vpop.eup %5252 }
 0x647   : > { %v3749_v25 = vadd.f32 1.0, %v5253_v21 }
 0x648   : > { %v5255_v55 = vpop.eup %5254 }
 0x649   : > { %v3748_v39 = vadd.f32 1.0, %v5255_v55  ;;  %v3781_v45 = vmul.f32 %v3749_v25, %v3653_v13 }
 0x64b   : > { %v3780_v26 = vmul.f32 %v3748_v39, %v3652_v6  ;;  %v9723_v39 = vld [vmem:[#allocation65_spill] sm:$0xff] }
 0x64d   : > { %v5257_v52 = vpop.eup %5256  ;;  %v3797_v4 = vpack.c.bf16 %v3781_v45, %v3780_v26 }
 0x64e   : > { %v5259_v0 = vpop.eup %5258  ;;  %v3718_v44 = vadd.f32 1.0, %v5257_v52  ;;  %v9724_v52 = vld [vmem:[#allocation66_spill] sm:$0xff] }
 0x64f   : > { %v3719_v8 = vadd.f32 1.0, %v5259_v0 }
 0x650   : > { %v3750_v20 = vmul.f32 %v3718_v44, %v3622_v28  ;;  %v9725_v28 = vld [vmem:[#allocation67_spill] sm:$0xff] }
 0x651   : > { %v3751_v10 = vmul.f32 %v3719_v8, %v3623_v12  ;;  %v9726_v12 = vld [vmem:[#allocation68_spill] sm:$0xff] }
 0x653   : > { %v3782_v18 = vpack.c.bf16 %v3751_v10, %v3750_v20 }
 0x655   : > { %4835 = vmatprep.mubr.bf16.mxu1 %v3782_v18 }
 0x656   : > { %4836 = vmatmul.mubr.bf16.vlgmr.msra.gmra.mrb[24].mxu1 %v9700_v48 }
 0x657   : > { %4839 = vmatprep.mubr.bf16.mxu1 %v9701_v34 }
 0x65e   : > { %4840 = vmatmul.mubr.bf16.gmra.mrb[28].mxu1 %v9702_v37 }
 0x65f   : > { %4843 = vmatprep.mubr.bf16.mxu1 %v9704_v36 }
 0x666   : > { %4844 = vmatmul.mubr.bf16.gmra.mrb[32].mxu1 %v9707_v62  ;;  %v9727_v62 = vld [vmem:[#allocation69_spill] sm:$0xff] }
 0x667   : > { %4847 = vmatprep.mubr.bf16.mxu1 %v9709_v1 }
 0x66e   : > { %4848 = vmatmul.mubr.bf16.gmra.mrb[36].mxu1 %v9712_v29 }
 0x66f   : > { %4851 = vmatprep.mubr.bf16.mxu1 %v9715_v53  ;;  %v9730_v53 = vld [vmem:[#allocation72_spill] sm:$0xff] }
 0x676   : > { %4852 = vmatmul.mubr.bf16.gmra.mrb[40].mxu1 %v9718_v22 }
 0x677   : > { %4855 = vmatprep.mubr.bf16.mxu1 %v3792_v61 }
 0x67e   : > { %4856 = vmatmul.mubr.bf16.gmra.mrb[44].mxu1 %v3793_v31 }
 0x67f   : > { %4859 = vmatprep.mubr.bf16.mxu1 %v3794_v59 }
 0x686   : > { %4860 = vmatmul.mubr.bf16.gmra.mrb[48].mxu1 %v3795_v9  ;;  %v9719_v9 = vld [vmem:[#allocation61_spill] sm:$0xff] }
 0x687   : > { %4863 = vmatprep.mubr.bf16.mxu1 %v3796_v16  ;;  %v9720_v16 = vld [vmem:[#allocation62_spill] sm:$0xff] }
 0x68e   : > { %4864 = vmatmul.mubr.bf16.gmra.mrb[52].mxu1 %v3797_v4 }
 0x729   : > { %v4837_v5 = vpop.f32.mrb[24].mxu1 }
 0x72a   : > { %v3895_v61 = vadd.f32 %v4837_v5, %v8913_v60  ;;  %v3886_v11 = vpop.f32.mrb[25].mxu1 }
 0x72b   : > { %v3887_v50 = vadd.f32 %v8913_v60, %v3886_v11  ;;  %v4838_v31 = vpop.f32.mrb[26].mxu1 }
 0x72c   : > { %v4019_v23 = vmul.f32 %v8915_v24, %v3895_v61  ;;  %v3898_v35 = vadd.f32 %v4838_v31, %v8913_v60  ;;  %v3889_v59 = vpop.f32.mrb[27].mxu1 }
 0x72d   : > { %v4017_v49 = vmul.f32 %v8915_v24, %v3887_v50  ;;  %v3890_v54 = vadd.f32 %v8913_v60, %v3889_v59 }
 0x72e   : > { %v4051_v33 = vadd.f32 %v4019_v23, %v9719_v9  ;;  %v4020_v51 = vmul.f32 %v8915_v24, %v3898_v35 }
 0x72f   : > { %v4049_v57 = vadd.f32 %v4017_v49, %v9720_v16  ;;  %v4018_v56 = vmul.f32 %v8915_v24, %v3890_v54  ;;  %v9731_v49 = vld [vmem:[#allocation73_spill] sm:$0xff] }
 0x730   : > { %4083 = vst [vmem:[%s8929_s27 + $0x10] sm:$0xff] %v4051_v33  ;;  %v4052_v14 = vadd.f32 %v4020_v51, %v9721_v32  ;;  %v9732_v33 = vld [vmem:[#allocation74_spill] sm:$0xff]  ;;  %v9734_v32 = vld [vmem:[#allocation76_spill] sm:$0xff] }
 0x731   : > { %4081 = vst [vmem:[%s8929_s27] sm:$0xff] %v4049_v57  ;;  %v4050_v38 = vadd.f32 %v4018_v56, %v9722_v58  ;;  %v4841_v30 = vpop.f32.mrb[28].mxu1  ;;  %v9733_v57 = vld [vmem:[#allocation75_spill] sm:$0xff] }
 0x732   : > { %4084 = vst [vmem:[%s8929_s27 + $0x18] sm:$0xff] %v4052_v14  ;;  %v3911_v19 = vadd.f32 %v4841_v30, %v8913_v60  ;;  %v3902_v2 = vpop.f32.mrb[29].mxu1 }
 0x733   : > { %4082 = vst [vmem:[%s8929_s27 + $0x8] sm:$0xff] %v4050_v38  ;;  %v3903_v47 = vadd.f32 %v8913_v60, %v3902_v2  ;;  %v4842_v63 = vpop.f32.mrb[30].mxu1 }
 0x734   : > { %v4023_v21 = vmul.f32 %v8915_v24, %v3911_v19  ;;  %v3914_v13 = vadd.f32 %v4842_v63, %v8913_v60  ;;  %v3905_v25 = vpop.f32.mrb[31].mxu1 }
 0x735   : > { %v4021_v55 = vmul.f32 %v8915_v24, %v3903_v47  ;;  %v3906_v6 = vadd.f32 %v8913_v60, %v3905_v25 }
 0x736   : > { %v4055_v45 = vadd.f32 %v4023_v21, %v9723_v39  ;;  %v4024_v26 = vmul.f32 %v8915_v24, %v3914_v13 }
 0x737   : > { %v4053_v4 = vadd.f32 %v4021_v55, %v9724_v52  ;;  %v4022_v0 = vmul.f32 %v8915_v24, %v3906_v6  ;;  %v9735_v55 = vld [vmem:[#allocation48_spill] sm:$0xff] }
 0x738   : > { %4087 = vst [vmem:[%s8929_s27 + $0x30] sm:$0xff] %v4055_v45  ;;  %v4056_v44 = vadd.f32 %v4024_v26, %v9725_v28  ;;  %v9736_v45 = vld [vmem:[#allocation77_spill] sm:$0xff]  ;;  %v9738_v28 = vld [vmem:[#allocation79_spill] sm:$0xff] }
 0x739   : > { %4085 = vst [vmem:[%s8929_s27 + $0x20] sm:$0xff] %v4053_v4  ;;  %v4054_v8 = vadd.f32 %v4022_v0, %v9726_v12  ;;  %v4845_v20 = vpop.f32.mrb[32].mxu1  ;;  %v9737_v4 = vld [vmem:[#allocation78_spill] sm:$0xff] }
 0x73a   : > { %4088 = vst [vmem:[%s8929_s27 + $0x38] sm:$0xff] %v4056_v44  ;;  %v3927_v10 = vadd.f32 %v4845_v20, %v8913_v60  ;;  %v3918_v18 = vpop.f32.mrb[33].mxu1 }
 0x73b   : > { %4086 = vst [vmem:[%s8929_s27 + $0x28] sm:$0xff] %v4054_v8  ;;  %v3919_v48 = vadd.f32 %v8913_v60, %v3918_v18  ;;  %v4846_v34 = vpop.f32.mrb[34].mxu1 }
 0x73c   : > { %v4027_v37 = vmul.f32 %v8915_v24, %v3927_v10  ;;  %v3930_v17 = vadd.f32 %v4846_v34, %v8913_v60  ;;  %v3921_v36 = vpop.f32.mrb[35].mxu1 }
 0x73d   : > { %v4025_v43 = vmul.f32 %v8915_v24, %v3919_v48  ;;  %v3922_v46 = vadd.f32 %v8913_v60, %v3921_v36 }
 0x73e   : > { %v4059_v3 = vadd.f32 %v4027_v37, %v9727_v62  ;;  %v4028_v1 = vmul.f32 %v8915_v24, %v3930_v17 }
 0x73f   : > { %v4057_v40 = vadd.f32 %v4025_v43, %v9728_v27  ;;  %v4026_v29 = vmul.f32 %v8915_v24, %v3922_v46  ;;  %v9739_v43 = vld [vmem:[#allocation51_spill] sm:$0xff] }
 0x740   : > { %4091 = vst [vmem:[%s8929_s27 + $0x50] sm:$0xff] %v4059_v3  ;;  %v4060_v7 = vadd.f32 %v4028_v1, %v9729_v15  ;;  %v9740_v3 = vld [vmem:[#allocation49_spill] sm:$0xff]  ;;  %v9742_v15 = vld [vmem:[#allocation50_spill] sm:$0xff] }
 0x741   : > { %4089 = vst [vmem:[%s8929_s27 + $0x40] sm:$0xff] %v4057_v40  ;;  %v4058_v42 = vadd.f32 %v4026_v29, %v9730_v53  ;;  %v4849_v41 = vpop.f32.mrb[36].mxu1  ;;  %v9741_v40 = vld [vmem:[#allocation52_spill] sm:$0xff] }
 0x742   : > { %4092 = vst [vmem:[%s8929_s27 + $0x58] sm:$0xff] %v4060_v7  ;;  %v3943_v22 = vadd.f32 %v4849_v41, %v8913_v60  ;;  %v3934_v5 = vpop.f32.mrb[37].mxu1 }
 0x743   : > { %4090 = vst [vmem:[%s8929_s27 + $0x48] sm:$0xff] %v4058_v42  ;;  %v3935_v61 = vadd.f32 %v8913_v60, %v3934_v5  ;;  %v4850_v11 = vpop.f32.mrb[38].mxu1 }
 0x744   : > { %v4031_v50 = vmul.f32 %v8915_v24, %v3943_v22  ;;  %v3946_v31 = vadd.f32 %v4850_v11, %v8913_v60  ;;  %v3937_v23 = vpop.f32.mrb[39].mxu1 }
 0x745   : > { %v4029_v35 = vmul.f32 %v8915_v24, %v3935_v61  ;;  %v3938_v59 = vadd.f32 %v8913_v60, %v3937_v23 }
 0x746   : > { %v4063_v54 = vadd.f32 %v4031_v50, %v9731_v49  ;;  %v4032_v9 = vmul.f32 %v8915_v24, %v3946_v31 }
 0x747   : > { %v4061_v51 = vadd.f32 %v4029_v35, %v9732_v33  ;;  %v4030_v16 = vmul.f32 %v8915_v24, %v3938_v59  ;;  %v9743_v35 = vld [vmem:[#allocation55_spill] sm:$0xff] }
 0x748   : > { %4095 = vst [vmem:[%s8929_s27 + $0x70] sm:$0xff] %v4063_v54  ;;  %v4064_v56 = vadd.f32 %v4032_v9, %v9733_v57  ;;  %v9744_v54 = vld [vmem:[#allocation53_spill] sm:$0xff]  ;;  %v9747_v57 = vld [vmem:[#allocation54_spill] sm:$0xff] }
 0x749   : > { %4093 = vst [vmem:[%s8929_s27 + $0x60] sm:$0xff] %v4061_v51  ;;  %v4062_v14 = vadd.f32 %v4030_v16, %v9734_v32  ;;  %v4853_v58 = vpop.f32.mrb[40].mxu1  ;;  %v9745_v51 = vld [vmem:[#allocation56_spill] sm:$0xff] }
 0x74a   : > { %4096 = vst [vmem:[%s8929_s27 + $0x78] sm:$0xff] %v4064_v56  ;;  %v3959_v38 = vadd.f32 %v4853_v58, %v8913_v60  ;;  %v3950_v30 = vpop.f32.mrb[41].mxu1 }
 0x74b   : > { %4094 = vst [vmem:[%s8929_s27 + $0x68] sm:$0xff] %v4062_v14  ;;  %v3951_v19 = vadd.f32 %v8913_v60, %v3950_v30  ;;  %v4854_v2 = vpop.f32.mrb[42].mxu1 }
 0x74c   : > { %v4035_v47 = vmul.f32 %v8915_v24, %v3959_v38  ;;  %v3962_v63 = vadd.f32 %v4854_v2, %v8913_v60  ;;  %v3953_v21 = vpop.f32.mrb[43].mxu1 }
 0x74d   : > { %v4033_v13 = vmul.f32 %v8915_v24, %v3951_v19  ;;  %v3954_v25 = vadd.f32 %v8913_v60, %v3953_v21 }
 0x74e   : > { %v4067_v6 = vadd.f32 %v4035_v47, %v9735_v55  ;;  %v4036_v39 = vmul.f32 %v8915_v24, %v3962_v63 }
 0x74f   : > { %v4065_v26 = vadd.f32 %v4033_v13, %v9736_v45  ;;  %v4034_v52 = vmul.f32 %v8915_v24, %v3954_v25  ;;  %v9748_v13 = vld [vmem:[#allocation59_spill] sm:$0xff] }
 0x750   : > { %4099 = vst [vmem:[%s8929_s27 + $0x90] sm:$0xff] %v4067_v6  ;;  %v4068_v0 = vadd.f32 %v4036_v39, %v9737_v4  ;;  %v9749_v6 = vld [vmem:[#allocation57_spill] sm:$0xff] }
 0x751   : > { %4097 = vst [vmem:[%s8929_s27 + $0x80] sm:$0xff] %v4065_v26  ;;  %v4066_v44 = vadd.f32 %v4034_v52, %v9738_v28  ;;  %v4857_v12 = vpop.f32.mrb[44].mxu1  ;;  %v9750_v26 = vld [vmem:[#allocation60_spill] sm:$0xff] }
 0x752   : > { %4100 = vst [vmem:[%s8929_s27 + $0x98] sm:$0xff] %v4068_v0  ;;  %v3975_v8 = vadd.f32 %v4857_v12, %v8913_v60  ;;  %v3966_v20 = vpop.f32.mrb[45].mxu1 }
 0x753   : > { %4098 = vst [vmem:[%s8929_s27 + $0x88] sm:$0xff] %v4066_v44  ;;  %v3967_v10 = vadd.f32 %v8913_v60, %v3966_v20  ;;  %v4858_v18 = vpop.f32.mrb[46].mxu1 }
 0x754   : > { %v4039_v48 = vmul.f32 %v8915_v24, %v3975_v8  ;;  %v3978_v34 = vadd.f32 %v4858_v18, %v8913_v60  ;;  %v3969_v37 = vpop.f32.mrb[47].mxu1 }
 0x755   : > { %v4037_v17 = vmul.f32 %v8915_v24, %v3967_v10  ;;  %v3970_v36 = vadd.f32 %v8913_v60, %v3969_v37 }
 0x756   : > { %v4071_v46 = vadd.f32 %v4039_v48, %v9739_v43  ;;  %v4040_v62 = vmul.f32 %v8915_v24, %v3978_v34 }
 0x757   : > { %v4069_v1 = vadd.f32 %v4037_v17, %v9740_v3  ;;  %v4038_v27 = vmul.f32 %v8915_v24, %v3970_v36 }
 0x758   : > { %4103 = vst [vmem:[%s8929_s27 + $0xb0] sm:$0xff] %v4071_v46  ;;  %v4072_v29 = vadd.f32 %v4040_v62, %v9741_v40 }
 0x759   : > { %4101 = vst [vmem:[%s8929_s27 + $0xa0] sm:$0xff] %v4069_v1  ;;  %v4070_v7 = vadd.f32 %v4038_v27, %v9742_v15  ;;  %v4861_v53 = vpop.f32.mrb[48].mxu1 }
 0x75a   : > { %4104 = vst [vmem:[%s8929_s27 + $0xb8] sm:$0xff] %v4072_v29  ;;  %v3991_v42 = vadd.f32 %v4861_v53, %v8913_v60  ;;  %v3982_v41 = vpop.f32.mrb[49].mxu1 }
 0x75b   : > { %4102 = vst [vmem:[%s8929_s27 + $0xa8] sm:$0xff] %v4070_v7  ;;  %v3983_v22 = vadd.f32 %v8913_v60, %v3982_v41  ;;  %v4862_v5 = vpop.f32.mrb[50].mxu1 }
 0x75c   : > { %v4043_v61 = vmul.f32 %v8915_v24, %v3991_v42  ;;  %v3994_v11 = vadd.f32 %v4862_v5, %v8913_v60  ;;  %v3985_v50 = vpop.f32.mrb[51].mxu1 }
 0x75d   : > { %v4041_v31 = vmul.f32 %v8915_v24, %v3983_v22  ;;  %v3986_v23 = vadd.f32 %v8913_v60, %v3985_v50 }
 0x75e   : > { %v4075_v59 = vadd.f32 %v4043_v61, %v9743_v35  ;;  %v4044_v49 = vmul.f32 %v8915_v24, %v3994_v11 }
 0x75f   : > { %v4073_v9 = vadd.f32 %v4041_v31, %v9744_v54  ;;  %v4042_v33 = vmul.f32 %v8915_v24, %v3986_v23 }
 0x760   : > { %4107 = vst [vmem:[%s8929_s27 + $0xd0] sm:$0xff] %v4075_v59  ;;  %v4076_v16 = vadd.f32 %v4044_v49, %v9745_v51 }
 0x761   : > { %4105 = vst [vmem:[%s8929_s27 + $0xc0] sm:$0xff] %v4073_v9  ;;  %v4074_v56 = vadd.f32 %v4042_v33, %v9747_v57  ;;  %v4865_v32 = vpop.f32.mrb[52].mxu1 }
 0x762   : > { %4108 = vst [vmem:[%s8929_s27 + $0xd8] sm:$0xff] %v4076_v16  ;;  %v4007_v14 = vadd.f32 %v4865_v32, %v8913_v60  ;;  %v3998_v58 = vpop.f32.mrb[53].mxu1 }
 0x763   : > { %4106 = vst [vmem:[%s8929_s27 + $0xc8] sm:$0xff] %v4074_v56  ;;  %v3999_v38 = vadd.f32 %v8913_v60, %v3998_v58  ;;  %v4866_v30 = vpop.f32.mrb[54].mxu1 }
 0x764   : > { %v4047_v19 = vmul.f32 %v8915_v24, %v4007_v14  ;;  %v4010_v2 = vadd.f32 %v4866_v30, %v8913_v60  ;;  %v4001_v47 = vpop.f32.mrb[55].mxu1 }
 0x765   : > { %v4045_v63 = vmul.f32 %v8915_v24, %v3999_v38  ;;  %v4002_v21 = vadd.f32 %v8913_v60, %v4001_v47  ;;  %v9752_v60 = vld [vmem:[#allocation58_spill] sm:$0xff] }
 0x766   : > { %v4079_v25 = vadd.f32 %v4047_v19, %v9748_v13  ;;  %v4048_v55 = vmul.f32 %v8915_v24, %v4010_v2 }
 0x767   : > { %v4077_v39 = vadd.f32 %v4045_v63, %v9749_v6  ;;  %v4046_v45 = vmul.f32 %v8915_v24, %v4002_v21 }
 0x768   : > { %4111 = vst [vmem:[%s8929_s27 + $0xf0] sm:$0xff] %v4079_v25  ;;  %v4080_v52 = vadd.f32 %v4048_v55, %v9750_v26 }
 0x769   : > { %4109 = vst [vmem:[%s8929_s27 + $0xe0] sm:$0xff] %v4077_v39  ;;  %v4078_v4 = vadd.f32 %v4046_v45, %v9752_v60 }
 0x76a   : > { %4112 = vst [vmem:[%s8929_s27 + $0xf8] sm:$0xff] %v4080_v52 }
 0x76b   : > { %4110 = vst [vmem:[%s8929_s27 + $0xe8] sm:$0xff] %v4078_v4 }
 0x76c   : > { %5782 = shalt.err (!%p5779_p0)
}
 0x76d   : > { %s5783_s10 = scalar_lea.hbm %s9050_s26, 4096  ;;  %s5787_s1 = scalar_lea.hbm %s9751_s11, 8192 }
 0x76e   : > { %p5784_p5 = scmp.ne.s32.totalorder %s9050_s26, %s5783_s10  ;;  %p5788_p7 = scmp.lt.u32.totalorder %s9050_s26, %s9751_s11 }
 0x76f   : > { %p5789_p6 = scmp.lt.u32.totalorder %s5787_s1, %s5783_s10  ;;  %p5791_p13 = scmp.lt.u32.totalorder %s5783_s10, %s9050_s26 }
 0x770   : > { %p5785_p4 = pnand %p5784_p5, %p9753_p9 }
 0x771   : > { %p5790_p10 = por %p5789_p6, %p5788_p7 }
 0x772   : > { %p5786_p2 = pneg %p5785_p4 }
 0x773   : > { %p5792_p3 = por %p5791_p13, %p5790_p10 }
 0x775   : > { %p5793_p11 = pnand %p5792_p3, %p5786_p2 }
 0x777   : > { %5796 = shalt.err (!%p5793_p11)
}
 0x778   : > { %s5906_s16 = smov 128   ;;  %s5907_s29 = smov 8  }
 0x779   : > { %4941 = dma.vmem_to_hbm [thread:$0]  (%p9753_p9), %s9052_s5, 4096, %s9050_s26, %s4114_s18, %s5906_s16, %s5906_s16, %s5907_s29  }
 0x77a PF: > { %s9754_s2 = sld [smem:[#allocation47_spill]]  ;;  %s9755_s3 = sld [smem:[#allocation43_spill]] }
 0x77b   : > { %s4145_s27 = sand.u32 1, %s5863_s21  }
 0x77c   : > { %s4146_s17 = scalar_lea.sflag [#allocation5], %s4145_s27 }
 0x780   : > { %p9756_p12 = scmp.ne.s32.totalorder %s9754_s2, 0  ;;  %p9757_p8 = scmp.ge.s32.totalorder %s9755_s3, 2 }
 0x782   : > { %p4994_p1 = pnand %p9757_p8, %p9756_p12 }
 0x784   : > { %5858 = dma.done.wait (!%p4994_p1), %s4146_s17, 4096  }
 0x785   : > { %5860 = vsyncadd (!%p4994_p1), %s4146_s17, 4294963200  ;;  %s42_s26 = sadd.s32 1, %s9755_s3   ;;  %s9758_s9 = sld [smem:[#allocation40_spill]] }
 0x786   : > { %p39_p0 = scmp.ge.s32.totalorder %s42_s26, 4   ;;  %s9759_s23 = sld [smem:[#allocation46_spill]] }
 0x787   : > { %s9760_s24 = sld [smem:[#allocation42_spill]]  ;;  %s9761_s25 = sld [smem:[#allocation45_spill]] }
 0x788   : > { %s9762_s21 = smov %s5867_s22  ;;  %41 = sbr.rel (!%p39_p0) target bundleno = 33 (0x21), region = 208 }
 0x78b   : > { %s9763_s22 = smov %s9758_s9 }
 0x78f   :  { %4151 = vsyncpa [#allocation4], 1 }
 0x790   :  { %4153 = vsyncpa [#allocation4 + $0x1], 1 }
 0x791   :  { %4154 = vsyncpa [#allocation7], 1 }
 0x792   :  { %4156 = vsyncpa [#allocation7 + $0x1], 1 }
 0x793   :  { %4157 = vsyncpa [#allocation10], 1 }
 0x794   :  { %4158 = vsyncpa [#allocation13], 1 }
 0x795   :  { %4159 = vsyncpa [#allocation16], 1 }
 0x796   :  { %4160 = vsyncpa [#allocation19], 1 }
 0x797   :  { %4161 = vsyncpa [#allocation22], 1 }
 0x798   :  { %4162 = vsyncpa [#allocation25], 1 }
 0x799   :  { %4163 = vsyncpa [#allocation28], 1 }
 0x79a   :  { %4164 = vsyncpa [#allocation5], 1 }
 0x79b   :  { %4166 = vsyncpa [#allocation5 + $0x1], 1 }

</bundles_post_ra>
